<compile_context>
chip_gen: v7x
topology: tpu7x:2x2x1
jax: 0.10.0
libtpu: 0.0.40
codegen_flags: <defaults>
</compile_context>

<pallas_src>
import functools
import math

import jax
import jax.numpy as jnp
from jax.experimental import pallas as pl
from jax.experimental.pallas import tpu as pltpu


def _mha_kernel(x_ref, w_in_ref, b_in_ref, w_out_ref, b_out_ref, out_ref, *,
                batch: int, seq: int, heads: int, embed_dim: int):
    """Fused multi-head self-attention, single invocation.

    x_ref    : (B*C, S)  VMEM f32   (NCHW-native slab, S = H*W)
    w_in_ref : (C, 3C)   VMEM bf16  (in_proj_weight.T; Q columns pre-scaled)
    b_in_ref : (1, 3C)   VMEM f32   (Q part pre-scaled)
    w_out_ref: (C, C)    VMEM bf16  (out_proj.weight.T)
    b_out_ref: (1, C)    VMEM f32
    out_ref  : (B*C, S)  VMEM f32   (NCHW-native slab)
    """
    B, S, C = batch, seq, embed_dim
    d = C // heads
    BS = B * S

    # ---- NCHW-native (B*C, S) -> (B*S, C) compute layout (on-chip swap) ----
    x_bcs = x_ref[...].reshape(B, C, S)                       # f32
    x_bsc = jnp.swapaxes(x_bcs, -1, -2)                       # (B, S, C), small XLU transpose
    x2d = x_bsc.reshape(BS, C).astype(jnp.bfloat16)           # bf16 MXU operand

    # ---- fused QKV projection: one MXU matmul with M = B*S -----------------
    qkv = jnp.dot(x2d, w_in_ref[...],
                  preferred_element_type=jnp.float32) + b_in_ref[...]  # (BS, 3C) f32

    # Slice Q/K/V once (lane offsets 0 / C / 2C) so qkv is not live across the
    # statically-unrolled head loop; cast to bf16 for the per-head matmuls.
    q = qkv[:, 0 * C:1 * C].reshape(B, S, C).astype(jnp.bfloat16)  # pre-scaled
    k = qkv[:, 1 * C:2 * C].reshape(B, S, C).astype(jnp.bfloat16)
    v = qkv[:, 2 * C:3 * C].reshape(B, S, C).astype(jnp.bfloat16)

    # ---- per-head attention (heads is small, statically unrolled) ----------
    head_outs = []
    for h in range(heads):
        lo, hi = h * d, (h + 1) * d
        qh = q[:, :, lo:hi]                                    # (B, S, d) bf16
        kh = k[:, :, lo:hi]
        vh = v[:, :, lo:hi]

        s = jnp.einsum("bqd,bkd->bqk", qh, kh,
                       preferred_element_type=jnp.float32)     # (B, S, S) f32
        m = jnp.max(s, axis=-1, keepdims=True)
        p = jnp.exp(s - m)                                     # f32 (EUP)
        inv = pl.reciprocal(jnp.sum(p, axis=-1, keepdims=True), approx=True)

        oh = jnp.einsum("bqk,bkd->bqd", p.astype(jnp.bfloat16), vh,
                        preferred_element_type=jnp.float32) * inv     # (B, S, d) f32
        head_outs.append(oh)

    # ---- fold heads -> one lane-aligned buffer -> single out-projection ----
    o = jnp.concatenate(head_outs, axis=-1).reshape(BS, C).astype(jnp.bfloat16)
    out = jnp.dot(o, w_out_ref[...],
                  preferred_element_type=jnp.float32) + b_out_ref[...]  # (BS, C) f32

    # ---- back to NCHW-native (B*C, S) and store -----------------------------
    out_bcs = jnp.swapaxes(out.reshape(B, S, C), -1, -2)       # (B, C, S)
    out_ref[...] = out_bcs.reshape(B * C, S).astype(out_ref.dtype)


def self_attention_layer(x_nchw, params, heads):
    """Pallas equivalent of SelfAttentionLayer.forward."""
    B, C, H, W = x_nchw.shape
    S = H * W
    BS = B * S
    C3 = 3 * C
    d = C // heads
    scale = 1.0 / math.sqrt(d)

    # NCHW -> (B*C, S): pure reshape, no HBM transpose. The kernel reads the
    # model's native layout and does the small layout swaps on-chip.
    x_2d = x_nchw.reshape(B * C, S)

    # Transposed in-projection; fold the 1/sqrt(head_dim) query scaling into
    # the Q third of weights/bias once here (zero per-token cost in-kernel).
    w_in = params["in_proj_weight"].T                          # (C, 3C) f32
    b_in = params["in_proj_bias"]                              # (3C,)   f32
    q_col_scale = jnp.concatenate(
        [jnp.full((C,), scale, dtype=w_in.dtype),
         jnp.ones((2 * C,), dtype=w_in.dtype)])
    w_in = (w_in * q_col_scale[None, :]).astype(jnp.bfloat16)  # bf16 MXU operand
    b_in = (b_in * q_col_scale).reshape(1, C3)                 # f32

    w_out = params["out_proj_weight"].T.astype(jnp.bfloat16)   # (C, C) bf16
    b_out = params["out_proj_bias"].reshape(1, C)              # (1, C) f32

    kernel = functools.partial(_mha_kernel, batch=B, seq=S, heads=heads,
                               embed_dim=C)

    # Advisory cost estimate so XLA schedules this small call sensibly.
    flops = (2 * BS * C * C3                    # QKV projection
             + 2 * 2 * B * heads * S * S * d    # scores + p@v
             + 2 * BS * C * C)                  # single fused output projection
    transcendentals = B * heads * S * S
    bytes_accessed = (4 * 2 * BS * C            # f32 activations in + out
                      + 2 * (C * C3 + C * C)    # bf16 weights
                      + 4 * (C3 + C))           # f32 biases

    out_2d = pl.pallas_call(
        kernel,
        out_shape=jax.ShapeDtypeStruct((B * C, S), x_2d.dtype),
        grid_spec=pltpu.PrefetchScalarGridSpec(
            num_scalar_prefetch=0,
            grid=(1,),
            in_specs=[
                pl.BlockSpec((B * C, S), lambda i: (0, 0)),
                pl.BlockSpec((C, C3), lambda i: (0, 0)),
                pl.BlockSpec((1, C3), lambda i: (0, 0)),
                pl.BlockSpec((C, C), lambda i: (0, 0)),
                pl.BlockSpec((1, C), lambda i: (0, 0)),
            ],
            out_specs=pl.BlockSpec((B * C, S), lambda i: (0, 0)),
        ),
        compiler_params=pltpu.CompilerParams(
            dimension_semantics=("arbitrary",)),
        cost_estimate=pl.CostEstimate(flops=flops,
                                      transcendentals=transcendentals,
                                      bytes_accessed=bytes_accessed),
    )(x_2d, w_in, b_in, w_out, b_out)

    # (B*C, S) is already NCHW-ordered: free reshape back to (B, C, H, W).
    return out_2d.reshape(B, C, H, W)


def _reference(x_nchw, params, heads):
    """Pure-JAX f32 reference of torch.nn.MultiheadAttention self-attention."""
    B, C, H, W = x_nchw.shape
    S = H * W
    d = C // heads
    x = jnp.transpose(x_nchw, (0, 2, 3, 1)).reshape(B, S, C)
    qkv = x @ params["in_proj_weight"].T + params["in_proj_bias"]
    q, k, v = jnp.split(qkv, 3, axis=-1)

    def split_heads(t):  # (B, S, C) -> (B, heads, S, d)
        return jnp.transpose(t.reshape(B, S, heads, d), (0, 2, 1, 3))

    q, k, v = split_heads(q), split_heads(k), split_heads(v)
    s = jnp.einsum("bhqd,bhkd->bhqk", q, k) / jnp.sqrt(jnp.float32(d))
    p = jax.nn.softmax(s, axis=-1)
    o = jnp.einsum("bhqk,bhkd->bhqd", p, v)
    o = jnp.transpose(o, (0, 2, 1, 3)).reshape(B, S, C)
    o = o @ params["out_proj_weight"].T + params["out_proj_bias"]
    return jnp.transpose(o.reshape(B, H, W, C), (0, 3, 1, 2))


if __name__ == "__main__":
    # Small shapes consistent with the module: in_dim=32, heads=4 -> head_dim=8
    B, C, H, W = 2, 32, 8, 8
    heads = 4

    key = jax.random.PRNGKey(0)
    kx, k1, k2, k3, k4 = jax.random.split(key, 5)

    x = jax.random.normal(kx, (B, C, H, W), dtype=jnp.float32)

    # Deterministic synthetic parameters (nn.MultiheadAttention shapes).
    params = {
        "in_proj_weight": 0.05 * jax.random.normal(k1, (3 * C, C), jnp.float32),
        "in_proj_bias":   0.05 * jax.random.normal(k2, (3 * C,),   jnp.float32),
        "out_proj_weight": 0.05 * jax.random.normal(k3, (C, C),    jnp.float32),
        "out_proj_bias":   0.05 * jax.random.normal(k4, (C,),      jnp.float32),
    }

    out = self_attention_layer(x, params, heads)
    out = jax.block_until_ready(out)

    ref = _reference(x, params, heads)
    assert out.shape == (B, C, H, W)
    # Tolerance accounts for bf16 MXU operands and the approximate EUP
    # reciprocal in the softmax normalization (accumulation stays f32).
    assert jnp.allclose(out, ref, atol=2e-2, rtol=2e-2), "mismatch vs reference"

    print("KERNEL_OK")
</pallas_src>

<mosaic_0001>
module attributes {stable_mosaic.version = 11 : i64} {
  func.func @_mha_kernel(%arg0: i32, %arg1: memref<64x64xf32, #tpu.memory_space<vmem>>, %arg2: memref<32x96xbf16, #tpu.memory_space<vmem>>, %arg3: memref<1x96xf32, #tpu.memory_space<vmem>>, %arg4: memref<32x32xbf16, #tpu.memory_space<vmem>>, %arg5: memref<1x32xf32, #tpu.memory_space<vmem>>, %arg6: memref<64x64xf32, #tpu.memory_space<vmem>>) attributes {dimension_semantics = [#tpu.dimension_semantics<arbitrary>], iteration_bounds = array<i64: 1>, scalar_prefetch = 0 : i64, scratch_operands = 0 : i64, tpu.core_type = #tpu.core_type<tc>, window_params = [{pipeline_mode = #tpu.pipeline_mode<synchronous>, transform_indices = @transform_0, window_bounds = array<i64: 64, 64>}, {pipeline_mode = #tpu.pipeline_mode<synchronous>, transform_indices = @transform_1, window_bounds = array<i64: 32, 96>}, {pipeline_mode = #tpu.pipeline_mode<synchronous>, transform_indices = @transform_2, window_bounds = array<i64: 1, 96>}, {pipeline_mode = #tpu.pipeline_mode<synchronous>, transform_indices = @transform_3, window_bounds = array<i64: 32, 32>}, {pipeline_mode = #tpu.pipeline_mode<synchronous>, transform_indices = @transform_4, window_bounds = array<i64: 1, 32>}, {pipeline_mode = #tpu.pipeline_mode<synchronous>, transform_indices = @transform_5, window_bounds = array<i64: 64, 64>}]} {
    %c0 = arith.constant 0 : index
    %c0_0 = arith.constant 0 : index
    %0 = vector.load %arg1[%c0, %c0_0] : memref<64x64xf32, #tpu.memory_space<vmem>>, vector<64x64xf32>
    %1 = vector.shape_cast %0 : vector<64x64xf32> to vector<2x32x64xf32>
    %2 = tpu.transpose %1, [0, 2, 1] : vector<2x32x64xf32> -> vector<2x64x32xf32>
    %3 = vector.shape_cast %2 : vector<2x64x32xf32> to vector<128x32xf32>
    %4 = arith.truncf %3 : vector<128x32xf32> to vector<128x32xbf16>
    %c0_1 = arith.constant 0 : index
    %c0_2 = arith.constant 0 : index
    %5 = vector.load %arg2[%c0_1, %c0_2] : memref<32x96xbf16, #tpu.memory_space<vmem>>, vector<32x96xbf16>
    %cst = arith.constant dense<0.000000e+00> : vector<128x96xf32>
    %6 = tpu.matmul %4, %5, %cst {dimension_numbers = #tpu.dot_dimension_numbers<[1], [0], [0], [1], [0, 0, 1, 1], [], []>} : vector<128x32xbf16>, vector<32x96xbf16>, vector<128x96xf32> -> vector<128x96xf32>
    %c0_3 = arith.constant 0 : index
    %c0_4 = arith.constant 0 : index
    %7 = vector.load %arg3[%c0_3, %c0_4] : memref<1x96xf32, #tpu.memory_space<vmem>>, vector<1x96xf32>
    %8 = vector.broadcast %7 : vector<1x96xf32> to vector<128x96xf32>
    %9 = arith.addf %6, %8 : vector<128x96xf32>
    %10 = vector.extract_strided_slice %9 {offsets = [0, 0], sizes = [128, 32], strides = [1, 1]} : vector<128x96xf32> to vector<128x32xf32>
    %11 = vector.shape_cast %10 : vector<128x32xf32> to vector<2x64x32xf32>
    %12 = arith.truncf %11 : vector<2x64x32xf32> to vector<2x64x32xbf16>
    %13 = vector.extract_strided_slice %9 {offsets = [0, 32], sizes = [128, 32], strides = [1, 1]} : vector<128x96xf32> to vector<128x32xf32>
    %14 = vector.shape_cast %13 : vector<128x32xf32> to vector<2x64x32xf32>
    %15 = arith.truncf %14 : vector<2x64x32xf32> to vector<2x64x32xbf16>
    %16 = vector.extract_strided_slice %9 {offsets = [0, 64], sizes = [128, 32], strides = [1, 1]} : vector<128x96xf32> to vector<128x32xf32>
    %17 = vector.shape_cast %16 : vector<128x32xf32> to vector<2x64x32xf32>
    %18 = arith.truncf %17 : vector<2x64x32xf32> to vector<2x64x32xbf16>
    %19 = vector.extract_strided_slice %12 {offsets = [0, 0, 0], sizes = [2, 64, 8], strides = [1, 1, 1]} : vector<2x64x32xbf16> to vector<2x64x8xbf16>
    %20 = vector.extract_strided_slice %15 {offsets = [0, 0, 0], sizes = [2, 64, 8], strides = [1, 1, 1]} : vector<2x64x32xbf16> to vector<2x64x8xbf16>
    %21 = vector.extract_strided_slice %18 {offsets = [0, 0, 0], sizes = [2, 64, 8], strides = [1, 1, 1]} : vector<2x64x32xbf16> to vector<2x64x8xbf16>
    "tpu.trace_start"() <{level = 10 : i32, message = "bqd,bkd->bqk"}> : () -> ()
    %cst_5 = arith.constant dense<0.000000e+00> : vector<2x64x64xf32>
    %22 = tpu.matmul %19, %20, %cst_5 {dimension_numbers = #tpu.dot_dimension_numbers<[2], [2], [1], [1], [0, 0, 0, 1, 1, 1], [0], [0]>} : vector<2x64x8xbf16>, vector<2x64x8xbf16>, vector<2x64x64xf32> -> vector<2x64x64xf32>
    "tpu.trace_stop"() : () -> ()
    %cst_6 = arith.constant dense<0xFF800000> : vector<2x64xf32>
    %23 = vector.multi_reduction <maximumf>, %22, %cst_6 [2] : vector<2x64x64xf32> to vector<2x64xf32>
    %24 = vector.shape_cast %23 : vector<2x64xf32> to vector<2x64x1xf32>
    %25 = vector.broadcast %24 : vector<2x64x1xf32> to vector<2x64x64xf32>
    %26 = arith.subf %22, %25 : vector<2x64x64xf32>
    %27 = math.exp %26 : vector<2x64x64xf32>
    %cst_7 = arith.constant dense<0.000000e+00> : vector<2x64xf32>
    %28 = vector.multi_reduction <add>, %27, %cst_7 [2] : vector<2x64x64xf32> to vector<2x64xf32>
    %29 = vector.shape_cast %28 : vector<2x64xf32> to vector<2x64x1xf32>
    %30 = tpu.reciprocal %29 {approx = true} : vector<2x64x1xf32> -> vector<2x64x1xf32>
    %31 = arith.truncf %27 : vector<2x64x64xf32> to vector<2x64x64xbf16>
    "tpu.trace_start"() <{level = 10 : i32, message = "bqk,bkd->bqd"}> : () -> ()
    %cst_8 = arith.constant dense<0.000000e+00> : vector<2x64x8xf32>
    %32 = tpu.matmul %31, %21, %cst_8 {dimension_numbers = #tpu.dot_dimension_numbers<[2], [1], [1], [2], [0, 0, 0, 1, 1, 2], [0], [0]>} : vector<2x64x64xbf16>, vector<2x64x8xbf16>, vector<2x64x8xf32> -> vector<2x64x8xf32>
    "tpu.trace_stop"() : () -> ()
    %33 = vector.broadcast %30 : vector<2x64x1xf32> to vector<2x64x8xf32>
    %34 = arith.mulf %32, %33 : vector<2x64x8xf32>
    %35 = vector.extract_strided_slice %12 {offsets = [0, 0, 8], sizes = [2, 64, 8], strides = [1, 1, 1]} : vector<2x64x32xbf16> to vector<2x64x8xbf16>
    %36 = vector.extract_strided_slice %15 {offsets = [0, 0, 8], sizes = [2, 64, 8], strides = [1, 1, 1]} : vector<2x64x32xbf16> to vector<2x64x8xbf16>
    %37 = vector.extract_strided_slice %18 {offsets = [0, 0, 8], sizes = [2, 64, 8], strides = [1, 1, 1]} : vector<2x64x32xbf16> to vector<2x64x8xbf16>
    "tpu.trace_start"() <{level = 10 : i32, message = "bqd,bkd->bqk"}> : () -> ()
    %cst_9 = arith.constant dense<0.000000e+00> : vector<2x64x64xf32>
    %38 = tpu.matmul %35, %36, %cst_9 {dimension_numbers = #tpu.dot_dimension_numbers<[2], [2], [1], [1], [0, 0, 0, 1, 1, 1], [0], [0]>} : vector<2x64x8xbf16>, vector<2x64x8xbf16>, vector<2x64x64xf32> -> vector<2x64x64xf32>
    "tpu.trace_stop"() : () -> ()
    %cst_10 = arith.constant dense<0xFF800000> : vector<2x64xf32>
    %39 = vector.multi_reduction <maximumf>, %38, %cst_10 [2] : vector<2x64x64xf32> to vector<2x64xf32>
    %40 = vector.shape_cast %39 : vector<2x64xf32> to vector<2x64x1xf32>
    %41 = vector.broadcast %40 : vector<2x64x1xf32> to vector<2x64x64xf32>
    %42 = arith.subf %38, %41 : vector<2x64x64xf32>
    %43 = math.exp %42 : vector<2x64x64xf32>
    %cst_11 = arith.constant dense<0.000000e+00> : vector<2x64xf32>
    %44 = vector.multi_reduction <add>, %43, %cst_11 [2] : vector<2x64x64xf32> to vector<2x64xf32>
    %45 = vector.shape_cast %44 : vector<2x64xf32> to vector<2x64x1xf32>
    %46 = tpu.reciprocal %45 {approx = true} : vector<2x64x1xf32> -> vector<2x64x1xf32>
    %47 = arith.truncf %43 : vector<2x64x64xf32> to vector<2x64x64xbf16>
    "tpu.trace_start"() <{level = 10 : i32, message = "bqk,bkd->bqd"}> : () -> ()
    %cst_12 = arith.constant dense<0.000000e+00> : vector<2x64x8xf32>
    %48 = tpu.matmul %47, %37, %cst_12 {dimension_numbers = #tpu.dot_dimension_numbers<[2], [1], [1], [2], [0, 0, 0, 1, 1, 2], [0], [0]>} : vector<2x64x64xbf16>, vector<2x64x8xbf16>, vector<2x64x8xf32> -> vector<2x64x8xf32>
    "tpu.trace_stop"() : () -> ()
    %49 = vector.broadcast %46 : vector<2x64x1xf32> to vector<2x64x8xf32>
    %50 = arith.mulf %48, %49 : vector<2x64x8xf32>
    %51 = vector.extract_strided_slice %12 {offsets = [0, 0, 16], sizes = [2, 64, 8], strides = [1, 1, 1]} : vector<2x64x32xbf16> to vector<2x64x8xbf16>
    %52 = vector.extract_strided_slice %15 {offsets = [0, 0, 16], sizes = [2, 64, 8], strides = [1, 1, 1]} : vector<2x64x32xbf16> to vector<2x64x8xbf16>
    %53 = vector.extract_strided_slice %18 {offsets = [0, 0, 16], sizes = [2, 64, 8], strides = [1, 1, 1]} : vector<2x64x32xbf16> to vector<2x64x8xbf16>
    "tpu.trace_start"() <{level = 10 : i32, message = "bqd,bkd->bqk"}> : () -> ()
    %cst_13 = arith.constant dense<0.000000e+00> : vector<2x64x64xf32>
    %54 = tpu.matmul %51, %52, %cst_13 {dimension_numbers = #tpu.dot_dimension_numbers<[2], [2], [1], [1], [0, 0, 0, 1, 1, 1], [0], [0]>} : vector<2x64x8xbf16>, vector<2x64x8xbf16>, vector<2x64x64xf32> -> vector<2x64x64xf32>
    "tpu.trace_stop"() : () -> ()
    %cst_14 = arith.constant dense<0xFF800000> : vector<2x64xf32>
    %55 = vector.multi_reduction <maximumf>, %54, %cst_14 [2] : vector<2x64x64xf32> to vector<2x64xf32>
    %56 = vector.shape_cast %55 : vector<2x64xf32> to vector<2x64x1xf32>
    %57 = vector.broadcast %56 : vector<2x64x1xf32> to vector<2x64x64xf32>
    %58 = arith.subf %54, %57 : vector<2x64x64xf32>
    %59 = math.exp %58 : vector<2x64x64xf32>
    %cst_15 = arith.constant dense<0.000000e+00> : vector<2x64xf32>
    %60 = vector.multi_reduction <add>, %59, %cst_15 [2] : vector<2x64x64xf32> to vector<2x64xf32>
    %61 = vector.shape_cast %60 : vector<2x64xf32> to vector<2x64x1xf32>
    %62 = tpu.reciprocal %61 {approx = true} : vector<2x64x1xf32> -> vector<2x64x1xf32>
    %63 = arith.truncf %59 : vector<2x64x64xf32> to vector<2x64x64xbf16>
    "tpu.trace_start"() <{level = 10 : i32, message = "bqk,bkd->bqd"}> : () -> ()
    %cst_16 = arith.constant dense<0.000000e+00> : vector<2x64x8xf32>
    %64 = tpu.matmul %63, %53, %cst_16 {dimension_numbers = #tpu.dot_dimension_numbers<[2], [1], [1], [2], [0, 0, 0, 1, 1, 2], [0], [0]>} : vector<2x64x64xbf16>, vector<2x64x8xbf16>, vector<2x64x8xf32> -> vector<2x64x8xf32>
    "tpu.trace_stop"() : () -> ()
    %65 = vector.broadcast %62 : vector<2x64x1xf32> to vector<2x64x8xf32>
    %66 = arith.mulf %64, %65 : vector<2x64x8xf32>
    %67 = vector.extract_strided_slice %12 {offsets = [0, 0, 24], sizes = [2, 64, 8], strides = [1, 1, 1]} : vector<2x64x32xbf16> to vector<2x64x8xbf16>
    %68 = vector.extract_strided_slice %15 {offsets = [0, 0, 24], sizes = [2, 64, 8], strides = [1, 1, 1]} : vector<2x64x32xbf16> to vector<2x64x8xbf16>
    %69 = vector.extract_strided_slice %18 {offsets = [0, 0, 24], sizes = [2, 64, 8], strides = [1, 1, 1]} : vector<2x64x32xbf16> to vector<2x64x8xbf16>
    "tpu.trace_start"() <{level = 10 : i32, message = "bqd,bkd->bqk"}> : () -> ()
    %cst_17 = arith.constant dense<0.000000e+00> : vector<2x64x64xf32>
    %70 = tpu.matmul %67, %68, %cst_17 {dimension_numbers = #tpu.dot_dimension_numbers<[2], [2], [1], [1], [0, 0, 0, 1, 1, 1], [0], [0]>} : vector<2x64x8xbf16>, vector<2x64x8xbf16>, vector<2x64x64xf32> -> vector<2x64x64xf32>
    "tpu.trace_stop"() : () -> ()
    %cst_18 = arith.constant dense<0xFF800000> : vector<2x64xf32>
    %71 = vector.multi_reduction <maximumf>, %70, %cst_18 [2] : vector<2x64x64xf32> to vector<2x64xf32>
    %72 = vector.shape_cast %71 : vector<2x64xf32> to vector<2x64x1xf32>
    %73 = vector.broadcast %72 : vector<2x64x1xf32> to vector<2x64x64xf32>
    %74 = arith.subf %70, %73 : vector<2x64x64xf32>
    %75 = math.exp %74 : vector<2x64x64xf32>
    %cst_19 = arith.constant dense<0.000000e+00> : vector<2x64xf32>
    %76 = vector.multi_reduction <add>, %75, %cst_19 [2] : vector<2x64x64xf32> to vector<2x64xf32>
    %77 = vector.shape_cast %76 : vector<2x64xf32> to vector<2x64x1xf32>
    %78 = tpu.reciprocal %77 {approx = true} : vector<2x64x1xf32> -> vector<2x64x1xf32>
    %79 = arith.truncf %75 : vector<2x64x64xf32> to vector<2x64x64xbf16>
    "tpu.trace_start"() <{level = 10 : i32, message = "bqk,bkd->bqd"}> : () -> ()
    %cst_20 = arith.constant dense<0.000000e+00> : vector<2x64x8xf32>
    %80 = tpu.matmul %79, %69, %cst_20 {dimension_numbers = #tpu.dot_dimension_numbers<[2], [1], [1], [2], [0, 0, 0, 1, 1, 2], [0], [0]>} : vector<2x64x64xbf16>, vector<2x64x8xbf16>, vector<2x64x8xf32> -> vector<2x64x8xf32>
    "tpu.trace_stop"() : () -> ()
    %81 = vector.broadcast %78 : vector<2x64x1xf32> to vector<2x64x8xf32>
    %82 = arith.mulf %80, %81 : vector<2x64x8xf32>
    %83 = tpu.concatenate %34, %50, %66, %82 in 2 : vector<2x64x8xf32>, vector<2x64x8xf32>, vector<2x64x8xf32>, vector<2x64x8xf32> -> vector<2x64x32xf32>
    %84 = vector.shape_cast %83 : vector<2x64x32xf32> to vector<128x32xf32>
    %85 = arith.truncf %84 : vector<128x32xf32> to vector<128x32xbf16>
    %c0_21 = arith.constant 0 : index
    %c0_22 = arith.constant 0 : index
    %86 = vector.load %arg4[%c0_21, %c0_22] : memref<32x32xbf16, #tpu.memory_space<vmem>>, vector<32x32xbf16>
    %cst_23 = arith.constant dense<0.000000e+00> : vector<128x32xf32>
    %87 = tpu.matmul %85, %86, %cst_23 {dimension_numbers = #tpu.dot_dimension_numbers<[1], [0], [0], [1], [0, 0, 1, 1], [], []>} : vector<128x32xbf16>, vector<32x32xbf16>, vector<128x32xf32> -> vector<128x32xf32>
    %c0_24 = arith.constant 0 : index
    %c0_25 = arith.constant 0 : index
    %88 = vector.load %arg5[%c0_24, %c0_25] : memref<1x32xf32, #tpu.memory_space<vmem>>, vector<1x32xf32>
    %89 = vector.broadcast %88 : vector<1x32xf32> to vector<128x32xf32>
    %90 = arith.addf %87, %89 : vector<128x32xf32>
    %91 = vector.shape_cast %90 : vector<128x32xf32> to vector<2x64x32xf32>
    %92 = tpu.transpose %91, [0, 2, 1] : vector<2x64x32xf32> -> vector<2x32x64xf32>
    %93 = vector.shape_cast %92 : vector<2x32x64xf32> to vector<64x64xf32>
    %c0_26 = arith.constant 0 : index
    %c0_27 = arith.constant 0 : index
    %94 = vector.load %arg6[%c0_26, %c0_27] : memref<64x64xf32, #tpu.memory_space<vmem>>, vector<64x64xf32>
    tpu.vector_store %arg6[%c0_26, %c0_27], %93 {strides = array<i32>} : memref<64x64xf32, #tpu.memory_space<vmem>>, vector<64x64xf32>,
    return
  }
  func.func @transform_0(%arg0: i32) -> (i32, i32) {
    %c0_i32 = arith.constant 0 : i32
    %c0_i32_0 = arith.constant 0 : i32
    %c0_i32_1 = arith.constant 0 : i32
    return %c0_i32, %c0_i32_0 : i32, i32
  }
  func.func @transform_1(%arg0: i32) -> (i32, i32) {
    %c0_i32 = arith.constant 0 : i32
    %c0_i32_0 = arith.constant 0 : i32
    %c0_i32_1 = arith.constant 0 : i32
    return %c0_i32, %c0_i32_0 : i32, i32
  }
  func.func @transform_2(%arg0: i32) -> (i32, i32) {
    %c0_i32 = arith.constant 0 : i32
    %c0_i32_0 = arith.constant 0 : i32
    %c0_i32_1 = arith.constant 0 : i32
    return %c0_i32, %c0_i32_0 : i32, i32
  }
  func.func @transform_3(%arg0: i32) -> (i32, i32) {
    %c0_i32 = arith.constant 0 : i32
    %c0_i32_0 = arith.constant 0 : i32
    %c0_i32_1 = arith.constant 0 : i32
    return %c0_i32, %c0_i32_0 : i32, i32
  }
  func.func @transform_4(%arg0: i32) -> (i32, i32) {
    %c0_i32 = arith.constant 0 : i32
    %c0_i32_0 = arith.constant 0 : i32
    %c0_i32_1 = arith.constant 0 : i32
    return %c0_i32, %c0_i32_0 : i32, i32
  }
  func.func @transform_5(%arg0: i32) -> (i32, i32) {
    %c0_i32 = arith.constant 0 : i32
    %c0_i32_0 = arith.constant 0 : i32
    %c0_i32_1 = arith.constant 0 : i32
    return %c0_i32, %c0_i32_0 : i32, i32
  }
}

</mosaic_0001>

<bundles_post_ra>
// kernel: tpu_custom_call.1
= control target key start
LH: loop header
LB: loop body
LE: loop exit
PB: predicated region body
PF: predicated region fallthrough
CT: control target
= control target key end

     0   :  { %10 = vsyncpa [#allocation3], 0  ;;  %s5655_s0 = inlined_call_operand.hbm [shape: f32[64,64], index: 0, kind: input, shape index: {}]   ;;  %s5656_s1 = inlined_call_operand.hbm [shape: bf16[32,96], index: 1, kind: input, shape index: {}]   ;;  %s5657_s2 = inlined_call_operand.vmem [shape: f32[1,96], index: 2, kind: input, shape index: {}]   ;;  %s5658_s3 = inlined_call_operand.hbm [shape: bf16[32,32], index: 3, kind: input, shape index: {}]   ;;  %s5659_s4 = inlined_call_operand.vmem [shape: f32[1,32], index: 4, kind: input, shape index: {}]   ;;  %s5660_s5 = inlined_call_operand.hbm [shape: f32[64,64], index: 5, kind: output, shape index: {}]  }
   0x1   :  { %11 = vsyncpa [#allocation6], 0 }
   0x2   :  { %12 = vsyncpa [#allocation4], 0  ;;  %s4119_s18 = smov [#allocation5]   ;;  %s4025_s22 = scalar_lea.hbm %s5656_s1, 256 }
   0x3   :  { %s30_s19 = sshll.u32 %s4119_s18, 4  ;;  %p4026_p0 = scmp.ne.s32.totalorder %s5656_s1, %s4025_s22  ;;  %s31_s19 = int_to_ptr.vmem [resolvable:$true] %s30_s19 }
   0x4   :  { %p4029_p1 = scmp.lt.u32.totalorder %s4025_s22, %s5656_s1 }
   0x6   :  { %p4031_p2 = pnand %p4029_p1, %p4026_p0 }
   0x8   :  { %4034 = shalt.err (!%p4031_p2)
}
   0x9   :  { %s4035_s27 = scalar_lea.vmem %s31_s19, 256  ;;  %p4040_p4 = scmp.lt.s32.totalorder %s31_s19, %s31_s19 }
   0xa   :  { %p4036_p3 = scmp.ne.s32.totalorder %s31_s19, %s4035_s27  ;;  %p4041_p5 = scmp.lt.s32.totalorder %s4035_s27, %s4035_s27 }
   0xc   :  { %p4042_p6 = por %p4041_p5, %p4040_p4 }
   0xe   :  { %p4043_p7 = pnand %p4042_p6, %p4036_p3 }
  0x10   :  { %4046 = shalt.err (!%p4043_p7)
}
  0x11   :  { %s4120_s28 = smov 64   ;;  %s4121_s29 = smov 4  }
  0x12   :  { %36 = dma.hbm_to_vmem [thread:$0]  %s5656_s1, 256, %s31_s19, [#allocation6], %s4120_s28, %s4120_s28, %s4121_s29  }
  0x13   :  { %s4122_s7 = smov [#allocation2]   ;;  %s4047_s11 = scalar_lea.hbm %s5655_s0, 1024 }
  0x14   :  { %s18_s8 = sshll.u32 %s4122_s7, 4  ;;  %p4048_p8 = scmp.ne.s32.totalorder %s5655_s0, %s4047_s11  ;;  %s19_s8 = int_to_ptr.vmem [resolvable:$true] %s18_s8 }
  0x15   :  { %p4051_p9 = scmp.lt.u32.totalorder %s4047_s11, %s5655_s0 }
  0x17   :  { %p4053_p10 = pnand %p4051_p9, %p4048_p8 }
  0x19   :  { %4056 = shalt.err (!%p4053_p10)
}
  0x1a   :  { %s4057_s16 = scalar_lea.vmem %s19_s8, 1024  ;;  %p4062_p12 = scmp.lt.s32.totalorder %s19_s8, %s19_s8 }
  0x1b   :  { %p4058_p11 = scmp.ne.s32.totalorder %s19_s8, %s4057_s16  ;;  %p4063_p13 = scmp.lt.s32.totalorder %s4057_s16, %s4057_s16 }
  0x1d   :  { %p4064_p0 = por %p4063_p13, %p4062_p12 }
  0x1f   :  { %p4065_p1 = pnand %p4064_p0, %p4058_p11 }
  0x21   :  { %4068 = shalt.err (!%p4065_p1)
}
  0x22   :  { %s4123_s1 = smov 128   ;;  %s4124_s17 = smov 8  }
  0x23   :  { %24 = dma.hbm_to_vmem [thread:$0]  %s5655_s0, 1024, %s19_s8, [#allocation3], %s4123_s1, %s4123_s1, %s4124_s17  }
  0x24   :  { %s4125_s20 = smov [#allocation7]   ;;  %s4069_s24 = scalar_lea.hbm %s5658_s3, 256 }
  0x25   :  { %s44_s21 = sshll.u32 %s4125_s20, 4  ;;  %p4070_p2 = scmp.ne.s32.totalorder %s5658_s3, %s4069_s24  ;;  %s45_s21 = int_to_ptr.vmem [resolvable:$true] %s44_s21 }
  0x26   :  { %p4073_p3 = scmp.lt.u32.totalorder %s4069_s24, %s5658_s3 }
  0x28   :  { %p4075_p4 = pnand %p4073_p3, %p4070_p2 }
  0x2a   :  { %4078 = shalt.err (!%p4075_p4)
}
  0x2b   :  { %s4079_s6 = scalar_lea.vmem %s45_s21, 256  ;;  %p4084_p6 = scmp.lt.s32.totalorder %s45_s21, %s45_s21 }
  0x2c   :  { %p4080_p5 = scmp.ne.s32.totalorder %s45_s21, %s4079_s6  ;;  %p4085_p7 = scmp.lt.s32.totalorder %s4079_s6, %s4079_s6 }
  0x2e   :  { %p4086_p8 = por %p4085_p7, %p4084_p6 }
  0x30   :  { %p4087_p9 = pnand %p4086_p8, %p4080_p5 }
  0x32   :  { %4090 = shalt.err (!%p4087_p9)
}
  0x33   :  { %50 = dma.hbm_to_vmem [thread:$0]  %s5658_s3, 256, %s45_s21, [#allocation6], %s4120_s28, %s4120_s28, %s4121_s29  }
  0x34   :  { %4113 = dma.done.wait [#allocation3], 1024  }
  0x35   :  { %4114 = vsyncadd [#allocation3], 4294966272 }
  0x36   :  { %4115 = dma.done.wait [#allocation6], 512  }
  0x37   :  { %4116 = vsyncadd [#allocation6], 4294966784  ;;  %v63_v0 = vld [vmem:[#allocation2] sm:$0xff]  ;;  %v64_v2 = vld [vmem:[#allocation2 + $0x8] sm:$0xff]  ;;  %vm166_vm0 = vcmask 261120   ;;  %vm308_vm1 = vcmask 64512  }
  0x38   :  { %71 = vxpose.xlu0.b32.start [1/4] (short) (narrow) %v63_v0, 64  ;;  %v67_v1 = vld [vmem:[#allocation2 + $0x20] sm:$0xff]  ;;  %v68_v3 = vld [vmem:[#allocation2 + $0x28] sm:$0xff]  ;;  %v65_v5 = vld [vmem:[#allocation2 + $0x10] sm:$0xff]  ;;  %s4126_s8 = smov 96   ;;  %vm499_vm2 = vcmask 523264  }
  0x39   :  { %103 = vxpose.xlu1.b32.start [1/4] (short) (narrow) %v67_v1, 64  ;;  %v3765_v4 = vld [vmem:[#allocation5] sm:$0xff]   ;;  %v69_v6 = vld [vmem:[#allocation2 + $0x30] sm:$0xff]  ;;  %v3766_v7 = vld [vmem:[#allocation5 + $0x8] sm:$0xff]   ;;  %s4129_s9 = smov 56   ;;  %s4130_s10 = smov 80  }
  0x3a   :  { %3296 = vmatprep.subr.bf16.mxu0 %v3765_v4  ;;  %v66_v8 = vld [vmem:[#allocation2 + $0x18] sm:$0xff]  ;;  %v3062_v35 = vld [vmem:[%s5657_s2] ss:$0 sm:$0xff]  ;;  %s4127_s2 = smov 88   ;;  %s4131_s11 = smov 112   ;;  %vm2786_vm3 = vcmask 130048  }
  0x3b   :  { %3297 = vmatpush3.bf16.msra.mxu0 %v3765_v4  ;;  %v70_v9 = vld [vmem:[#allocation2 + $0x38] sm:$0xff]  ;;  %s4132_s12 = smov 48   ;;  %s4133_s13 = smov 72   ;;  %vm2803_vm4 = vcmask 195584  }
  0x3c   :  { %72 = vxpose.xlu0.b32.cont [2/4] (short) (narrow) %v64_v2, 64  ;;  %3298 = vmatprep.subr.bf16.mxu0 %v3766_v7  ;;  %s4134_s14 = smov 104   ;;  %s4135_s15 = smov 40  }
  0x3d   :  { %104 = vxpose.xlu1.b32.cont [2/4] (short) (narrow) %v68_v3, 64  ;;  %s4136_s16 = smov 16   ;;  %s4137_s18 = smov 24  }
  0x3f   :  { %3299 = vmatpush3.bf16.msra.mxu0 %v3766_v7 }
  0x40   :  { %73 = vxpose.xlu0.b32.cont [3/4] (short) (narrow) %v65_v5, 64 }
  0x41   :  { %105 = vxpose.xlu1.b32.cont [3/4] (short) (narrow) %v69_v6, 64 }
  0x44   :  { %74 = vxpose.xlu0.b32.end [4/4] (short) (narrow) %v66_v8, 64 }
  0x45   :  { %106 = vxpose.xlu1.b32.end [4/4] (short) (narrow) %v70_v9, 64 }
  0xb8   :  { %v87_v10 = vpop.trf.xlu0 }
  0xb9   :  { %v119_v11 = vpop.trf.xlu1 }
  0xbc   :  { %v88_v12 = vpop.trf.xlu0 }
  0xbd   :  { %v135_v13 = vpack.c.bf16 %v88_v12, %v87_v10  ;;  %v120_v14 = vpop.trf.xlu1 }
  0xbe   :  { %v139_v28 = vpack.c.bf16 %v120_v14, %v119_v11 }
  0xbf   :  { %3300 = vmatprep.mubr.msk.bf16.mxu0 %vm166_vm0, %v135_v13 }
  0xc0   :  { %v89_v15 = vpop.trf.xlu0 }
  0xc1   :  { %v121_v16 = vpop.trf.xlu1 }
  0xc4   :  { %v90_v17 = vpop.trf.xlu0 }
  0xc5   :  { %v136_v18 = vpack.c.bf16 %v90_v17, %v89_v15  ;;  %v122_v20 = vpop.trf.xlu1 }
  0xc6   :  { %v140_v31 = vpack.c.bf16 %v122_v20, %v121_v16 }
  0xc7   :  { %3301 = vmatmul.mubr.msk.bf16.vlgmr.msra.gmra.mrb[0].mxu0 %vm166_vm0, %v136_v18 }
  0xc8   :  { %v91_v19 = vpop.trf.xlu0 }
  0xc9   :  { %v123_v23 = vpop.trf.xlu1 }
  0xcc   :  { %v92_v21 = vpop.trf.xlu0 }
  0xcd   :  { %v137_v22 = vpack.c.bf16 %v92_v21, %v91_v19  ;;  %v124_v26 = vpop.trf.xlu1 }
  0xce   :  { %v141_v30 = vpack.c.bf16 %v124_v26, %v123_v23 }
  0xcf   :  { %3304 = vmatprep.mubr.msk.bf16.mxu0 %vm166_vm0, %v137_v22 }
  0xd0   :  { %v93_v24 = vpop.trf.xlu0 }
  0xd1   :  { %v125_v29 = vpop.trf.xlu1 }
  0xd4   :  { %v94_v25 = vpop.trf.xlu0 }
  0xd5   :  { %v138_v27 = vpack.c.bf16 %v94_v25, %v93_v24  ;;  %v126_v32 = vpop.trf.xlu1 }
  0xd6   :  { %v142_v33 = vpack.c.bf16 %v126_v32, %v125_v29 }
  0xd7   :  { %3305 = vmatmul.mubr.msk.bf16.gmra.mrb[4].mxu0 %vm166_vm0, %v138_v27 }
  0xd8   :  { %3308 = vmatprep.mubr.msk.bf16.mxu0 %vm166_vm0, %v139_v28 }
  0xdf   :  { %3309 = vmatmul.mubr.msk.bf16.gmra.mrb[8].mxu0 %vm166_vm0, %v140_v31 }
  0xe0   :  { %3312 = vmatprep.mubr.msk.bf16.mxu0 %vm166_vm0, %v141_v30 }
  0xe7   :  { %3313 = vmatmul.mubr.msk.bf16.gmra.mrb[12].mxu0 %vm166_vm0, %v142_v33 }
 0x19a   :  { %v3302_v34 = vpop.f32.mrb[0].mxu0 }
 0x19b   :  { %v225_v36 = vpop.f32.mrb[1].mxu0  ;;  %v234_v38 = vadd.f32 %v3302_v34, %v3062_v35 }
 0x19c   :  { %v3303_v37 = vpop.f32.mrb[2].mxu0  ;;  %v226_v41 = vadd.f32 %v3062_v35, %v225_v36 }
 0x19d   :  { %v237_v39 = vadd.f32 %v3303_v37, %v3062_v35  ;;  %v228_v40 = vpop.f32.mrb[3].mxu0 }
 0x19e   :  { %v229_v42 = vadd.f32 %v3062_v35, %v228_v40 }
 0x19f   :  { %v4225_v43 = vpack.c.bf16 %v237_v39, %v234_v38 }
 0x1a0   :  { %v4227_v44 = vpack.c.bf16 %v229_v42, %v226_v41 }
 0x1a1   :  { %302 = vrot.lane.b32.xlu1 %v4225_v43, %s4126_s8 }
 0x1a2   :  { %300 = vrot.lane.b32.xlu0 %v4227_v44, %s4126_s8  ;;  %3324 = vmatprep.mubr.msk.bf16.mxu1 %vm308_vm1, %v4227_v44 }
 0x1aa   :  { %v3306_v45 = vpop.f32.mrb[4].mxu0 }
 0x1ab   :  { %v241_v46 = vpop.f32.mrb[5].mxu0  ;;  %v250_v48 = vadd.f32 %v3306_v45, %v3062_v35 }
 0x1ac   :  { %v3307_v47 = vpop.f32.mrb[6].mxu0  ;;  %v242_v51 = vadd.f32 %v3062_v35, %v241_v46 }
 0x1ad   :  { %v253_v49 = vadd.f32 %v3307_v47, %v3062_v35  ;;  %v244_v50 = vpop.f32.mrb[7].mxu0 }
 0x1ae   :  { %v245_v52 = vadd.f32 %v3062_v35, %v244_v50 }
 0x1af   :  { %v4235_v53 = vpack.c.bf16 %v253_v49, %v250_v48 }
 0x1b0   :  { %v4237_v54 = vpack.c.bf16 %v245_v52, %v242_v51 }
 0x1b2   :  { %v3310_v55 = vpop.f32.mrb[8].mxu0  ;;  %304 = vrot.lane.b32.xlu1 %v4237_v54, %s4126_s8 }
 0x1b3   :  { %v257_v56 = vpop.f32.mrb[9].mxu0  ;;  %v266_v58 = vadd.f32 %v3310_v55, %v3062_v35 }
 0x1b4   :  { %v3311_v57 = vpop.f32.mrb[10].mxu0  ;;  %v258_v61 = vadd.f32 %v3062_v35, %v257_v56 }
 0x1b5   :  { %v269_v59 = vadd.f32 %v3311_v57, %v3062_v35  ;;  %v260_v60 = vpop.f32.mrb[11].mxu0 }
 0x1b6   :  { %v261_v62 = vadd.f32 %v3062_v35, %v260_v60 }
 0x1b7   :  { %v4241_v63 = vpack.c.bf16 %v269_v59, %v266_v58 }
 0x1b8   :  { %v4243_v0 = vpack.c.bf16 %v261_v62, %v258_v61 }
 0x1b9   :  { %404 = vrot.lane.b32.xlu0 %v4241_v63, %s4126_s8 }
 0x1ba   :  { %v3314_v1 = vpop.f32.mrb[12].mxu0  ;;  %3340 = vmatprep.mubr.msk.bf16.mxu0 %vm308_vm1, %v4243_v0  ;;  %402 = vrot.lane.b32.xlu1 %v4243_v0, %s4126_s8 }
 0x1bb   :  { %v282_v2 = vadd.f32 %v3314_v1, %v3062_v35  ;;  %v273_v3 = vpop.f32.mrb[13].mxu0 }
 0x1bc   :  { %v274_v4 = vadd.f32 %v3062_v35, %v273_v3  ;;  %v3315_v5 = vpop.f32.mrb[14].mxu0 }
 0x1bd   :  { %v285_v6 = vadd.f32 %v3315_v5, %v3062_v35  ;;  %v276_v7 = vpop.f32.mrb[15].mxu0 }
 0x1be   :  { %v277_v8 = vadd.f32 %v3062_v35, %v276_v7  ;;  %306 = vrot.lane.b32.xlu1 %v4235_v53, %s4126_s8 }
 0x1bf   :  { %v4253_v9 = vpack.c.bf16 %v285_v6, %v282_v2 }
 0x1c0   :  { %v4255_v10 = vpack.c.bf16 %v277_v8, %v274_v4 }
 0x1c1   :  { %408 = vrot.lane.b32.xlu0 %v4253_v9, %s4126_s8 }
 0x1c2   :  { %406 = vrot.lane.b32.xlu1 %v4255_v10, %s4126_s8 }
 0x1c5   :  { %668 = vrot.lane.b32.xlu0 %v4227_v44, %s4120_s28 }
 0x1c6   :  { %670 = vrot.lane.b32.xlu1 %v4225_v43, %s4120_s28 }
 0x1c9   :  { %672 = vrot.lane.b32.xlu0 %v4237_v54, %s4120_s28 }
 0x1ca   :  { %674 = vrot.lane.b32.xlu1 %v4235_v53, %s4120_s28 }
 0x1cd   :  { %759 = vrot.lane.b32.xlu0 %v4241_v63, %s4120_s28 }
 0x1ce   :  { %757 = vrot.lane.b32.xlu1 %v4243_v0, %s4120_s28 }
 0x1d1   :  { %872 = vrot.lane.b32.xlu0 %v4225_v43, %s4127_s2 }
 0x1d2   :  { %870 = vrot.lane.b32.xlu1 %v4227_v44, %s4127_s2 }
 0x1d5   :  { %975 = vrot.lane.b32.xlu0 %v4243_v0, %s4127_s2 }
 0x1d6   :  { %763 = vrot.lane.b32.xlu1 %v4253_v9, %s4120_s28 }
 0x1d9   :  { %876 = vrot.lane.b32.xlu0 %v4235_v53, %s4127_s2 }
 0x1da   :  { %874 = vrot.lane.b32.xlu1 %v4237_v54, %s4127_s2 }
 0x1dd   :  { %761 = vrot.lane.b32.xlu0 %v4255_v10, %s4120_s28  ;;  %s4128_s28 = smov 120  }
 0x213   :  { %v303_v13 = vpop.permute.xlu1 %302 }
 0x214   :  { %v301_v11 = vpop.permute.xlu0 %300  ;;  %v325_v14 = vsel %vm308_vm1, %v303_v13, 0 }
 0x215   :  { %3592 = vmatprep.subr.msk.bf16.mxu1 %vm308_vm1, %v301_v11  ;;  %v322_v12 = vsel %vm308_vm1, %v301_v11, 0 }
 0x216   :  { %3317 = vmatpush3.bf16.xpose.msra.mxu1 %v322_v12 }
 0x217   :  { %3593 = vmatprep.subr.msk.bf16.mxu1 %vm308_vm1, %v303_v13 }
 0x21e   :  { %3319 = vmatpush3.bf16.xpose.msra.mxu1 %v325_v14 }
 0x224   :  { %v305_v15 = vpop.permute.xlu1 %304 }
 0x225   :  { %3594 = vmatprep.subr.msk.bf16.mxu1 %vm308_vm1, %v305_v15  ;;  %v328_v16 = vsel %vm308_vm1, %v305_v15, 0 }
 0x226   :  { %3321 = vmatpush3.bf16.xpose.msra.mxu1 %v328_v16 }
 0x22b   :  { %v405_v19 = vpop.permute.xlu0 %404 }
 0x22c   :  { %v403_v17 = vpop.permute.xlu1 %402  ;;  %v426_v24 = vsel %vm308_vm1, %v405_v19, 0 }
 0x22d   :  { %3596 = vmatprep.subr.msk.bf16.mxu0 %vm308_vm1, %v403_v17  ;;  %v423_v18 = vsel %vm308_vm1, %v403_v17, 0 }
 0x22e   :  { %3333 = vmatpush3.bf16.xpose.msra.mxu0 %v423_v18 }
 0x22f   :  { %3597 = vmatprep.subr.msk.bf16.mxu0 %vm308_vm1, %v405_v19 }
 0x230   :  { %v307_v20 = vpop.permute.xlu1 %306 }
 0x231   :  { %3595 = vmatprep.subr.msk.bf16.mxu1 %vm308_vm1, %v307_v20  ;;  %v331_v21 = vsel %vm308_vm1, %v307_v20, 0 }
 0x232   :  { %3323 = vmatpush3.bf16.xpose.msra.mxu1 %v331_v21 }
 0x233   :  { %v409_v22 = vpop.permute.xlu0 %408 }
 0x234   :  { %v407_v23 = vpop.permute.xlu1 %406  ;;  %v432_v33 = vsel %vm308_vm1, %v409_v22, 0 }
 0x235   :  { %v429_v29 = vsel %vm308_vm1, %v407_v23, 0 }
 0x236   :  { %3335 = vmatpush3.bf16.xpose.msra.mxu0 %v426_v24 }
 0x237   :  { %3598 = vmatprep.subr.msk.bf16.mxu0 %vm308_vm1, %v407_v23  ;;  %v669_v25 = vpop.permute.xlu0 %668 }
 0x238   :  { %v671_v26 = vpop.permute.xlu1 %670 }
 0x239   :  { %3325 = vmatmul.mubr.msk.bf16.vlgmr.msra.gmra.mrb[0].mxu1 %vm308_vm1, %v4225_v43 }
 0x23a   :  { %3328 = vmatprep.mubr.msk.bf16.mxu1 %vm308_vm1, %v4237_v54 }
 0x23b   :  { %v673_v27 = vpop.permute.xlu0 %672 }
 0x23c   :  { %v675_v28 = vpop.permute.xlu1 %674 }
 0x23e   :  { %3337 = vmatpush3.bf16.xpose.msra.mxu0 %v429_v29 }
 0x23f   :  { %3599 = vmatprep.subr.msk.bf16.mxu0 %vm308_vm1, %v409_v22  ;;  %v4306_v30 = vpop.permute.xlu0 %759 }
 0x240   :  { %v4308_v31 = vpop.permute.xlu1 %757 }
 0x241   :  { %3329 = vmatmul.mubr.msk.bf16.gmra.mrb[4].mxu1 %vm308_vm1, %v4235_v53 }
 0x243   :  { %v873_v35 = vpop.permute.xlu0 %872 }
 0x244   :  { %v871_v32 = vpop.permute.xlu1 %870  ;;  %v894_v37 = vsel %vm308_vm1, %v873_v35, 0 }
 0x245   :  { %3600 = vmatprep.subr.msk.bf16.mxu1 %vm308_vm1, %v871_v32  ;;  %v891_v34 = vsel %vm308_vm1, %v871_v32, 0 }
 0x246   :  { %3339 = vmatpush3.bf16.xpose.msra.mxu0 %v432_v33  ;;  %3381 = vmatpush3.bf16.xpose.msra.mxu1 %v891_v34 }
 0x247   :  { %3348 = vmatprep.subr.bf16.mxu0 %v669_v25  ;;  %3601 = vmatprep.subr.msk.bf16.mxu1 %vm308_vm1, %v873_v35  ;;  %v4324_v39 = vpop.permute.xlu0 %975 }
 0x248   :  { %v4316_v36 = vpop.permute.xlu1 %763 }
 0x24b   :  { %v877_v41 = vpop.permute.xlu0 %876 }
 0x24c   :  { %v875_v38 = vpop.permute.xlu1 %874  ;;  %v900_v42 = vsel %vm308_vm1, %v877_v41, 0 }
 0x24d   :  { %3341 = vmatmul.mubr.msk.bf16.vlgmr.msra.gmra.mrb[16].mxu0 %vm308_vm1, %v4241_v63  ;;  %v897_v40 = vsel %vm308_vm1, %v875_v38, 0 }
 0x24e   :  { %3344 = vmatprep.mubr.msk.bf16.mxu0 %vm308_vm1, %v4255_v10  ;;  %3349 = vmatpush3.bf16.msra.mxu0 %v669_v25 }
 0x24f   :  { %3383 = vmatpush3.bf16.xpose.msra.mxu1 %v894_v37  ;;  %3350 = vmatprep.subr.bf16.mxu0 %v671_v26  ;;  %v4410_v19 = vpop.permute.xlu0 %761 }
 0x250   :  { %3602 = vmatprep.subr.msk.bf16.mxu1 %vm308_vm1, %v875_v38 }
 0x252   :  { %3351 = vmatpush3.bf16.msra.mxu0 %v671_v26 }
 0x253   :  { %3352 = vmatprep.subr.bf16.mxu0 %v673_v27 }
 0x255   :  { %3345 = vmatmul.mubr.msk.bf16.gmra.mrb[20].mxu0 %vm308_vm1, %v4253_v9 }
 0x256   :  { %3353 = vmatpush3.bf16.msra.mxu0 %v673_v27 }
 0x257   :  { %3385 = vmatpush3.bf16.xpose.msra.mxu1 %v897_v40  ;;  %3354 = vmatprep.subr.bf16.mxu0 %v675_v28 }
 0x258   :  { %3603 = vmatprep.subr.msk.bf16.mxu1 %vm308_vm1, %v877_v41 }
 0x25a   :  { %3355 = vmatpush3.bf16.msra.mxu0 %v675_v28 }
 0x25b   :  { %3364 = vmatprep.subr.bf16.mxu0 %v4308_v31 }
 0x25f   :  { %3387 = vmatpush3.bf16.xpose.msra.mxu1 %v900_v42 }
 0x30c   :  { %v4332_v45 = vpop.f32.mrb[0].mxu1 }
 0x30d   :  { %v4334_v46 = vpop.f32.mrb[1].mxu1  ;;  %v506_v47 = vsel %vm499_vm2, %v4332_v45, -inf }
 0x30e   :  { %507 = vmax.xlane.f32.xlu0 %v506_v47  ;;  %v4338_v48 = vpop.f32.mrb[2].mxu1  ;;  %v500_v49 = vsel %vm499_vm2, %v4334_v46, -inf }
 0x30f   :  { %501 = vmax.xlane.f32.xlu1 %v500_v49  ;;  %v4342_v50 = vpop.f32.mrb[3].mxu1  ;;  %v509_v52 = vsel %vm499_vm2, %v4338_v48, -inf }
 0x310   :  { %v503_v51 = vsel %vm499_vm2, %v4342_v50, -inf }
 0x312   :  { %504 = vmax.xlane.f32.xlu0 %v503_v51 }
 0x313   :  { %510 = vmax.xlane.f32.xlu1 %v509_v52 }
 0x314   :  { %v4348_v55 = vpop.f32.mrb[4].mxu1 }
 0x315   :  { %v4350_v56 = vpop.f32.mrb[5].mxu1  ;;  %v518_v57 = vsel %vm499_vm2, %v4348_v55, -inf }
 0x316   :  { %519 = vmax.xlane.f32.xlu0 %v518_v57  ;;  %v4354_v58 = vpop.f32.mrb[6].mxu1  ;;  %v512_v61 = vsel %vm499_vm2, %v4350_v56, -inf }
 0x317   :  { %v4356_v59 = vpop.f32.mrb[7].mxu1  ;;  %v521_v60 = vsel %vm499_vm2, %v4354_v58, -inf }
 0x318   :  { %522 = vmax.xlane.f32.xlu1 %v521_v60  ;;  %v515_v62 = vsel %vm499_vm2, %v4356_v59, -inf }
 0x31a   :  { %513 = vmax.xlane.f32.xlu0 %v512_v61 }
 0x31c   :  { %516 = vmax.xlane.f32.xlu1 %v515_v62 }
 0x320   :  { %v4364_v1 = vpop.f32.mrb[16].mxu0 }
 0x321   :  { %v4366_v2 = vpop.f32.mrb[17].mxu0  ;;  %v530_v3 = vsel %vm499_vm2, %v4364_v1, -inf }
 0x322   :  { %531 = vmax.xlane.f32.xlu0 %v530_v3  ;;  %v4370_v4 = vpop.f32.mrb[18].mxu0  ;;  %v524_v5 = vsel %vm499_vm2, %v4366_v2, -inf }
 0x323   :  { %525 = vmax.xlane.f32.xlu1 %v524_v5  ;;  %v4374_v6 = vpop.f32.mrb[19].mxu0  ;;  %v533_v8 = vsel %vm499_vm2, %v4370_v4, -inf }
 0x324   :  { %v527_v7 = vsel %vm499_vm2, %v4374_v6, -inf }
 0x326   :  { %528 = vmax.xlane.f32.xlu0 %v527_v7 }
 0x327   :  { %534 = vmax.xlane.f32.xlu1 %v533_v8 }
 0x328   :  { %v4380_v11 = vpop.f32.mrb[20].mxu0 }
 0x329   :  { %v4382_v12 = vpop.f32.mrb[21].mxu0  ;;  %v542_v16 = vsel %vm499_vm2, %v4380_v11, -inf }
 0x32a   :  { %v4384_v13 = vpop.f32.mrb[22].mxu0  ;;  %v536_v15 = vsel %vm499_vm2, %v4382_v12, -inf }
 0x32b   :  { %v4386_v14 = vpop.f32.mrb[23].mxu0  ;;  %v545_v17 = vsel %vm499_vm2, %v4384_v13, -inf }
 0x32c   :  { %v539_v18 = vsel %vm499_vm2, %v4386_v14, -inf }
 0x338   :  { %862 = vrot.lane.b32.xlu1 %v4227_v44, %s4128_s28 }
 0x33c   :  { %977 = vrot.lane.b32.xlu0 %v4241_v63, %s4127_s2 }
 0x35b   :  { %537 = vmax.xlane.f32.xlu0 %v536_v15 }
 0x35c   :  { %543 = vmax.xlane.f32.xlu1 %v542_v16 }
 0x360   :  { %546 = vmax.xlane.f32.xlu1 %v545_v17 }
 0x364   :  { %540 = vmax.xlane.f32.xlu1 %v539_v18 }
 0x371   :  { %864 = vrot.lane.b32.xlu0 %v4225_v43, %s4128_s28 }
 0x375   :  { %981 = vrot.lane.b32.xlu0 %v4253_v9, %s4127_s2  ;;  %979 = vrot.lane.b32.xlu1 %v4255_v10, %s4127_s2 }
 0x379   :  { %969 = vrot.lane.b32.xlu0 %v4241_v63, %s4128_s28  ;;  %967 = vrot.lane.b32.xlu1 %v4243_v0, %s4128_s28 }
 0x37d   :  { %868 = vrot.lane.b32.xlu0 %v4235_v53, %s4128_s28  ;;  %866 = vrot.lane.b32.xlu1 %v4237_v54, %s4128_s28 }
 0x381   :  { %973 = vrot.lane.b32.xlu0 %v4253_v9, %s4128_s28  ;;  %971 = vrot.lane.b32.xlu1 %v4255_v10, %s4128_s28 }
 0x39b   :  { %v508_v20 = vpop.xlane.xlu0 %507 }
 0x39c   :  { %v550_v21 = vsub.f32 %v4332_v45, %v508_v20  ;;  %v502_v22 = vpop.xlane.xlu1 %501 }
 0x39d   :  { %v548_v23 = vsub.f32 %v4334_v46, %v502_v22 }
 0x39e   :  { %v568_v24 = vmul.f32 1.442695, %v550_v21 }
 0x39f   :  { %v564_v25 = vmul.f32 1.442695, %v548_v23  ;;  %v505_v26 = vpop.xlane.xlu0 %504 }
 0x3a0   :  { %v549_v27 = vsub.f32 %v4342_v50, %v505_v26  ;;  %v511_v28 = vpop.xlane.xlu1 %510  ;;  %3769 = vpow2.f32 %v568_v24 }
 0x3a1   :  { %v551_v29 = vsub.f32 %v4338_v48, %v511_v28  ;;  %3771 = vpow2.f32 %v564_v25 }
 0x3a2   :  { %v566_v32 = vmul.f32 1.442695, %v549_v27 }
 0x3a3   :  { %v570_v33 = vmul.f32 1.442695, %v551_v29  ;;  %v520_v34 = vpop.xlane.xlu0 %519 }
 0x3a4   :  { %3773 = vpow2.f32 %v566_v32  ;;  %v554_v35 = vsub.f32 %v4348_v55, %v520_v34 }
 0x3a5   :  { %3775 = vpow2.f32 %v570_v33  ;;  %v523_v37 = vpop.xlane.xlu1 %522 }
 0x3a6   :  { %v576_v38 = vmul.f32 1.442695, %v554_v35  ;;  %v555_v40 = vsub.f32 %v4354_v58, %v523_v37 }
 0x3a7   :  { %v514_v41 = vpop.xlane.xlu0 %513 }
 0x3a8   :  { %v578_v42 = vmul.f32 1.442695, %v555_v40  ;;  %v552_v45 = vsub.f32 %v4350_v56, %v514_v41  ;;  %3777 = vpow2.f32 %v576_v38 }
 0x3a9   :  { %v517_v46 = vpop.xlane.xlu1 %516 }
 0x3aa   :  { %3779 = vpow2.f32 %v578_v42  ;;  %v572_v47 = vmul.f32 1.442695, %v552_v45  ;;  %v553_v48 = vsub.f32 %v4356_v59, %v517_v46  ;;  %v4420_v49 = vpop.eup %3769 }
 0x3ab   :  { %v4422_v51 = vpop.eup %3771 }
 0x3ac   :  { %v574_v50 = vmul.f32 1.442695, %v553_v48  ;;  %3781 = vpow2.f32 %v572_v47 }
 0x3ae   :  { %v4424_v52 = vpop.eup %3773  ;;  %3783 = vpow2.f32 %v574_v50 }
 0x3af   :  { %5674 = vst [vmem:[#allocation12_spill] sm:$0xff] %v4424_v52  ;;  %v4426_v55 = vpop.eup %3775  ;;  %v532_v57 = vpop.xlane.xlu0 %531  ;;  %v660_v56 = vpack.c.bf16 %v4424_v52, %v4422_v51 }
 0x3b0   :  { %5675 = vst [vmem:[#allocation13_spill] sm:$0xff] %v4426_v55  ;;  %v661_v58 = vpack.c.bf16 %v4426_v55, %v4420_v49  ;;  %v558_v59 = vsub.f32 %v4364_v1, %v532_v57  ;;  %v526_v60 = vpop.xlane.xlu1 %525 }
 0x3b1   :  { %v556_v61 = vsub.f32 %v4366_v2, %v526_v60  ;;  %3356 = vmatprep.mubr.msk.bf16.mxu0 %vm499_vm2, %v660_v56 }
 0x3b2   :  { %v584_v62 = vmul.f32 1.442695, %v558_v59  ;;  %3357 = vmatmul.mubr.msk.bf16.vlgmr.msra.gmra.mrb[24].mxu0 %vm499_vm2, %v661_v58  ;;  %v4436_v3 = vpop.eup %3777 }
 0x3b3   :  { %5676 = vst [vmem:[#allocation14_spill] sm:$0xff] %v4436_v3  ;;  %v580_v5 = vmul.f32 1.442695, %v556_v61  ;;  %3365 = vmatpush3.bf16.msra.mxu0 %v4308_v31  ;;  %v529_v7 = vpop.xlane.xlu0 %528 }
 0x3b4   :  { %v4439_v8 = vpop.eup %3779  ;;  %3366 = vmatprep.subr.bf16.mxu0 %v4306_v30  ;;  %v557_v1 = vsub.f32 %v4374_v6, %v529_v7  ;;  %v535_v15 = vpop.xlane.xlu1 %534  ;;  %3785 = vpow2.f32 %v584_v62 }
 0x3b5   :  { %5677 = vst [vmem:[#allocation15_spill] sm:$0xff] %v4439_v8  ;;  %v559_v2 = vsub.f32 %v4370_v4, %v535_v15  ;;  %v663_v16 = vpack.c.bf16 %v4439_v8, %v4436_v3  ;;  %3787 = vpow2.f32 %v580_v5 }
 0x3b6   :  { %v582_v17 = vmul.f32 1.442695, %v557_v1  ;;  %v4446_v18 = vpop.eup %3781 }
 0x3b7   :  { %v586_v20 = vmul.f32 1.442695, %v559_v2  ;;  %3367 = vmatpush3.bf16.msra.mxu0 %v4306_v30  ;;  %v978_v25 = vpop.permute.xlu0 %977 }
 0x3b8   :  { %v4449_v31 = vpop.eup %3783  ;;  %3789 = vpow2.f32 %v582_v17  ;;  %3368 = vmatprep.subr.bf16.mxu0 %v4410_v19  ;;  %v863_v6 = vpop.permute.xlu1 %862  ;;  %v999_v26 = vsel %vm308_vm1, %v978_v25, 0 }
 0x3b9   :  { %5678 = vst [vmem:[#allocation16_spill] sm:$0xff] %v4449_v31  ;;  %3791 = vpow2.f32 %v586_v20  ;;  %3388 = vmatprep.mubr.msk.bf16.mxu1 %vm308_vm1, %v863_v6  ;;  %v662_v4 = vpack.c.bf16 %v4449_v31, %v4446_v18 }
 0x3bb   :  { %3369 = vmatpush3.bf16.msra.mxu0 %v4410_v19  ;;  %3360 = vmatprep.mubr.msk.bf16.mxu0 %vm499_vm2, %v662_v4 }
 0x3bc   :  { %3370 = vmatprep.subr.bf16.mxu0 %v4316_v36  ;;  %3361 = vmatmul.mubr.msk.bf16.gmra.mrb[28].mxu0 %vm499_vm2, %v663_v16 }
 0x3be   :  { %v4460_v30 = vpop.eup %3785 }
 0x3bf   :  { %3371 = vmatpush3.bf16.msra.mxu0 %v4316_v36  ;;  %5679 = vst [vmem:[#allocation17_spill] sm:$0xff] %v4460_v30  ;;  %v4464_v21 = vpop.eup %3787  ;;  %v996_v36 = vsel %vm308_vm1, %v4324_v39, 0 }
 0x3c0   :  { %3604 = vmatprep.subr.msk.bf16.mxu0 %vm308_vm1, %v4324_v39  ;;  %5680 = vst [vmem:[#allocation18_spill] sm:$0xff] %v4464_v21 }
 0x3c2   :  { %v4466_v22 = vpop.eup %3789 }
 0x3c3   :  { %5681 = vst [vmem:[#allocation19_spill] sm:$0xff] %v4466_v22  ;;  %v4468_v23 = vpop.eup %3791  ;;  %v664_v19 = vpack.c.bf16 %v4466_v22, %v4464_v21 }
 0x3c4   :  { %5682 = vst [vmem:[#allocation20_spill] sm:$0xff] %v4468_v23  ;;  %v665_v24 = vpack.c.bf16 %v4468_v23, %v4460_v30 }
 0x3c5   :  { %3372 = vmatprep.mubr.msk.bf16.mxu0 %vm499_vm2, %v664_v19 }
 0x3c6   :  { %3373 = vmatmul.mubr.msk.bf16.vlgmr.msra.gmra.mrb[32].mxu0 %vm499_vm2, %v665_v24 }
 0x3c8   :  { %3397 = vmatpush3.bf16.xpose.msra.mxu0 %v996_v36 }
 0x3c9   :  { %3605 = vmatprep.subr.msk.bf16.mxu0 %vm308_vm1, %v978_v25 }
 0x3d0   :  { %3399 = vmatpush3.bf16.xpose.msra.mxu0 %v999_v26 }
 0x3e8   :  { %v538_v27 = vpop.xlane.xlu0 %537 }
 0x3e9   :  { %v544_v28 = vpop.xlane.xlu1 %543  ;;  %v560_v33 = vsub.f32 %v4382_v12, %v538_v27 }
 0x3ea   :  { %v562_v29 = vsub.f32 %v4380_v11, %v544_v28 }
 0x3eb   :  { %v588_v38 = vmul.f32 1.442695, %v560_v33 }
 0x3ec   :  { %v865_v32 = vpop.permute.xlu0 %864  ;;  %v592_v34 = vmul.f32 1.442695, %v562_v29 }
 0x3ed   :  { %v547_v35 = vpop.xlane.xlu1 %546  ;;  %3389 = vmatmul.mubr.msk.bf16.vlgmr.msra.gmra.mrb[8].mxu1 %vm308_vm1, %v865_v32 }
 0x3ee   :  { %v563_v39 = vsub.f32 %v4384_v13, %v547_v35  ;;  %3793 = vpow2.f32 %v592_v34 }
 0x3f0   :  { %v594_v37 = vmul.f32 1.442695, %v563_v39  ;;  %v982_v41 = vpop.permute.xlu0 %981 }
 0x3f1   :  { %v541_v40 = vpop.xlane.xlu1 %540  ;;  %v1005_v56 = vsel %vm308_vm1, %v982_v41, 0 }
 0x3f2   :  { %3795 = vpow2.f32 %v594_v37  ;;  %v561_v42 = vsub.f32 %v4386_v14, %v541_v40 }
 0x3f3   :  { %3797 = vpow2.f32 %v588_v38 }
 0x3f4   :  { %v590_v45 = vmul.f32 1.442695, %v561_v42  ;;  %v970_v46 = vpop.permute.xlu0 %969 }
 0x3f5   :  { %v980_v11 = vpop.permute.xlu1 %979 }
 0x3f6   :  { %3799 = vpow2.f32 %v590_v45  ;;  %3606 = vmatprep.subr.msk.bf16.mxu0 %vm308_vm1, %v980_v11  ;;  %v1002_v12 = vsel %vm308_vm1, %v980_v11, 0 }
 0x3f7   :  { %3401 = vmatpush3.bf16.xpose.msra.mxu0 %v1002_v12 }
 0x3f8   :  { %3607 = vmatprep.subr.msk.bf16.mxu0 %vm308_vm1, %v982_v41  ;;  %v4488_v47 = vpop.eup %3793  ;;  %v869_v57 = vpop.permute.xlu0 %868 }
 0x3f9   :  { %v968_v13 = vpop.permute.xlu1 %967  ;;  %5683 = vst [vmem:[#allocation21_spill] sm:$0xff] %v4488_v47 }
 0x3fc   :  { %v4490_v48 = vpop.eup %3795  ;;  %v974_v62 = vpop.permute.xlu0 %973 }
 0x3fd   :  { %5684 = vst [vmem:[#allocation22_spill] sm:$0xff] %v4490_v48  ;;  %v867_v50 = vpop.permute.xlu1 %866  ;;  %v667_v14 = vpack.c.bf16 %v4490_v48, %v4488_v47  ;;  %v4496_v58 = vpop.eup %3797 }
 0x3fe   :  { %3392 = vmatprep.mubr.msk.bf16.mxu1 %vm308_vm1, %v867_v50  ;;  %5685 = vst [vmem:[#allocation23_spill] sm:$0xff] %v4496_v58 }
 0x3ff   :  { %3393 = vmatmul.mubr.msk.bf16.gmra.mrb[12].mxu1 %vm308_vm1, %v869_v57  ;;  %3403 = vmatpush3.bf16.xpose.msra.mxu0 %v1005_v56 }
 0x400   :  { %v4499_v59 = vpop.eup %3799 }
 0x401   :  { %5686 = vst [vmem:[#allocation24_spill] sm:$0xff] %v4499_v59  ;;  %v666_v60 = vpack.c.bf16 %v4499_v59, %v4496_v58  ;;  %v972_v61 = vpop.permute.xlu1 %971 }
 0x403   :  { %3376 = vmatprep.mubr.msk.bf16.mxu0 %vm499_vm2, %v666_v60 }
 0x404   :  { %3377 = vmatmul.mubr.msk.bf16.gmra.mrb[36].mxu0 %vm499_vm2, %v667_v14 }
 0x405   :  { %3404 = vmatprep.mubr.msk.bf16.mxu0 %vm308_vm1, %v968_v13 }
 0x40c   :  { %3405 = vmatmul.mubr.msk.bf16.vlgmr.msra.gmra.mrb[40].mxu0 %vm308_vm1, %v970_v46 }
 0x40d   :  { %3408 = vmatprep.mubr.msk.bf16.mxu0 %vm308_vm1, %v972_v61 }
 0x414   :  { %3409 = vmatmul.mubr.msk.bf16.gmra.mrb[44].mxu0 %vm308_vm1, %v974_v62 }
 0x485   :  { %v4509_v5 = vpop.f32.mrb[24].mxu0 }
 0x486   :  { %5687 = vst [vmem:[#allocation25_spill] sm:$0xff] %v4509_v5  ;;  %v4511_v7 = vpop.f32.mrb[25].mxu0 }
 0x487   :  { %5688 = vst [vmem:[#allocation26_spill] sm:$0xff] %v4511_v7  ;;  %v4513_v1 = vpop.f32.mrb[26].mxu0 }
 0x488   :  { %5689 = vst [vmem:[#allocation27_spill] sm:$0xff] %v4513_v1  ;;  %v4515_v15 = vpop.f32.mrb[27].mxu0 }
 0x489   :  { %5690 = vst [vmem:[#allocation28_spill] sm:$0xff] %v4515_v15 }
 0x48f   :  { %v4517_v2 = vpop.f32.mrb[28].mxu0 }
 0x490   :  { %5691 = vst [vmem:[#allocation29_spill] sm:$0xff] %v4517_v2  ;;  %v4519_v16 = vpop.f32.mrb[29].mxu0 }
 0x491   :  { %5692 = vst [vmem:[#allocation30_spill] sm:$0xff] %v4519_v16  ;;  %v4521_v17 = vpop.f32.mrb[30].mxu0 }
 0x492   :  { %5693 = vst [vmem:[#allocation31_spill] sm:$0xff] %v4521_v17  ;;  %v4523_v20 = vpop.f32.mrb[31].mxu0 }
 0x493   :  { %5694 = vst [vmem:[#allocation32_spill] sm:$0xff] %v4523_v20 }
 0x499   :  { %v4525_v6 = vpop.f32.mrb[32].mxu0 }
 0x49a   :  { %5695 = vst [vmem:[#allocation33_spill] sm:$0xff] %v4525_v6  ;;  %v4527_v4 = vpop.f32.mrb[33].mxu0 }
 0x49b   :  { %5696 = vst [vmem:[#allocation34_spill] sm:$0xff] %v4527_v4  ;;  %v4529_v19 = vpop.f32.mrb[34].mxu0 }
 0x49c   :  { %5697 = vst [vmem:[#allocation35_spill] sm:$0xff] %v4529_v19  ;;  %v4531_v24 = vpop.f32.mrb[35].mxu0 }
 0x49d   :  { %5698 = vst [vmem:[#allocation36_spill] sm:$0xff] %v4531_v24 }
 0x4c0   :  { %v4533_v36 = vpop.f32.mrb[8].mxu1 }
 0x4c1   :  { %v4535_v25 = vpop.f32.mrb[9].mxu1  ;;  %v1078_v26 = vsel %vm499_vm2, %v4533_v36, -inf }
 0x4c2   :  { %1079 = vmax.xlane.f32.xlu0 %v1078_v26  ;;  %v4539_v27 = vpop.f32.mrb[10].mxu1  ;;  %v1072_v28 = vsel %vm499_vm2, %v4535_v25, -inf }
 0x4c3   :  { %1073 = vmax.xlane.f32.xlu1 %v1072_v28  ;;  %v4543_v29 = vpop.f32.mrb[11].mxu1  ;;  %v1081_v32 = vsel %vm499_vm2, %v4539_v27, -inf }
 0x4c4   :  { %v1075_v57 = vsel %vm499_vm2, %v4543_v29, -inf }
 0x4c7   :  { %1082 = vmax.xlane.f32.xlu1 %v1081_v32 }
 0x4d2   :  { %v4547_v33 = vpop.f32.mrb[12].mxu1 }
 0x4d3   :  { %v4549_v34 = vpop.f32.mrb[13].mxu1  ;;  %v1090_v60 = vsel %vm499_vm2, %v4547_v33, -inf }
 0x4d4   :  { %v4551_v35 = vpop.f32.mrb[14].mxu1  ;;  %v1084_v56 = vsel %vm499_vm2, %v4549_v34, -inf }
 0x4d5   :  { %v4553_v39 = vpop.f32.mrb[15].mxu1  ;;  %v1093_v61 = vsel %vm499_vm2, %v4551_v35, -inf }
 0x4d6   :  { %v1087_v62 = vsel %vm499_vm2, %v4553_v39, -inf }
 0x4d7   :  { %v4555_v37 = vpop.f32.mrb[36].mxu0 }
 0x4d8   :  { %5699 = vst [vmem:[#allocation37_spill] sm:$0xff] %v4555_v37  ;;  %v4557_v38 = vpop.f32.mrb[37].mxu0  ;;  %1240 = vrot.lane.b32.xlu0 %v4227_v44, %s4129_s9  ;;  %1242 = vrot.lane.b32.xlu1 %v4225_v43, %s4129_s9 }
 0x4d9   :  { %5700 = vst [vmem:[#allocation38_spill] sm:$0xff] %v4557_v38  ;;  %v4561_v40 = vpop.f32.mrb[38].mxu0 }
 0x4da   :  { %5701 = vst [vmem:[#allocation39_spill] sm:$0xff] %v4561_v40  ;;  %v4563_v41 = vpop.f32.mrb[39].mxu0 }
 0x4db   :  { %5702 = vst [vmem:[#allocation40_spill] sm:$0xff] %v4563_v41 }
 0x4dc   :  { %1244 = vrot.lane.b32.xlu0 %v4237_v54, %s4129_s9  ;;  %1246 = vrot.lane.b32.xlu1 %v4235_v53, %s4129_s9 }
 0x4df   :  { %v4567_v42 = vpop.f32.mrb[40].mxu0 }
 0x4e0   :  { %1329 = vrot.lane.b32.xlu0 %v4243_v0, %s4129_s9  ;;  %1331 = vrot.lane.b32.xlu1 %v4241_v63, %s4129_s9  ;;  %v4571_v45 = vpop.f32.mrb[41].mxu0  ;;  %v1102_v28 = vsel %vm499_vm2, %v4567_v42, -inf }
 0x4e1   :  { %v4573_v11 = vpop.f32.mrb[42].mxu0  ;;  %v1096_v26 = vsel %vm499_vm2, %v4571_v45, -inf }
 0x4e2   :  { %v4575_v12 = vpop.f32.mrb[43].mxu0  ;;  %v1105_v32 = vsel %vm499_vm2, %v4573_v11, -inf }
 0x4e4   :  { %1333 = vrot.lane.b32.xlu0 %v4255_v10, %s4129_s9  ;;  %1442 = vrot.lane.b32.xlu1 %v4227_v44, %s4130_s10 }
 0x4e7   :  { %v4580_v46 = vpop.f32.mrb[44].mxu0 }
 0x4e8   :  { %1444 = vrot.lane.b32.xlu0 %v4225_v43, %s4130_s10  ;;  %1335 = vrot.lane.b32.xlu1 %v4253_v9, %s4129_s9  ;;  %v4585_v13 = vpop.f32.mrb[45].mxu0 }
 0x4e9   :  { %v4587_v50 = vpop.f32.mrb[46].mxu0 }
 0x4ea   :  { %v4589_v14 = vpop.f32.mrb[47].mxu0  ;;  %v1117_v38 = vsel %vm499_vm2, %v4587_v50, -inf }
 0x4ec   :  { %1547 = vrot.lane.b32.xlu0 %v4243_v0, %s4130_s10  ;;  %1446 = vrot.lane.b32.xlu1 %v4237_v54, %s4130_s10 }
 0x4f0   :  { %1448 = vrot.lane.b32.xlu0 %v4235_v53, %s4130_s10 }
 0x50f   :  { %1076 = vmax.xlane.f32.xlu0 %v1075_v57  ;;  %v1099_v57 = vsel %vm499_vm2, %v4575_v12, -inf }
 0x510   :  { %1085 = vmax.xlane.f32.xlu1 %v1084_v56 }
 0x513   :  { %1091 = vmax.xlane.f32.xlu0 %v1090_v60 }
 0x514   :  { %1094 = vmax.xlane.f32.xlu1 %v1093_v61 }
 0x517   :  { %1088 = vmax.xlane.f32.xlu0 %v1087_v62  ;;  %v1114_v62 = vsel %vm499_vm2, %v4580_v46, -inf }
 0x518   :  { %1097 = vmax.xlane.f32.xlu1 %v1096_v26 }
 0x51b   :  { %1103 = vmax.xlane.f32.xlu0 %v1102_v28  ;;  %v1108_v28 = vsel %vm499_vm2, %v4585_v13, -inf }
 0x51c   :  { %1106 = vmax.xlane.f32.xlu1 %v1105_v32 }
 0x51f   :  { %1100 = vmax.xlane.f32.xlu0 %v1099_v57 }
 0x52d   :  { %1434 = vrot.lane.b32.xlu1 %v4227_v44, %s4131_s11 }
 0x535   :  { %1549 = vrot.lane.b32.xlu0 %v4241_v63, %s4130_s10 }
 0x54f   :  { %v1080_v56 = vpop.xlane.xlu0 %1079 }
 0x550   :  { %v1122_v60 = vsub.f32 %v4533_v36, %v1080_v56  ;;  %v1074_v61 = vpop.xlane.xlu1 %1073 }
 0x551   :  { %1115 = vmax.xlane.f32.xlu1 %v1114_v62  ;;  %v1111_v62 = vsel %vm499_vm2, %v4589_v14, -inf }
 0x552   :  { %v1140_v32 = vmul.f32 1.442695, %v1122_v60 }
 0x553   :  { %v1241_v26 = vpop.permute.xlu0 %1240 }
 0x554   :  { %v1083_v57 = vpop.xlane.xlu1 %1082  ;;  %1109 = vmax.xlane.f32.xlu0 %v1108_v28  ;;  %3412 = vmatprep.subr.bf16.mxu1 %v1241_v26  ;;  %3801 = vpow2.f32 %v1140_v32 }
 0x555   :  { %v1123_v41 = vsub.f32 %v4539_v27, %v1083_v57  ;;  %1118 = vmax.xlane.f32.xlu1 %v1117_v38  ;;  %3413 = vmatpush3.bf16.msra.mxu1 %v1241_v26 }
 0x557   :  { %v1142_v36 = vmul.f32 1.442695, %v1123_v41  ;;  %v1245_v56 = vpop.permute.xlu0 %1244 }
 0x558   :  { %v1243_v40 = vpop.permute.xlu1 %1242 }
 0x559   :  { %3803 = vpow2.f32 %v1142_v36  ;;  %1112 = vmax.xlane.f32.xlu1 %v1111_v62  ;;  %3414 = vmatprep.subr.bf16.mxu1 %v1243_v40  ;;  %v1120_v62 = vsub.f32 %v4535_v25, %v1074_v61 }
 0x55a   :  { %3415 = vmatpush3.bf16.msra.mxu1 %v1243_v40 }
 0x55b   :  { %3416 = vmatprep.subr.bf16.mxu1 %v1245_v56  ;;  %v1330_v60 = vpop.permute.xlu0 %1329 }
 0x55c   :  { %v1247_v28 = vpop.permute.xlu1 %1246  ;;  %3428 = vmatprep.subr.bf16.mxu0 %v1330_v60 }
 0x55d   :  { %3429 = vmatpush3.bf16.msra.mxu0 %v1330_v60 }
 0x55e   :  { %3417 = vmatpush3.bf16.msra.mxu1 %v1245_v56  ;;  %v4629_v41 = vpop.eup %3801 }
 0x55f   :  { %3418 = vmatprep.subr.bf16.mxu1 %v1247_v28  ;;  %v1334_v27 = vpop.permute.xlu0 %1333 }
 0x560   :  { %v1332_v38 = vpop.permute.xlu1 %1331 }
 0x561   :  { %3430 = vmatprep.subr.bf16.mxu0 %v1332_v38 }
 0x562   :  { %3419 = vmatpush3.bf16.msra.mxu1 %v1247_v28  ;;  %3431 = vmatpush3.bf16.msra.mxu0 %v1332_v38 }
 0x563   :  { %v4631_v26 = vpop.eup %3803  ;;  %3432 = vmatprep.subr.bf16.mxu0 %v1334_v27  ;;  %v4637_v57 = vpop.permute.xlu0 %1444 }
 0x564   :  { %v4635_v32 = vpop.permute.xlu1 %1442 }
 0x565   :  { %3608 = vmatprep.subr.msk.bf16.mxu1 %vm308_vm1, %v4635_v32 }
 0x566   :  { %3433 = vmatpush3.bf16.msra.mxu0 %v1334_v27  ;;  %v1136_v27 = vmul.f32 1.442695, %v1120_v62 }
 0x567   :  { %v4645_v56 = vpop.permute.xlu0 %1547 }
 0x568   :  { %v1336_v36 = vpop.permute.xlu1 %1335  ;;  %3805 = vpow2.f32 %v1136_v27  ;;  %v1463_v27 = vsel %vm308_vm1, %v4635_v32, 0 }
 0x569   :  { %3434 = vmatprep.subr.bf16.mxu0 %v1336_v36 }
 0x56a   :  { %1436 = vrot.lane.b32.xlu0 %v4225_v43, %s4131_s11  ;;  %1551 = vrot.lane.b32.xlu1 %v4255_v10, %s4130_s10 }
 0x56b   :  { %3435 = vmatpush3.bf16.msra.mxu0 %v1336_v36  ;;  %v4664_v60 = vpop.permute.xlu0 %1448 }
 0x56c   :  { %3612 = vmatprep.subr.msk.bf16.mxu0 %vm308_vm1, %v4645_v56  ;;  %v4666_v28 = vpop.permute.xlu1 %1446 }
 0x56e   :  { %1553 = vrot.lane.b32.xlu0 %v4253_v9, %s4130_s10  ;;  %1539 = vrot.lane.b32.xlu1 %v4243_v0, %s4131_s11 }
 0x572   :  { %1541 = vrot.lane.b32.xlu0 %v4241_v63, %s4131_s11  ;;  %1438 = vrot.lane.b32.xlu1 %v4237_v54, %s4131_s11 }
 0x576   :  { %1440 = vrot.lane.b32.xlu0 %v4235_v53, %s4131_s11  ;;  %1543 = vrot.lane.b32.xlu1 %v4255_v10, %s4131_s11 }
 0x57a   :  { %1545 = vrot.lane.b32.xlu0 %v4253_v9, %s4131_s11 }
 0x59c   :  { %v1077_v38 = vpop.xlane.xlu0 %1076 }
 0x59d   :  { %v1121_v36 = vsub.f32 %v4543_v29, %v1077_v38  ;;  %v1086_v40 = vpop.xlane.xlu1 %1085 }
 0x59e   :  { %v1124_v6 = vsub.f32 %v4549_v34, %v1086_v40 }
 0x59f   :  { %v1138_v37 = vmul.f32 1.442695, %v1121_v36 }
 0x5a0   :  { %v1092_v19 = vpop.xlane.xlu0 %1091  ;;  %v1144_v20 = vmul.f32 1.442695, %v1124_v6 }
 0x5a1   :  { %3807 = vpow2.f32 %v1138_v37  ;;  %v1126_v24 = vsub.f32 %v4547_v33, %v1092_v19  ;;  %v1095_v17 = vpop.xlane.xlu1 %1094  ;;  %v4675_v37 = vpop.eup %3805 }
 0x5a2   :  { %v1127_v25 = vsub.f32 %v4551_v35, %v1095_v17 }
 0x5a3   :  { %v1148_v61 = vmul.f32 1.442695, %v1126_v24 }
 0x5a4   :  { %v1150_v1 = vmul.f32 1.442695, %v1127_v25  ;;  %v1089_v4 = vpop.xlane.xlu0 %1088 }
 0x5a5   :  { %3809 = vpow2.f32 %v1148_v61  ;;  %v1125_v62 = vsub.f32 %v4553_v39, %v1089_v4  ;;  %v1098_v29 = vpop.xlane.xlu1 %1097 }
 0x5a6   :  { %3811 = vpow2.f32 %v1150_v1  ;;  %v1128_v34 = vsub.f32 %v4571_v45, %v1098_v29 }
 0x5a7   :  { %v1146_v38 = vmul.f32 1.442695, %v1125_v62  ;;  %3813 = vpow2.f32 %v1144_v20 }
 0x5a8   :  { %v1104_v40 = vpop.xlane.xlu0 %1103  ;;  %v1152_v35 = vmul.f32 1.442695, %v1128_v34 }
 0x5a9   :  { %3815 = vpow2.f32 %v1146_v38  ;;  %v1130_v19 = vsub.f32 %v4567_v42, %v1104_v40  ;;  %v1107_v33 = vpop.xlane.xlu1 %1106  ;;  %v1466_v38 = vsel %vm308_vm1, %v4637_v57, 0 }
 0x5aa   :  { %v1131_v17 = vsub.f32 %v4573_v11, %v1107_v33  ;;  %v5703_v11 = vpack.c.bf16 %v4631_v26, %v4629_v41 }
 0x5ab   :  { %v4678_v6 = vpop.eup %3807  ;;  %v1156_v24 = vmul.f32 1.442695, %v1130_v19 }
 0x5ac   :  { %v1158_v4 = vmul.f32 1.442695, %v1131_v17  ;;  %v1101_v39 = vpop.xlane.xlu0 %1100  ;;  %v1232_v1 = vpack.c.bf16 %v4678_v6, %v4675_v37 }
 0x5ad   :  { %3817 = vpow2.f32 %v1156_v24  ;;  %v1129_v20 = vsub.f32 %v4575_v12, %v1101_v39  ;;  %v1435_v29 = vpop.permute.xlu1 %1434  ;;  %v1568_v24 = vsel %vm308_vm1, %v4645_v56, 0 }
 0x5ae   :  { %3819 = vpow2.f32 %v1158_v4  ;;  %3420 = vmatprep.mubr.msk.bf16.mxu1 %vm499_vm2, %v1232_v1  ;;  %v1472_v4 = vsel %vm308_vm1, %v4664_v60, 0 }
 0x5af   :  { %v4684_v42 = vpop.eup %3809  ;;  %v1154_v45 = vmul.f32 1.442695, %v1129_v20  ;;  %3421 = vmatmul.mubr.msk.bf16.vlgmr.msra.gmra.mrb[16].mxu1 %vm499_vm2, %v5703_v11  ;;  %3821 = vpow2.f32 %v1152_v35 }
 0x5b0   :  { %v4692_v36 = vpop.eup %3811  ;;  %3445 = vmatpush3.bf16.xpose.msra.mxu1 %v1463_v27  ;;  %v1550_v35 = vpop.permute.xlu0 %1549 }
 0x5b1   :  { %3823 = vpow2.f32 %v1154_v45  ;;  %3609 = vmatprep.subr.msk.bf16.mxu1 %vm308_vm1, %v4637_v57  ;;  %v1235_v12 = vpack.c.bf16 %v4692_v36, %v4684_v42  ;;  %v4698_v25 = vpop.eup %3813  ;;  %v1469_v57 = vsel %vm308_vm1, %v4666_v28, 0  ;;  %v1571_v39 = vsel %vm308_vm1, %v1550_v35, 0 }
 0x5b3   :  { %v4700_v61 = vpop.eup %3815 }
 0x5b4   :  { %v1234_v62 = vpack.c.bf16 %v4700_v61, %v4698_v25 }
 0x5b6   :  { %3424 = vmatprep.mubr.msk.bf16.mxu1 %vm499_vm2, %v1234_v62 }
 0x5b7   :  { %v4705_v32 = vpop.eup %3817  ;;  %3425 = vmatmul.mubr.msk.bf16.gmra.mrb[20].mxu1 %vm499_vm2, %v1235_v12 }
 0x5b8   :  { %v4710_v34 = vpop.eup %3819  ;;  %3447 = vmatpush3.bf16.xpose.msra.mxu1 %v1466_v38  ;;  %3452 = vmatprep.mubr.msk.bf16.mxu1 %vm308_vm1, %v1435_v29 }
 0x5b9   :  { %v1237_v40 = vpack.c.bf16 %v4710_v34, %v4705_v32  ;;  %3610 = vmatprep.subr.msk.bf16.mxu1 %vm308_vm1, %v4666_v28  ;;  %v4717_v19 = vpop.eup %3821 }
 0x5bb   :  { %v4719_v33 = vpop.eup %3823 }
 0x5bc   :  { %v1236_v17 = vpack.c.bf16 %v4719_v33, %v4717_v19 }
 0x5be   :  { %3436 = vmatprep.mubr.msk.bf16.mxu0 %vm499_vm2, %v1236_v17 }
 0x5bf   :  { %3437 = vmatmul.mubr.msk.bf16.vlgmr.msra.gmra.mrb[48].mxu0 %vm499_vm2, %v1237_v40 }
 0x5c0   :  { %3449 = vmatpush3.bf16.xpose.msra.mxu1 %v1469_v57  ;;  %3461 = vmatpush3.bf16.xpose.msra.mxu0 %v1568_v24 }
 0x5c1   :  { %3611 = vmatprep.subr.msk.bf16.mxu1 %vm308_vm1, %v4664_v60  ;;  %3613 = vmatprep.subr.msk.bf16.mxu0 %vm308_vm1, %v1550_v35 }
 0x5c8   :  { %3451 = vmatpush3.bf16.xpose.msra.mxu1 %v1472_v4  ;;  %3463 = vmatpush3.bf16.xpose.msra.mxu0 %v1571_v39 }
 0x5de   :  { %v1116_v1 = vpop.xlane.xlu1 %1115 }
 0x5df   :  { %v1134_v28 = vsub.f32 %v4580_v46, %v1116_v1 }
 0x5e1   :  { %v1110_v20 = vpop.xlane.xlu0 %1109  ;;  %v1164_v56 = vmul.f32 1.442695, %v1134_v28 }
 0x5e2   :  { %v1132_v45 = vsub.f32 %v4585_v13, %v1110_v20  ;;  %v1119_v11 = vpop.xlane.xlu1 %1118 }
 0x5e3   :  { %v1135_v27 = vsub.f32 %v4587_v50, %v1119_v11  ;;  %3825 = vpow2.f32 %v1164_v56 }
 0x5e4   :  { %v1160_v29 = vmul.f32 1.442695, %v1132_v45 }
 0x5e5   :  { %v1166_v12 = vmul.f32 1.442695, %v1135_v27  ;;  %v1437_v62 = vpop.permute.xlu0 %1436 }
 0x5e6   :  { %v1113_v38 = vpop.xlane.xlu1 %1112  ;;  %3453 = vmatmul.mubr.msk.bf16.vlgmr.msra.gmra.mrb[24].mxu1 %vm308_vm1, %v1437_v62 }
 0x5e7   :  { %3827 = vpow2.f32 %v1166_v12  ;;  %v1133_v60 = vsub.f32 %v4589_v14, %v1113_v38 }
 0x5e8   :  { %3829 = vpow2.f32 %v1160_v29 }
 0x5e9   :  { %v1162_v40 = vmul.f32 1.442695, %v1133_v60  ;;  %v1554_v17 = vpop.permute.xlu0 %1553 }
 0x5ea   :  { %v1552_v46 = vpop.permute.xlu1 %1551  ;;  %v1577_v1 = vsel %vm308_vm1, %v1554_v17, 0 }
 0x5eb   :  { %3831 = vpow2.f32 %v1162_v40  ;;  %3614 = vmatprep.subr.msk.bf16.mxu0 %vm308_vm1, %v1552_v46  ;;  %v1574_v13 = vsel %vm308_vm1, %v1552_v46, 0 }
 0x5ec   :  { %3465 = vmatpush3.bf16.xpose.msra.mxu0 %v1574_v13 }
 0x5ed   :  { %3615 = vmatprep.subr.msk.bf16.mxu0 %vm308_vm1, %v1554_v17  ;;  %v1542_v50 = vpop.permute.xlu0 %1541  ;;  %v4743_v24 = vpop.eup %3825 }
 0x5ee   :  { %v1540_v57 = vpop.permute.xlu1 %1539 }
 0x5f1   :  { %v4745_v35 = vpop.eup %3827  ;;  %v1441_v39 = vpop.permute.xlu0 %1440 }
 0x5f2   :  { %v1439_v4 = vpop.permute.xlu1 %1438  ;;  %v1239_v14 = vpack.c.bf16 %v4745_v35, %v4743_v24  ;;  %v4751_v28 = vpop.eup %3829 }
 0x5f3   :  { %3456 = vmatprep.mubr.msk.bf16.mxu1 %vm308_vm1, %v1439_v4 }
 0x5f4   :  { %3457 = vmatmul.mubr.msk.bf16.gmra.mrb[28].mxu1 %vm308_vm1, %v1441_v39  ;;  %3467 = vmatpush3.bf16.xpose.msra.mxu0 %v1577_v1 }
 0x5f5   :  { %v4754_v20 = vpop.eup %3831  ;;  %v1546_v11 = vpop.permute.xlu0 %1545 }
 0x5f6   :  { %v1238_v56 = vpack.c.bf16 %v4754_v20, %v4751_v28  ;;  %v1544_v45 = vpop.permute.xlu1 %1543 }
 0x5f8   :  { %3440 = vmatprep.mubr.msk.bf16.mxu0 %vm499_vm2, %v1238_v56 }
 0x5f9   :  { %3441 = vmatmul.mubr.msk.bf16.gmra.mrb[52].mxu0 %vm499_vm2, %v1239_v14 }
 0x5fa   :  { %3468 = vmatprep.mubr.msk.bf16.mxu0 %vm308_vm1, %v1540_v57 }
 0x601   :  { %3469 = vmatmul.mubr.msk.bf16.vlgmr.msra.gmra.mrb[56].mxu0 %vm308_vm1, %v1542_v50 }
 0x602   :  { %3472 = vmatprep.mubr.msk.bf16.mxu0 %vm308_vm1, %v1544_v45 }
 0x609   :  { %3473 = vmatmul.mubr.msk.bf16.gmra.mrb[60].mxu0 %vm308_vm1, %v1546_v11 }
 0x682   :  { %v4764_v27 = vpop.f32.mrb[16].mxu1 }
 0x683   :  { %5704 = vst [vmem:[#allocation41_spill] sm:$0xff] %v4764_v27  ;;  %v4766_v12 = vpop.f32.mrb[17].mxu1 }
 0x684   :  { %5705 = vst [vmem:[#allocation42_spill] sm:$0xff] %v4766_v12  ;;  %v4768_v62 = vpop.f32.mrb[18].mxu1 }
 0x685   :  { %5706 = vst [vmem:[#allocation43_spill] sm:$0xff] %v4768_v62  ;;  %v4770_v29 = vpop.f32.mrb[19].mxu1 }
 0x686   :  { %5707 = vst [vmem:[#allocation44_spill] sm:$0xff] %v4770_v29 }
 0x68a   :  { %v4772_v38 = vpop.f32.mrb[20].mxu1 }
 0x68b   :  { %5708 = vst [vmem:[#allocation45_spill] sm:$0xff] %v4772_v38  ;;  %v4774_v60 = vpop.f32.mrb[21].mxu1 }
 0x68c   :  { %5709 = vst [vmem:[#allocation46_spill] sm:$0xff] %v4774_v60  ;;  %v4776_v40 = vpop.f32.mrb[22].mxu1 }
 0x68d   :  { %5710 = vst [vmem:[#allocation47_spill] sm:$0xff] %v4776_v40  ;;  %v4778_v17 = vpop.f32.mrb[23].mxu1 }
 0x68e   :  { %5711 = vst [vmem:[#allocation48_spill] sm:$0xff] %v4778_v17 }
 0x692   :  { %v4780_v46 = vpop.f32.mrb[48].mxu0 }
 0x693   :  { %5712 = vst [vmem:[#allocation49_spill] sm:$0xff] %v4780_v46  ;;  %v4782_v13 = vpop.f32.mrb[49].mxu0 }
 0x694   :  { %5713 = vst [vmem:[#allocation50_spill] sm:$0xff] %v4782_v13  ;;  %v4784_v50 = vpop.f32.mrb[50].mxu0 }
 0x695   :  { %5714 = vst [vmem:[#allocation51_spill] sm:$0xff] %v4784_v50  ;;  %v4786_v57 = vpop.f32.mrb[51].mxu0 }
 0x696   :  { %5715 = vst [vmem:[#allocation52_spill] sm:$0xff] %v4786_v57 }
 0x6b9   :  { %v4788_v4 = vpop.f32.mrb[24].mxu1 }
 0x6ba   :  { %v4790_v14 = vpop.f32.mrb[25].mxu1  ;;  %v1650_v39 = vsel %vm499_vm2, %v4788_v4, -inf }
 0x6bb   :  { %1651 = vmax.xlane.f32.xlu0 %v1650_v39  ;;  %v4794_v1 = vpop.f32.mrb[26].mxu1  ;;  %v1644_v56 = vsel %vm499_vm2, %v4790_v14, -inf }
 0x6bc   :  { %1645 = vmax.xlane.f32.xlu1 %v1644_v56  ;;  %v4798_v45 = vpop.f32.mrb[27].mxu1  ;;  %v1653_v11 = vsel %vm499_vm2, %v4794_v1, -inf }
 0x6bd   :  { %v1647_v40 = vsel %vm499_vm2, %v4798_v45, -inf }
 0x6c0   :  { %1654 = vmax.xlane.f32.xlu1 %v1653_v11 }
 0x6c7   :  { %v4802_v15 = vpop.f32.mrb[28].mxu1 }
 0x6c8   :  { %v4804_v2 = vpop.f32.mrb[29].mxu1  ;;  %v1662_v17 = vsel %vm499_vm2, %v4802_v15, -inf }
 0x6c9   :  { %v4806_v16 = vpop.f32.mrb[30].mxu1  ;;  %v1656_v38 = vsel %vm499_vm2, %v4804_v2, -inf }
 0x6ca   :  { %v4808_v5 = vpop.f32.mrb[31].mxu1  ;;  %v1665_v60 = vsel %vm499_vm2, %v4806_v16, -inf }
 0x6cb   :  { %v1659_v48 = vsel %vm499_vm2, %v4808_v5, -inf }
 0x6cc   :  { %v4810_v39 = vpop.f32.mrb[52].mxu0 }
 0x6cd   :  { %5716 = vst [vmem:[#allocation53_spill] sm:$0xff] %v4810_v39  ;;  %v4812_v7 = vpop.f32.mrb[53].mxu0 }
 0x6ce   :  { %5717 = vst [vmem:[#allocation54_spill] sm:$0xff] %v4812_v7  ;;  %v4814_v50 = vpop.f32.mrb[54].mxu0 }
 0x6cf   :  { %5718 = vst [vmem:[#allocation55_spill] sm:$0xff] %v4814_v50  ;;  %v4816_v56 = vpop.f32.mrb[55].mxu0 }
 0x6d0   :  { %5719 = vst [vmem:[#allocation56_spill] sm:$0xff] %v4816_v56 }
 0x6d1   :  { %1812 = vrot.lane.b32.xlu0 %v4227_v44, %s4132_s12  ;;  %1814 = vrot.lane.b32.xlu1 %v4225_v43, %s4132_s12 }
 0x6d4   :  { %v4820_v11 = vpop.f32.mrb[56].mxu0 }
 0x6d5   :  { %1816 = vrot.lane.b32.xlu0 %v4237_v54, %s4132_s12  ;;  %1818 = vrot.lane.b32.xlu1 %v4235_v53, %s4132_s12  ;;  %v4824_v46 = vpop.f32.mrb[57].mxu0 }
 0x6d6   :  { %v4826_v39 = vpop.f32.mrb[58].mxu0  ;;  %v1668_v59 = vsel %vm499_vm2, %v4824_v46, -inf }
 0x6d7   :  { %v4828_v7 = vpop.f32.mrb[59].mxu0 }
 0x6d9   :  { %1901 = vrot.lane.b32.xlu0 %v4243_v0, %s4132_s12  ;;  %1903 = vrot.lane.b32.xlu1 %v4241_v63, %s4132_s12 }
 0x6dc   :  { %v4832_v50 = vpop.f32.mrb[60].mxu0 }
 0x6dd   :  { %1905 = vrot.lane.b32.xlu0 %v4255_v10, %s4132_s12  ;;  %2014 = vrot.lane.b32.xlu1 %v4227_v44, %s4133_s13  ;;  %v4837_v56 = vpop.f32.mrb[61].mxu0 }
 0x6de   :  { %v4839_v57 = vpop.f32.mrb[62].mxu0  ;;  %v1680_v62 = vsel %vm499_vm2, %v4837_v56, -inf }
 0x6df   :  { %v4841_v13 = vpop.f32.mrb[63].mxu0 }
 0x6e1   :  { %2016 = vrot.lane.b32.xlu0 %v4225_v43, %s4133_s13  ;;  %1907 = vrot.lane.b32.xlu1 %v4253_v9, %s4132_s12 }
 0x6e5   :  { %2119 = vrot.lane.b32.xlu0 %v4243_v0, %s4133_s13  ;;  %2018 = vrot.lane.b32.xlu1 %v4237_v54, %s4133_s13 }
 0x6e9   :  { %2020 = vrot.lane.b32.xlu0 %v4235_v53, %s4133_s13  ;;  %2006 = vrot.lane.b32.xlu1 %v4227_v44, %s4134_s14 }
 0x6ed   :  { %2121 = vrot.lane.b32.xlu0 %v4241_v63, %s4133_s13 }
 0x70c   :  { %1648 = vmax.xlane.f32.xlu0 %v1647_v40  ;;  %v1674_v40 = vsel %vm499_vm2, %v4820_v11, -inf }
 0x70d   :  { %1657 = vmax.xlane.f32.xlu1 %v1656_v38  ;;  %v1677_v38 = vsel %vm499_vm2, %v4826_v39, -inf }
 0x710   :  { %1663 = vmax.xlane.f32.xlu0 %v1662_v17  ;;  %v1671_v17 = vsel %vm499_vm2, %v4828_v7, -inf }
 0x711   :  { %1666 = vmax.xlane.f32.xlu1 %v1665_v60 }
 0x714   :  { %1660 = vmax.xlane.f32.xlu0 %v1659_v48 }
 0x715   :  { %1669 = vmax.xlane.f32.xlu1 %v1668_v59 }
 0x718   :  { %1675 = vmax.xlane.f32.xlu0 %v1674_v40 }
 0x719   :  { %1678 = vmax.xlane.f32.xlu1 %v1677_v38  ;;  %v1686_v38 = vsel %vm499_vm2, %v4832_v50, -inf }
 0x71c   :  { %1672 = vmax.xlane.f32.xlu0 %v1671_v17 }
 0x72a   :  { %2123 = vrot.lane.b32.xlu1 %v4255_v10, %s4133_s13 }
 0x732   :  { %2008 = vrot.lane.b32.xlu0 %v4225_v43, %s4134_s14 }
 0x748   :  { %v1652_v48 = vpop.xlane.xlu0 %1651 }
 0x749   :  { %v1694_v59 = vsub.f32 %v4788_v4, %v1652_v48  ;;  %v1646_v60 = vpop.xlane.xlu1 %1645  ;;  %v1689_v4 = vsel %vm499_vm2, %v4839_v57, -inf }
 0x74b   :  { %v1712_v40 = vmul.f32 1.442695, %v1694_v59 }
 0x74c   :  { %v1813_v47 = vpop.permute.xlu0 %1812 }
 0x74d   :  { %v1655_v23 = vpop.xlane.xlu1 %1654  ;;  %3476 = vmatprep.subr.bf16.mxu1 %v1813_v47  ;;  %3833 = vpow2.f32 %v1712_v40 }
 0x74e   :  { %v1695_v58 = vsub.f32 %v4794_v1, %v1655_v23  ;;  %1687 = vmax.xlane.f32.xlu1 %v1686_v38  ;;  %3477 = vmatpush3.bf16.msra.mxu1 %v1813_v47  ;;  %v1683_v47 = vsel %vm499_vm2, %v4841_v13, -inf }
 0x750   :  { %v1714_v17 = vmul.f32 1.442695, %v1695_v58  ;;  %v1817_v30 = vpop.permute.xlu0 %1816 }
 0x751   :  { %v1815_v27 = vpop.permute.xlu1 %1814  ;;  %1681 = vmax.xlane.f32.xlu0 %v1680_v62 }
 0x752   :  { %3835 = vpow2.f32 %v1714_v17  ;;  %1690 = vmax.xlane.f32.xlu1 %v1689_v4  ;;  %3478 = vmatprep.subr.bf16.mxu1 %v1815_v27 }
 0x753   :  { %3479 = vmatpush3.bf16.msra.mxu1 %v1815_v27 }
 0x754   :  { %3480 = vmatprep.subr.bf16.mxu1 %v1817_v30  ;;  %v1902_v48 = vpop.permute.xlu0 %1901 }
 0x755   :  { %v1819_v23 = vpop.permute.xlu1 %1818  ;;  %3492 = vmatprep.subr.bf16.mxu0 %v1902_v48 }
 0x756   :  { %1684 = vmax.xlane.f32.xlu1 %v1683_v47  ;;  %3493 = vmatpush3.bf16.msra.mxu0 %v1902_v48 }
 0x757   :  { %3481 = vmatpush3.bf16.msra.mxu1 %v1817_v30  ;;  %v4888_v1 = vpop.eup %3833 }
 0x758   :  { %3482 = vmatprep.subr.bf16.mxu1 %v1819_v23  ;;  %v1906_v58 = vpop.permute.xlu0 %1905 }
 0x759   :  { %v1904_v62 = vpop.permute.xlu1 %1903 }
 0x75a   :  { %3494 = vmatprep.subr.bf16.mxu0 %v1904_v62 }
 0x75b   :  { %3483 = vmatpush3.bf16.msra.mxu1 %v1819_v23  ;;  %3495 = vmatpush3.bf16.msra.mxu0 %v1904_v62  ;;  %v1692_v23 = vsub.f32 %v4790_v14, %v1646_v60 }
 0x75c   :  { %v4890_v59 = vpop.eup %3835  ;;  %3496 = vmatprep.subr.bf16.mxu0 %v1906_v58  ;;  %v4894_v40 = vpop.permute.xlu0 %2016 }
 0x75d   :  { %v2015_v38 = vpop.permute.xlu1 %2014  ;;  %v1708_v62 = vmul.f32 1.442695, %v1692_v23 }
 0x75e   :  { %3616 = vmatprep.subr.msk.bf16.mxu1 %vm308_vm1, %v2015_v38 }
 0x75f   :  { %3497 = vmatpush3.bf16.msra.mxu0 %v1906_v58  ;;  %3837 = vpow2.f32 %v1708_v62  ;;  %v2035_v62 = vsel %vm308_vm1, %v2015_v38, 0 }
 0x760   :  { %v4897_v17 = vpop.permute.xlu0 %2119 }
 0x761   :  { %v1908_v30 = vpop.permute.xlu1 %1907 }
 0x762   :  { %3498 = vmatprep.subr.bf16.mxu0 %v1908_v30 }
 0x763   :  { %3499 = vmatpush3.bf16.msra.mxu0 %v1908_v30 }
 0x764   :  { %3620 = vmatprep.subr.msk.bf16.mxu0 %vm308_vm1, %v4897_v17  ;;  %v4915_v4 = vpop.permute.xlu0 %2020 }
 0x765   :  { %v4917_v48 = vpop.permute.xlu1 %2018 }
 0x767   :  { %2010 = vrot.lane.b32.xlu0 %v4237_v54, %s4134_s14  ;;  %2012 = vrot.lane.b32.xlu1 %v4235_v53, %s4134_s14 }
 0x768   :  { %v4920_v47 = vpop.permute.xlu0 %2121 }
 0x769   :  { %v2007_v58 = vpop.permute.xlu1 %2006 }
 0x76b   :  { %2125 = vrot.lane.b32.xlu0 %v4253_v9, %s4133_s13  ;;  %2111 = vrot.lane.b32.xlu1 %v4243_v0, %s4134_s14 }
 0x76f   :  { %2113 = vrot.lane.b32.xlu0 %v4241_v63, %s4134_s14  ;;  %2115 = vrot.lane.b32.xlu1 %v4255_v10, %s4134_s14 }
 0x773   :  { %2117 = vrot.lane.b32.xlu0 %v4253_v9, %s4134_s14 }
 0x799   :  { %v1649_v30 = vpop.xlane.xlu0 %1648 }
 0x79a   :  { %v1693_v27 = vsub.f32 %v4798_v45, %v1649_v30  ;;  %v1658_v22 = vpop.xlane.xlu1 %1657 }
 0x79b   :  { %v1696_v29 = vsub.f32 %v4804_v2, %v1658_v22 }
 0x79c   :  { %v1710_v12 = vmul.f32 1.442695, %v1693_v27 }
 0x79d   :  { %v1664_v8 = vpop.xlane.xlu0 %1663  ;;  %v1716_v60 = vmul.f32 1.442695, %v1696_v29 }
 0x79e   :  { %3839 = vpow2.f32 %v1710_v12  ;;  %v1698_v31 = vsub.f32 %v4802_v15, %v1664_v8  ;;  %v1667_v55 = vpop.xlane.xlu1 %1666  ;;  %v4929_v12 = vpop.eup %3837 }
 0x79f   :  { %v1699_v21 = vsub.f32 %v4806_v16, %v1667_v55 }
 0x7a0   :  { %v1720_v14 = vmul.f32 1.442695, %v1698_v31 }
 0x7a1   :  { %v1722_v52 = vmul.f32 1.442695, %v1699_v21  ;;  %v1661_v3 = vpop.xlane.xlu0 %1660 }
 0x7a2   :  { %3841 = vpow2.f32 %v1720_v14  ;;  %v1697_v23 = vsub.f32 %v4808_v5, %v1661_v3  ;;  %v1670_v45 = vpop.xlane.xlu1 %1669 }
 0x7a3   :  { %3843 = vpow2.f32 %v1722_v52  ;;  %v1700_v22 = vsub.f32 %v4824_v46, %v1670_v45  ;;  %v2038_v45 = vsel %vm308_vm1, %v4894_v40, 0 }
 0x7a4   :  { %v1718_v27 = vmul.f32 1.442695, %v1697_v23  ;;  %3845 = vpow2.f32 %v1716_v60 }
 0x7a5   :  { %v1676_v2 = vpop.xlane.xlu0 %1675  ;;  %v1724_v16 = vmul.f32 1.442695, %v1700_v22 }
 0x7a6   :  { %3847 = vpow2.f32 %v1718_v27  ;;  %v1702_v8 = vsub.f32 %v4820_v11, %v1676_v2  ;;  %v1679_v15 = vpop.xlane.xlu1 %1678 }
 0x7a7   :  { %v1703_v55 = vsub.f32 %v4826_v39, %v1679_v15  ;;  %v5720_v39 = vpack.c.bf16 %v4890_v59, %v4888_v1 }
 0x7a8   :  { %v4932_v31 = vpop.eup %3839  ;;  %v1728_v21 = vmul.f32 1.442695, %v1702_v8 }
 0x7a9   :  { %v1730_v3 = vmul.f32 1.442695, %v1703_v55  ;;  %v1673_v5 = vpop.xlane.xlu0 %1672  ;;  %v1804_v52 = vpack.c.bf16 %v4932_v31, %v4929_v12  ;;  %v2044_v55 = vsel %vm308_vm1, %v4915_v4, 0 }
 0x7aa   :  { %3849 = vpow2.f32 %v1728_v21  ;;  %v1701_v29 = vsub.f32 %v4828_v7, %v1673_v5  ;;  %v2143_v21 = vsel %vm308_vm1, %v4920_v47, 0 }
 0x7ab   :  { %3851 = vpow2.f32 %v1730_v3  ;;  %3484 = vmatprep.mubr.msk.bf16.mxu1 %vm499_vm2, %v1804_v52 }
 0x7ac   :  { %v4938_v46 = vpop.eup %3841  ;;  %v1726_v11 = vmul.f32 1.442695, %v1701_v29  ;;  %3485 = vmatmul.mubr.msk.bf16.vlgmr.msra.gmra.mrb[32].mxu1 %vm499_vm2, %v5720_v39  ;;  %3853 = vpow2.f32 %v1724_v16  ;;  %v2124_v16 = vpop.permute.xlu1 %2123 }
 0x7ad   :  { %v4945_v30 = vpop.eup %3843  ;;  %3509 = vmatpush3.bf16.xpose.msra.mxu1 %v2035_v62 }
 0x7ae   :  { %3855 = vpow2.f32 %v1726_v11  ;;  %3617 = vmatprep.subr.msk.bf16.mxu1 %vm308_vm1, %v4894_v40  ;;  %v1807_v7 = vpack.c.bf16 %v4945_v30, %v4938_v46  ;;  %v4951_v14 = vpop.eup %3845  ;;  %v2041_v40 = vsel %vm308_vm1, %v4917_v48, 0 }
 0x7b0   :  { %v4953_v60 = vpop.eup %3847 }
 0x7b1   :  { %v1806_v23 = vpack.c.bf16 %v4953_v60, %v4951_v14 }
 0x7b3   :  { %3488 = vmatprep.mubr.msk.bf16.mxu1 %vm499_vm2, %v1806_v23 }
 0x7b4   :  { %v4958_v38 = vpop.eup %3849  ;;  %3489 = vmatmul.mubr.msk.bf16.gmra.mrb[36].mxu1 %vm499_vm2, %v1807_v7 }
 0x7b5   :  { %v4963_v27 = vpop.eup %3851  ;;  %3511 = vmatpush3.bf16.xpose.msra.mxu1 %v2038_v45  ;;  %3516 = vmatprep.mubr.msk.bf16.mxu1 %vm308_vm1, %v2007_v58  ;;  %v2140_v58 = vsel %vm308_vm1, %v4897_v17, 0  ;;  %v2009_v17 = vpop.permute.xlu0 %2008 }
 0x7b6   :  { %v1809_v22 = vpack.c.bf16 %v4963_v27, %v4958_v38  ;;  %3618 = vmatprep.subr.msk.bf16.mxu1 %vm308_vm1, %v4917_v48  ;;  %v4970_v2 = vpop.eup %3853  ;;  %v2146_v48 = vsel %vm308_vm1, %v2124_v16, 0 }
 0x7b8   :  { %v4972_v8 = vpop.eup %3855 }
 0x7b9   :  { %v1808_v15 = vpack.c.bf16 %v4972_v8, %v4970_v2 }
 0x7bb   :  { %3500 = vmatprep.mubr.msk.bf16.mxu0 %vm499_vm2, %v1808_v15 }
 0x7bc   :  { %3501 = vmatmul.mubr.msk.bf16.vlgmr.msra.gmra.mrb[64].mxu0 %vm499_vm2, %v1809_v22 }
 0x7bd   :  { %3513 = vmatpush3.bf16.xpose.msra.mxu1 %v2041_v40  ;;  %3525 = vmatpush3.bf16.xpose.msra.mxu0 %v2140_v58 }
 0x7be   :  { %3619 = vmatprep.subr.msk.bf16.mxu1 %vm308_vm1, %v4915_v4  ;;  %3621 = vmatprep.subr.msk.bf16.mxu0 %vm308_vm1, %v4920_v47 }
 0x7c5   :  { %3515 = vmatpush3.bf16.xpose.msra.mxu1 %v2044_v55  ;;  %3527 = vmatpush3.bf16.xpose.msra.mxu0 %v2143_v21 }
 0x7c6   :  { %3622 = vmatprep.subr.msk.bf16.mxu0 %vm308_vm1, %v2124_v16 }
 0x7cc   :  { %3517 = vmatmul.mubr.msk.bf16.vlgmr.msra.gmra.mrb[40].mxu1 %vm308_vm1, %v2009_v17 }
 0x7cd   :  { %3529 = vmatpush3.bf16.xpose.msra.mxu0 %v2146_v48 }
 0x7db   :  { %v1688_v3 = vpop.xlane.xlu1 %1687 }
 0x7dc   :  { %v1706_v5 = vsub.f32 %v4832_v50, %v1688_v3 }
 0x7de   :  { %v1682_v52 = vpop.xlane.xlu0 %1681  ;;  %v1736_v29 = vmul.f32 1.442695, %v1706_v5 }
 0x7df   :  { %v1704_v4 = vsub.f32 %v4837_v56, %v1682_v52  ;;  %v1691_v11 = vpop.xlane.xlu1 %1690 }
 0x7e0   :  { %v1707_v47 = vsub.f32 %v4839_v57, %v1691_v11  ;;  %3857 = vpow2.f32 %v1736_v29 }
 0x7e1   :  { %v1732_v7 = vmul.f32 1.442695, %v1704_v4 }
 0x7e2   :  { %v1738_v39 = vmul.f32 1.442695, %v1707_v47  ;;  %v2011_v62 = vpop.permute.xlu0 %2010 }
 0x7e3   :  { %v1685_v23 = vpop.xlane.xlu1 %1684  ;;  %3520 = vmatprep.mubr.msk.bf16.mxu1 %vm308_vm1, %v2011_v62 }
 0x7e4   :  { %3859 = vpow2.f32 %v1738_v39  ;;  %v1705_v45 = vsub.f32 %v4841_v13, %v1685_v23 }
 0x7e5   :  { %3861 = vpow2.f32 %v1732_v7 }
 0x7e6   :  { %v1734_v22 = vmul.f32 1.442695, %v1705_v45  ;;  %v2126_v15 = vpop.permute.xlu0 %2125 }
 0x7e7   :  { %v2013_v50 = vpop.permute.xlu1 %2012  ;;  %3623 = vmatprep.subr.msk.bf16.mxu0 %vm308_vm1, %v2126_v15  ;;  %v2149_v56 = vsel %vm308_vm1, %v2126_v15, 0 }
 0x7e8   :  { %3863 = vpow2.f32 %v1734_v22  ;;  %3521 = vmatmul.mubr.msk.bf16.gmra.mrb[44].mxu1 %vm308_vm1, %v2013_v50  ;;  %3531 = vmatpush3.bf16.xpose.msra.mxu0 %v2149_v56 }
 0x7ea   :  { %v5001_v57 = vpop.eup %3857  ;;  %v2114_v17 = vpop.permute.xlu0 %2113 }
 0x7eb   :  { %v2112_v16 = vpop.permute.xlu1 %2111 }
 0x7ee   :  { %v5003_v40 = vpop.eup %3859  ;;  %v2118_v3 = vpop.permute.xlu0 %2117 }
 0x7ef   :  { %v1811_v58 = vpack.c.bf16 %v5003_v40, %v5001_v57  ;;  %v5007_v13 = vpop.eup %3861  ;;  %v2116_v48 = vpop.permute.xlu1 %2115 }
 0x7f2   :  { %v5009_v55 = vpop.eup %3863 }
 0x7f3   :  { %v1810_v21 = vpack.c.bf16 %v5009_v55, %v5007_v13 }
 0x7f5   :  { %3504 = vmatprep.mubr.msk.bf16.mxu0 %vm499_vm2, %v1810_v21 }
 0x7f6   :  { %3505 = vmatmul.mubr.msk.bf16.gmra.mrb[68].mxu0 %vm499_vm2, %v1811_v58 }
 0x7f7   :  { %3532 = vmatprep.mubr.msk.bf16.mxu0 %vm308_vm1, %v2112_v16 }
 0x7fe   :  { %3533 = vmatmul.mubr.msk.bf16.vlgmr.msra.gmra.mrb[72].mxu0 %vm308_vm1, %v2114_v17 }
 0x7ff   :  { %3536 = vmatprep.mubr.msk.bf16.mxu0 %vm308_vm1, %v2116_v48 }
 0x806   :  { %3537 = vmatmul.mubr.msk.bf16.gmra.mrb[76].mxu0 %vm308_vm1, %v2118_v3 }
 0x87f   :  { %v5019_v5 = vpop.f32.mrb[32].mxu1 }
 0x880   :  { %5721 = vst [vmem:[#allocation57_spill] sm:$0xff] %v5019_v5  ;;  %v5021_v52 = vpop.f32.mrb[33].mxu1 }
 0x881   :  { %v5023_v29 = vpop.f32.mrb[34].mxu1 }
 0x882   :  { %5722 = vst [vmem:[#allocation58_spill] sm:$0xff] %v5023_v29  ;;  %v5025_v4 = vpop.f32.mrb[35].mxu1 }
 0x887   :  { %v5027_v11 = vpop.f32.mrb[36].mxu1 }
 0x888   :  { %5723 = vst [vmem:[#allocation59_spill] sm:$0xff] %v5027_v11  ;;  %v5029_v47 = vpop.f32.mrb[37].mxu1 }
 0x889   :  { %5724 = vst [vmem:[#allocation60_spill] sm:$0xff] %v5029_v47  ;;  %v5031_v39 = vpop.f32.mrb[38].mxu1 }
 0x88a   :  { %5725 = vst [vmem:[#allocation61_spill] sm:$0xff] %v5031_v39  ;;  %v5033_v62 = vpop.f32.mrb[39].mxu1 }
 0x88b   :  { %5726 = vst [vmem:[#allocation62_spill] sm:$0xff] %v5033_v62 }
 0x88f   :  { %v5035_v7 = vpop.f32.mrb[64].mxu0 }
 0x890   :  { %5727 = vst [vmem:[#allocation63_spill] sm:$0xff] %v5035_v7  ;;  %v5037_v23 = vpop.f32.mrb[65].mxu0 }
 0x891   :  { %5728 = vst [vmem:[#allocation64_spill] sm:$0xff] %v5037_v23  ;;  %v5039_v45 = vpop.f32.mrb[66].mxu0 }
 0x892   :  { %5729 = vst [vmem:[#allocation65_spill] sm:$0xff] %v5039_v45  ;;  %v5041_v22 = vpop.f32.mrb[67].mxu0 }
 0x893   :  { %5730 = vst [vmem:[#allocation66_spill] sm:$0xff] %v5041_v22 }
 0x89f   :  { %v5043_v15 = vpop.f32.mrb[40].mxu1 }
 0x8a0   :  { %v5045_v50 = vpop.f32.mrb[41].mxu1  ;;  %v2222_v56 = vsel %vm499_vm2, %v5043_v15, -inf }
 0x8a1   :  { %2223 = vmax.xlane.f32.xlu0 %v2222_v56  ;;  %v5049_v58 = vpop.f32.mrb[42].mxu1  ;;  %v2216_v21 = vsel %vm499_vm2, %v5045_v50, -inf }
 0x8a2   :  { %2217 = vmax.xlane.f32.xlu1 %v2216_v21  ;;  %v5053_v16 = vpop.f32.mrb[43].mxu1  ;;  %v2225_v17 = vsel %vm499_vm2, %v5049_v58, -inf }
 0x8a3   :  { %v2219_v39 = vsel %vm499_vm2, %v5053_v16, -inf }
 0x8a6   :  { %2226 = vmax.xlane.f32.xlu1 %v2225_v17 }
 0x8b7   :  { %2384 = vrot.lane.b32.xlu0 %v4227_v44, %s4135_s15  ;;  %2386 = vrot.lane.b32.xlu1 %v4225_v43, %s4135_s15 }
 0x8bb   :  { %2388 = vrot.lane.b32.xlu0 %v4237_v54, %s4135_s15  ;;  %v5063_v48 = vpop.f32.mrb[44].mxu1 }
 0x8bc   :  { %v5065_v3 = vpop.f32.mrb[45].mxu1  ;;  %v2234_v62 = vsel %vm499_vm2, %v5063_v48, -inf }
 0x8bd   :  { %v5067_v56 = vpop.f32.mrb[46].mxu1 }
 0x8be   :  { %v5069_v21 = vpop.f32.mrb[47].mxu1 }
 0x8bf   :  { %v2231_v47 = vsel %vm499_vm2, %v5069_v21, -inf }
 0x8c9   :  { %v5071_v45 = vpop.f32.mrb[68].mxu0 }
 0x8ca   :  { %5731 = vst [vmem:[#allocation67_spill] sm:$0xff] %v5071_v45  ;;  %v5073_v17 = vpop.f32.mrb[69].mxu0  ;;  %v2237_v45 = vsel %vm499_vm2, %v5067_v56, -inf }
 0x8cb   :  { %5732 = vst [vmem:[#allocation68_spill] sm:$0xff] %v5073_v17  ;;  %v5075_v7 = vpop.f32.mrb[70].mxu0 }
 0x8cc   :  { %5733 = vst [vmem:[#allocation69_spill] sm:$0xff] %v5075_v7  ;;  %v5077_v44 = vpop.f32.mrb[71].mxu0 }
 0x8cd   :  { %5734 = vst [vmem:[#allocation70_spill] sm:$0xff] %v5077_v44 }
 0x8d1   :  { %v5079_v43 = vpop.f32.mrb[72].mxu0 }
 0x8d2   :  { %v5081_v22 = vpop.f32.mrb[73].mxu0  ;;  %v2246_v29 = vsel %vm499_vm2, %v5079_v43, -inf }
 0x8d3   :  { %v5083_v54 = vpop.f32.mrb[74].mxu0 }
 0x8d4   :  { %v5085_v23 = vpop.f32.mrb[75].mxu0  ;;  %v2249_v5 = vsel %vm499_vm2, %v5083_v54, -inf }
 0x8d9   :  { %v5089_v11 = vpop.f32.mrb[76].mxu0 }
 0x8da   :  { %2220 = vmax.xlane.f32.xlu0 %v2219_v39  ;;  %v5093_v7 = vpop.f32.mrb[77].mxu0  ;;  %v2228_v39 = vsel %vm499_vm2, %v5065_v3, -inf }
 0x8db   :  { %2238 = vmax.xlane.f32.xlu1 %v2237_v45  ;;  %v5095_v44 = vpop.f32.mrb[78].mxu0  ;;  %v2240_v45 = vsel %vm499_vm2, %v5081_v22, -inf }
 0x8dc   :  { %v5097_v17 = vpop.f32.mrb[79].mxu0 }
 0x8de   :  { %2235 = vmax.xlane.f32.xlu0 %v2234_v62  ;;  %v2252_v62 = vsel %vm499_vm2, %v5093_v7, -inf }
 0x8df   :  { %2232 = vmax.xlane.f32.xlu1 %v2231_v47  ;;  %v2243_v47 = vsel %vm499_vm2, %v5085_v23, -inf }
 0x8e2   :  { %2229 = vmax.xlane.f32.xlu0 %v2228_v39  ;;  %v2258_v39 = vsel %vm499_vm2, %v5089_v11, -inf }
 0x8e3   :  { %2247 = vmax.xlane.f32.xlu1 %v2246_v29  ;;  %v2261_v29 = vsel %vm499_vm2, %v5095_v44, -inf }
 0x8e6   :  { %2241 = vmax.xlane.f32.xlu0 %v2240_v45  ;;  %v2255_v45 = vsel %vm499_vm2, %v5097_v17, -inf }
 0x8e7   :  { %2250 = vmax.xlane.f32.xlu1 %v2249_v5  ;;  %v1171_v5 = vsel %vm499_vm2, %v4678_v6, 0.0 }
 0x8ea   :  { %2253 = vmax.xlane.f32.xlu0 %v2252_v62  ;;  %v1168_v62 = vsel %vm499_vm2, %v4675_v37, 0.0  ;;  %v1740_v37 = vsel %vm499_vm2, %v4929_v12, 0.0  ;;  %v1749_v12 = vsel %vm499_vm2, %v4890_v59, 0.0 }
 0x8eb   :  { %2244 = vmax.xlane.f32.xlu1 %v2243_v47 }
 0x8ef   :  { %2259 = vmax.xlane.f32.xlu1 %v2258_v39 }
 0x8f3   :  { %2262 = vmax.xlane.f32.xlu1 %v2261_v29 }
 0x8f7   :  { %2256 = vmax.xlane.f32.xlu1 %v2255_v45 }
 0x900   :  { %2473 = vrot.lane.b32.xlu0 %v4243_v0, %s4135_s15 }
 0x904   :  { %2475 = vrot.lane.b32.xlu0 %v4241_v63, %s4135_s15  ;;  %v1174_v63 = vsel %vm499_vm2, %v4629_v41, 0.0  ;;  %v1743_v41 = vsel %vm499_vm2, %v4932_v31, 0.0 }
 0x908   :  { %2477 = vrot.lane.b32.xlu0 %v4255_v10, %s4135_s15  ;;  %2390 = vrot.lane.b32.xlu1 %v4235_v53, %s4135_s15  ;;  %v1177_v53 = vsel %vm499_vm2, %v4631_v26, 0.0 }
 0x90c   :  { %2479 = vrot.lane.b32.xlu0 %v4253_v9, %s4135_s15 }
 0x92b   :  { %1172 = vadd.xlane.f32.xlu0 %v1171_v5 }
 0x92c   :  { %1169 = vadd.xlane.f32.xlu1 %v1168_v62 }
 0x92e   :  { %v2224_v0 = vpop.xlane.xlu0 %2223 }
 0x92f   :  { %v2266_v10 = vsub.f32 %v5043_v15, %v2224_v0  ;;  %v2218_v47 = vpop.xlane.xlu1 %2217  ;;  %1175 = vadd.xlane.f32.xlu0 %v1174_v63 }
 0x930   :  { %v2264_v9 = vsub.f32 %v5045_v50, %v2218_v47  ;;  %1178 = vadd.xlane.f32.xlu1 %v1177_v53  ;;  %v1746_v50 = vsel %vm499_vm2, %v4888_v1, 0.0  ;;  %v1186_v47 = vsel %vm499_vm2, %v4684_v42, 0.0  ;;  %v1752_v53 = vsel %vm499_vm2, %v4951_v14, 0.0 }
 0x931   :  { %v2284_v6 = vmul.f32 1.442695, %v2266_v10  ;;  %v1180_v10 = vsel %vm499_vm2, %v4698_v25, 0.0 }
 0x932   :  { %v2280_v39 = vmul.f32 1.442695, %v2264_v9  ;;  %v2385_v29 = vpop.permute.xlu0 %2384  ;;  %v1758_v9 = vsel %vm499_vm2, %v4938_v46, 0.0 }
 0x933   :  { %v2227_v45 = vpop.xlane.xlu1 %2226  ;;  %1741 = vadd.xlane.f32.xlu0 %v1740_v37  ;;  %3540 = vmatprep.subr.bf16.mxu1 %v2385_v29 }
 0x934   :  { %3865 = vpow2.f32 %v2280_v39  ;;  %v2267_v15 = vsub.f32 %v5049_v58, %v2227_v45  ;;  %1744 = vadd.xlane.f32.xlu1 %v1743_v41  ;;  %3541 = vmatpush3.bf16.msra.mxu1 %v2385_v29 }
 0x935   :  { %3867 = vpow2.f32 %v2284_v6 }
 0x936   :  { %v2286_v26 = vmul.f32 1.442695, %v2267_v15  ;;  %v2389_v62 = vpop.permute.xlu0 %2388 }
 0x937   :  { %v2387_v5 = vpop.permute.xlu1 %2386  ;;  %1747 = vadd.xlane.f32.xlu0 %v1746_v50 }
 0x938   :  { %3869 = vpow2.f32 %v2286_v26  ;;  %1750 = vadd.xlane.f32.xlu1 %v1749_v12  ;;  %3542 = vmatprep.subr.bf16.mxu1 %v2387_v5 }
 0x939   :  { %3543 = vmatpush3.bf16.msra.mxu1 %v2387_v5 }
 0x93a   :  { %3544 = vmatprep.subr.bf16.mxu1 %v2389_v62 }
 0x93d   :  { %3545 = vmatpush3.bf16.msra.mxu1 %v2389_v62 }
 0x93e   :  { %v3866_v31 = vpop.eup %3865 }
 0x93f   :  { %v2312_v58 = vsel %vm499_vm2, %v3866_v31, 0.0  ;;  %v5151_v0 = vpop.eup %3867 }
 0x940   :  { %2313 = vadd.xlane.f32.xlu0 %v2312_v58  ;;  %v2318_v59 = vsel %vm499_vm2, %v5151_v0, 0.0 }
 0x942   :  { %v5153_v63 = vpop.eup %3869 }
 0x943   :  { %v2377_v1 = vpack.c.bf16 %v5153_v63, %v5151_v0 }
 0x944   :  { %2319 = vadd.xlane.f32.xlu0 %v2318_v59 }
 0x948   :  { %1181 = vadd.xlane.f32.xlu0 %v1180_v10 }
 0x94c   :  { %1187 = vadd.xlane.f32.xlu0 %v1186_v47 }
 0x950   :  { %1753 = vadd.xlane.f32.xlu0 %v1752_v53 }
 0x954   :  { %1759 = vadd.xlane.f32.xlu0 %v1758_v9 }
 0x967   :  { %v2221_v6 = vpop.xlane.xlu0 %2220 }
 0x968   :  { %v2265_v39 = vsub.f32 %v5053_v16, %v2221_v6  ;;  %v2239_v29 = vpop.xlane.xlu1 %2238 }
 0x969   :  { %v2271_v37 = vsub.f32 %v5067_v56, %v2239_v29 }
 0x96a   :  { %v2282_v25 = vmul.f32 1.442695, %v2265_v39 }
 0x96b   :  { %v2294_v45 = vmul.f32 1.442695, %v2271_v37  ;;  %v2236_v41 = vpop.xlane.xlu0 %2235 }
 0x96c   :  { %3871 = vpow2.f32 %v2282_v25  ;;  %v2270_v42 = vsub.f32 %v5063_v48, %v2236_v41  ;;  %v2233_v15 = vpop.xlane.xlu1 %2232  ;;  %v2321_v25 = vsel %vm499_vm2, %v5153_v63, 0.0 }
 0x96d   :  { %v2269_v14 = vsub.f32 %v5069_v21, %v2233_v15  ;;  %3873 = vpow2.f32 %v2294_v45 }
 0x96e   :  { %v2292_v26 = vmul.f32 1.442695, %v2270_v42 }
 0x96f   :  { %v2290_v50 = vmul.f32 1.442695, %v2269_v14  ;;  %v2230_v46 = vpop.xlane.xlu0 %2229  ;;  %v1183_v14 = vsel %vm499_vm2, %v4700_v61, 0.0  ;;  %v1189_v61 = vsel %vm499_vm2, %v4692_v36, 0.0 }
 0x970   :  { %3875 = vpow2.f32 %v2292_v26  ;;  %v2268_v5 = vsub.f32 %v5065_v3, %v2230_v46  ;;  %v2248_v16 = vpop.xlane.xlu1 %2247 }
 0x971   :  { %v2274_v12 = vsub.f32 %v5079_v43, %v2248_v16  ;;  %3877 = vpow2.f32 %v2290_v50 }
 0x972   :  { %v2288_v56 = vmul.f32 1.442695, %v2268_v5 }
 0x973   :  { %v2242_v62 = vpop.xlane.xlu0 %2241  ;;  %v2300_v58 = vmul.f32 1.442695, %v2274_v12 }
 0x974   :  { %3879 = vpow2.f32 %v2288_v56  ;;  %v2272_v48 = vsub.f32 %v5081_v22, %v2242_v62  ;;  %v2251_v59 = vpop.xlane.xlu1 %2250 }
 0x975   :  { %v2275_v21 = vsub.f32 %v5083_v54, %v2251_v59  ;;  %3881 = vpow2.f32 %v2300_v58 }
 0x976   :  { %v3872_v10 = vpop.eup %3871  ;;  %v2296_v3 = vmul.f32 1.442695, %v2272_v48 }
 0x977   :  { %v2302_v47 = vmul.f32 1.442695, %v2275_v21  ;;  %v2254_v53 = vpop.xlane.xlu0 %2253  ;;  %v2315_v9 = vsel %vm499_vm2, %v3872_v10, 0.0  ;;  %v2376_v6 = vpack.c.bf16 %v3872_v10, %v3866_v31  ;;  %v5176_v43 = vpop.eup %3873 }
 0x978   :  { %v2245_v39 = vpop.xlane.xlu1 %2244  ;;  %2316 = vadd.xlane.f32.xlu1 %v2315_v9  ;;  %v2276_v46 = vsub.f32 %v5093_v7, %v2254_v53  ;;  %v1755_v9 = vsel %vm499_vm2, %v4953_v60, 0.0  ;;  %v1761_v60 = vsel %vm499_vm2, %v4945_v30, 0.0  ;;  %v2333_v63 = vsel %vm499_vm2, %v5176_v43, 0.0 }
 0x979   :  { %3883 = vpow2.f32 %v2302_v47  ;;  %v2273_v29 = vsub.f32 %v5085_v23, %v2245_v39  ;;  %3548 = vmatprep.mubr.msk.bf16.mxu1 %vm499_vm2, %v2376_v6  ;;  %v1192_v6 = vsel %vm499_vm2, %v4717_v19, 0.0  ;;  %v1198_v19 = vsel %vm499_vm2, %v4705_v32, 0.0 }
 0x97a   :  { %v5180_v22 = vpop.eup %3875  ;;  %3885 = vpow2.f32 %v2296_v3  ;;  %v2304_v59 = vmul.f32 1.442695, %v2276_v46  ;;  %v1764_v32 = vsel %vm499_vm2, %v4970_v2, 0.0  ;;  %v5739_v46 = vld [vmem:[#allocation16_spill] sm:$0xff] }
 0x97b   :  { %v2298_v54 = vmul.f32 1.442695, %v2273_v29  ;;  %v2474_v37 = vpop.permute.xlu0 %2473  ;;  %v2379_v31 = vpack.c.bf16 %v5176_v43, %v5180_v22  ;;  %v3878_v41 = vpop.eup %3877  ;;  %v2330_v7 = vsel %vm499_vm2, %v5180_v22, 0.0  ;;  %v1210_v43 = vsel %vm499_vm2, %v4743_v24, 0.0 }
 0x97c   :  { %v2260_v45 = vpop.xlane.xlu1 %2259  ;;  %2322 = vadd.xlane.f32.xlu1 %v2321_v25  ;;  %3556 = vmatprep.subr.bf16.mxu0 %v2474_v37  ;;  %v2327_v30 = vsel %vm499_vm2, %v3878_v41, 0.0  ;;  %v1195_v25 = vsel %vm499_vm2, %v4719_v33, 0.0  ;;  %v1767_v22 = vsel %vm499_vm2, %v4972_v8, 0.0  ;;  %v1773_v33 = vsel %vm499_vm2, %v4963_v27, 0.0 }
 0x97d   :  { %3887 = vpow2.f32 %v2298_v54  ;;  %v2278_v23 = vsub.f32 %v5089_v11, %v2260_v45  ;;  %3557 = vmatpush3.bf16.msra.mxu0 %v2474_v37  ;;  %v1201_v45 = vsel %vm499_vm2, %v4710_v34, 0.0  ;;  %v1207_v34 = vsel %vm499_vm2, %v4754_v20, 0.0  ;;  %v5735_v20 = vld [vmem:[#allocation14_spill] sm:$0xff] }
 0x97e   :  { %v3880_v42 = vpop.eup %3879  ;;  %v596_v24 = vsel %vm499_vm2, %v4422_v51, 0.0  ;;  %v1213_v8 = vsel %vm499_vm2, %v4745_v35, 0.0  ;;  %v1779_v27 = vsel %vm499_vm2, %v5009_v55, 0.0  ;;  %v1785_v51 = vsel %vm499_vm2, %v5003_v40, 0.0  ;;  %v5736_v35 = vld [vmem:[#allocation12_spill] sm:$0xff] }
 0x97f   :  { %v2476_v15 = vpop.permute.xlu0 %2475  ;;  %v2324_v26 = vsel %vm499_vm2, %v3880_v42, 0.0  ;;  %v2378_v50 = vpack.c.bf16 %v3878_v41, %v3880_v42  ;;  %v2308_v5 = vmul.f32 1.442695, %v2278_v23  ;;  %v5192_v56 = vpop.eup %3881  ;;  %v614_v41 = vsel %vm499_vm2, %v5735_v20, 0.0  ;;  %v5737_v23 = vld [vmem:[#allocation18_spill] sm:$0xff] }
 0x980   :  { %v2263_v16 = vpop.xlane.xlu1 %2262  ;;  %1184 = vadd.xlane.f32.xlu1 %v1183_v14  ;;  %2325 = vadd.xlane.f32.xlu0 %v2324_v26  ;;  %v620_v42 = vsel %vm499_vm2, %v5737_v23, 0.0  ;;  %v2342_v14 = vsel %vm499_vm2, %v5192_v56, 0.0  ;;  %v5753_v23 = vld [vmem:[#allocation22_spill] sm:$0xff] }
 0x981   :  { %v2279_v12 = vsub.f32 %v5095_v44, %v2263_v16  ;;  %3558 = vmatprep.subr.bf16.mxu0 %v2476_v15  ;;  %3889 = vpow2.f32 %v2308_v5  ;;  %v611_v5 = vsel %vm499_vm2, %v5739_v46, 0.0 }
 0x982   :  { %3559 = vmatpush3.bf16.msra.mxu0 %v2476_v15  ;;  %v5738_v15 = vld [vmem:[#allocation13_spill] sm:$0xff] }
 0x983   :  { %v5194_v11 = vpop.eup %3883  ;;  %v2310_v62 = vmul.f32 1.442695, %v2279_v12  ;;  %v2478_v58 = vpop.permute.xlu0 %2477  ;;  %v605_v40 = vsel %vm499_vm2, %v5738_v15, 0.0 }
 0x984   :  { %v2381_v48 = vpack.c.bf16 %v5194_v11, %v5192_v56  ;;  %v2257_v44 = vpop.xlane.xlu1 %2256  ;;  %1190 = vadd.xlane.f32.xlu1 %v1189_v61  ;;  %2331 = vadd.xlane.f32.xlu0 %v2330_v7  ;;  %v5203_v10 = vpop.eup %3885  ;;  %v5740_v56 = vld [vmem:[#allocation15_spill] sm:$0xff] }
 0x985   :  { %3891 = vpow2.f32 %v2310_v62  ;;  %v2277_v21 = vsub.f32 %v5097_v17, %v2257_v44  ;;  %3560 = vmatprep.subr.bf16.mxu0 %v2478_v58  ;;  %v2336_v16 = vsel %vm499_vm2, %v5203_v10, 0.0  ;;  %v617_v61 = vsel %vm499_vm2, %v5740_v56, 0.0  ;;  %v5741_v44 = vld [vmem:[#allocation44_spill] sm:$0xff] }
 0x986   :  { %3561 = vmatpush3.bf16.msra.mxu0 %v2478_v58  ;;  %3893 = vpow2.f32 %v2304_v59 }
 0x987   :  { %v5205_v47 = vpop.eup %3887  ;;  %v2306_v36 = vmul.f32 1.442695, %v2277_v21  ;;  %v2480_v53 = vpop.permute.xlu0 %2479 }
 0x988   :  { %v2391_v3 = vpop.permute.xlu1 %2390  ;;  %1756 = vadd.xlane.f32.xlu1 %v1755_v9  ;;  %1193 = vadd.xlane.f32.xlu0 %v1192_v6  ;;  %v2380_v17 = vpack.c.bf16 %v5205_v47, %v5203_v10  ;;  %v5743_v6 = vld [vmem:[#allocation19_spill] sm:$0xff] }
 0x989   :  { %3895 = vpow2.f32 %v2306_v36  ;;  %3562 = vmatprep.subr.bf16.mxu0 %v2480_v53  ;;  %3546 = vmatprep.subr.bf16.mxu1 %v2391_v3  ;;  %v5742_v36 = vld [vmem:[#allocation42_spill] sm:$0xff] }
 0x98a   :  { %3563 = vmatpush3.bf16.msra.mxu0 %v2480_v53  ;;  %3547 = vmatpush3.bf16.msra.mxu1 %v2391_v3  ;;  %v623_v3 = vsel %vm499_vm2, %v5743_v6, 0.0 }
 0x98b   :  { %3564 = vmatprep.mubr.msk.bf16.mxu0 %vm499_vm2, %v2380_v17  ;;  %v5223_v39 = vpop.eup %3889 }
 0x98c   :  { %1762 = vadd.xlane.f32.xlu1 %v1761_v60  ;;  %1199 = vadd.xlane.f32.xlu0 %v1198_v19  ;;  %v2354_v7 = vsel %vm499_vm2, %v5223_v39, 0.0 }
 0x98d   :  { %3565 = vmatmul.mubr.msk.bf16.vlgmr.msra.gmra.mrb[80].mxu0 %vm499_vm2, %v2381_v48  ;;  %3549 = vmatmul.mubr.msk.bf16.vlgmr.msra.gmra.mrb[48].mxu1 %vm499_vm2, %v2377_v1  ;;  %v1770_v1 = vsel %vm499_vm2, %v4958_v38, 0.0  ;;  %v1204_v38 = vsel %vm499_vm2, %v4751_v28, 0.0  ;;  %v1782_v28 = vsel %vm499_vm2, %v5001_v57, 0.0  ;;  %v608_v57 = vsel %vm499_vm2, %v4446_v18, 0.0 }
 0x98e   :  { %3552 = vmatprep.mubr.msk.bf16.mxu1 %vm499_vm2, %v2378_v50 }
 0x98f   :  { %v5226_v29 = vpop.eup %3891 }
 0x990   :  { %2328 = vadd.xlane.f32.xlu1 %v2327_v30  ;;  %1765 = vadd.xlane.f32.xlu0 %v1764_v32  ;;  %v2383_v54 = vpack.c.bf16 %v5226_v29, %v5223_v39  ;;  %v5233_v37 = vpop.eup %3893  ;;  %v5744_v39 = vld [vmem:[#allocation41_spill] sm:$0xff]  ;;  %v5745_v32 = vld [vmem:[#allocation43_spill] sm:$0xff] }
 0x991   :  { %v2348_v17 = vsel %vm499_vm2, %v5233_v37, 0.0 }
 0x993   :  { %v5235_v0 = vpop.eup %3895 }
 0x994   :  { %2334 = vadd.xlane.f32.xlu1 %v2333_v63  ;;  %1771 = vadd.xlane.f32.xlu0 %v1770_v1  ;;  %v2382_v2 = vpack.c.bf16 %v5235_v0, %v5233_v37  ;;  %v2345_v1 = vsel %vm499_vm2, %v5194_v11, 0.0 }
 0x995   :  { %3553 = vmatmul.mubr.msk.bf16.gmra.mrb[52].mxu1 %vm499_vm2, %v2379_v31  ;;  %v1776_v31 = vsel %vm499_vm2, %v5007_v13, 0.0  ;;  %v602_v13 = vsel %vm499_vm2, %v4420_v49, 0.0  ;;  %v599_v49 = vsel %vm499_vm2, %v5736_v35, 0.0  ;;  %v5752_v35 = vld [vmem:[#allocation24_spill] sm:$0xff] }
 0x996   :  { %3568 = vmatprep.mubr.msk.bf16.mxu0 %vm499_vm2, %v2382_v2  ;;  %v5746_v2 = vld [vmem:[#allocation17_spill] sm:$0xff] }
 0x997   :  { %3569 = vmatmul.mubr.msk.bf16.gmra.mrb[84].mxu0 %vm499_vm2, %v2383_v54 }
 0x998   :  { %1196 = vadd.xlane.f32.xlu1 %v1195_v25  ;;  %1205 = vadd.xlane.f32.xlu0 %v1204_v38  ;;  %v626_v25 = vsel %vm499_vm2, %v5746_v2, 0.0  ;;  %v5758_v2 = vld [vmem:[#allocation60_spill] sm:$0xff] }
 0x99c   :  { %1202 = vadd.xlane.f32.xlu1 %v1201_v45  ;;  %1211 = vadd.xlane.f32.xlu0 %v1210_v43 }
 0x9a0   :  { %1768 = vadd.xlane.f32.xlu1 %v1767_v22  ;;  %1777 = vadd.xlane.f32.xlu0 %v1776_v31  ;;  %v2339_v31 = vsel %vm499_vm2, %v5205_v47, 0.0  ;;  %v2357_v47 = vsel %vm499_vm2, %v5226_v29, 0.0 }
 0x9a4   :  { %1774 = vadd.xlane.f32.xlu1 %v1773_v33  ;;  %1783 = vadd.xlane.f32.xlu0 %v1782_v28  ;;  %v5747_v33 = vld [vmem:[#allocation23_spill] sm:$0xff] }
 0x9a5   :  { %v632_v28 = vsel %vm499_vm2, %v5747_v33, 0.0 }
 0x9a8   :  { %1208 = vadd.xlane.f32.xlu1 %v1207_v34  ;;  %597 = vadd.xlane.f32.xlu0 %v596_v24  ;;  %v5748_v24 = vld [vmem:[#allocation57_spill] sm:$0xff] }
 0x9ac   :  { %1214 = vadd.xlane.f32.xlu1 %v1213_v8  ;;  %603 = vadd.xlane.f32.xlu0 %v602_v13  ;;  %v5749_v13 = vld [vmem:[#allocation58_spill] sm:$0xff] }
 0x9b0   :  { %1780 = vadd.xlane.f32.xlu1 %v1779_v27  ;;  %609 = vadd.xlane.f32.xlu0 %v608_v57  ;;  %v5750_v57 = vld [vmem:[#allocation20_spill] sm:$0xff] }
 0x9b4   :  { %1786 = vadd.xlane.f32.xlu1 %v1785_v51  ;;  %615 = vadd.xlane.f32.xlu0 %v614_v41  ;;  %v5751_v51 = vld [vmem:[#allocation21_spill] sm:$0xff]  ;;  %v2351_v41 = vsel %vm499_vm2, %v5235_v0, 0.0 }
 0x9b8   :  { %600 = vadd.xlane.f32.xlu1 %v599_v49  ;;  %621 = vadd.xlane.f32.xlu0 %v620_v42  ;;  %v1173_v55 = vpop.xlane.xlu0 %1172  ;;  %v635_v49 = vsel %vm499_vm2, %v5752_v35, 0.0  ;;  %v641_v42 = vsel %vm499_vm2, %v5753_v23, 0.0 }
 0x9b9   :  { %3897 = vrcp.f32 %v1173_v55  ;;  %v1170_v18 = vpop.xlane.xlu1 %1169 }
 0x9ba   :  { %3899 = vrcp.f32 %v1170_v18 }
 0x9bc   :  { %606 = vadd.xlane.f32.xlu1 %v605_v40  ;;  %2343 = vadd.xlane.f32.xlu0 %v2342_v14  ;;  %v1176_v26 = vpop.xlane.xlu0 %1175 }
 0x9bd   :  { %3901 = vrcp.f32 %v1176_v26  ;;  %v1179_v50 = vpop.xlane.xlu1 %1178 }
 0x9be   :  { %3903 = vrcp.f32 %v1179_v50 }
 0x9c0   :  { %612 = vadd.xlane.f32.xlu1 %v611_v5  ;;  %2337 = vadd.xlane.f32.xlu0 %v2336_v16  ;;  %v1742_v12 = vpop.xlane.xlu0 %1741  ;;  %v3767_v5 = vld [vmem:[#allocation7] sm:$0xff]  }
 0x9c1   :  { %3905 = vrcp.f32 %v1742_v12  ;;  %v1745_v62 = vpop.xlane.xlu1 %1744  ;;  %3572 = vmatprep.subr.bf16.mxu1 %v3767_v5 }
 0x9c2   :  { %3907 = vrcp.f32 %v1745_v62  ;;  %3573 = vmatpush3.bf16.msra.mxu1 %v3767_v5 }
 0x9c3   :  { %v3898_v58 = vpop.eup %3897 }
 0x9c4   :  { %v3900_v48 = vpop.eup %3899  ;;  %618 = vadd.xlane.f32.xlu1 %v617_v61  ;;  %2355 = vadd.xlane.f32.xlu0 %v2354_v7  ;;  %v1748_v59 = vpop.xlane.xlu0 %1747  ;;  %v1419_v21 = vmul.f32 %v3898_v58, %v5741_v44 }
 0x9c5   :  { %3909 = vrcp.f32 %v1748_v59  ;;  %v1751_v10 = vpop.xlane.xlu1 %1750  ;;  %v1418_v53 = vmul.f32 %v3900_v48, %v5742_v36  ;;  %v5754_v59 = vld [vmem:[#allocation46_spill] sm:$0xff] }
 0x9c6   :  { %3911 = vrcp.f32 %v1751_v10 }
 0x9c7   :  { %v3902_v9 = vpop.eup %3901  ;;  %v3645_v60 = vpack.i.bf16 %v1419_v21, %v1418_v53  ;;  %v5755_v21 = vld [vmem:[#allocation48_spill] sm:$0xff] }
 0x9c8   :  { %v3904_v19 = vpop.eup %3903  ;;  %624 = vadd.xlane.f32.xlu1 %v623_v3  ;;  %2349 = vadd.xlane.f32.xlu0 %v2348_v17  ;;  %v1420_v30 = vmul.f32 %v3902_v9, %v5744_v39  ;;  %v5756_v17 = vld [vmem:[#allocation45_spill] sm:$0xff] }
 0x9c9   :  { %v1421_v54 = vmul.f32 %v3904_v19, %v5745_v32  ;;  %v5757_v19 = vld [vmem:[#allocation47_spill] sm:$0xff] }
 0x9cb   :  { %v3906_v63 = vpop.eup %3905  ;;  %v3650_v38 = vpack.i.bf16 %v1421_v54, %v1420_v30 }
 0x9cc   :  { %v3908_v45 = vpop.eup %3907  ;;  %2346 = vadd.xlane.f32.xlu1 %v2345_v1  ;;  %627 = vadd.xlane.f32.xlu0 %v626_v25  ;;  %v1990_v37 = vmul.f32 %v3906_v63, %v5021_v52  ;;  %v629_v52 = vsel %vm499_vm2, %v5750_v57, 0.0 }
 0x9cd   :  { %v1991_v43 = vmul.f32 %v3908_v45, %v5025_v4  ;;  %v638_v4 = vsel %vm499_vm2, %v5751_v51, 0.0  ;;  %v5330_v55 = vpop.xlane.xlu0 %2313 }
 0x9cf   :  { %v3910_v22 = vpop.eup %3909  ;;  %v3655_v34 = vpack.i.bf16 %v1991_v43, %v1990_v37 }
 0x9d0   :  { %v3912_v11 = vpop.eup %3911  ;;  %2340 = vadd.xlane.f32.xlu1 %v2339_v31  ;;  %633 = vadd.xlane.f32.xlu0 %v632_v28  ;;  %v1992_v8 = vmul.f32 %v3910_v22, %v5748_v24  ;;  %v5760_v28 = vld [vmem:[#allocation59_spill] sm:$0xff] }
 0x9d1   :  { %v1993_v27 = vmul.f32 %v3912_v11, %v5749_v13  ;;  %v5333_v29 = vpop.xlane.xlu0 %2319  ;;  %v5761_v11 = vld [vmem:[#allocation61_spill] sm:$0xff] }
 0x9d3   :  { %v3660_v20 = vpack.i.bf16 %v1993_v27, %v1992_v8 }
 0x9d4   :  { %630 = vadd.xlane.f32.xlu1 %v629_v52  ;;  %639 = vadd.xlane.f32.xlu0 %v638_v4 }
 0x9d5   :  { %v1182_v0 = vpop.xlane.xlu0 %1181 }
 0x9d6   :  { %3913 = vrcp.f32 %v1182_v0 }
 0x9d8   :  { %2358 = vadd.xlane.f32.xlu1 %v2357_v47 }
 0x9d9   :  { %v1188_v18 = vpop.xlane.xlu0 %1187 }
 0x9dc   :  { %2352 = vadd.xlane.f32.xlu1 %v2351_v41  ;;  %v5762_v41 = vld [vmem:[#allocation50_spill] sm:$0xff] }
 0x9dd   :  { %v1754_v15 = vpop.xlane.xlu0 %1753 }
 0x9e0   :  { %636 = vadd.xlane.f32.xlu1 %v635_v49  ;;  %v3914_v56 = vpop.eup %3913  ;;  %v5763_v49 = vld [vmem:[#allocation52_spill] sm:$0xff] }
 0x9e1   :  { %v1760_v14 = vpop.xlane.xlu0 %1759  ;;  %v5346_v44 = vmul.f32 %v3914_v56, %v5754_v59  ;;  %v5766_v59 = vld [vmem:[#allocation64_spill] sm:$0xff] }
 0x9e4   :  { %642 = vadd.xlane.f32.xlu1 %v641_v42 }
 0x9ea   :  { %3646 = vrot.lane.b32.xlu0 %v3645_v60, %s4124_s17 }
 0x9ee   :  { %3661 = vrot.lane.b32.xlu0 %v3660_v20, %s4136_s16 }
 0x9f5   :  { %3651 = vrot.lane.b32.xlu1 %v3650_v38, %s4124_s17  ;;  %v5759_v38 = vld [vmem:[#allocation62_spill] sm:$0xff] }
 0x9f9   :  { %3656 = vrot.lane.b32.xlu1 %v3655_v34, %s4136_s16 }
 0xa05   :  { %v5337_v40 = vpop.xlane.xlu1 %2316 }
 0xa09   :  { %v5339_v26 = vpop.xlane.xlu1 %2322 }
 0xa0d   :  { %v1185_v50 = vpop.xlane.xlu1 %1184  ;;  %v5341_v46 = vpop.xlane.xlu0 %2325 }
 0xa0e   :  { %3915 = vrcp.f32 %v1185_v50  ;;  %v5764_v50 = vld [vmem:[#allocation49_spill] sm:$0xff] }
 0xa0f   :  { %3917 = vrcp.f32 %v1188_v18 }
 0xa11   :  { %v1191_v16 = vpop.xlane.xlu1 %1190  ;;  %v5343_v12 = vpop.xlane.xlu0 %2331 }
 0xa12   :  { %3919 = vrcp.f32 %v1191_v16  ;;  %v5765_v16 = vld [vmem:[#allocation51_spill] sm:$0xff] }
 0xa13   :  { %3921 = vrcp.f32 %v1754_v15 }
 0xa15   :  { %v1757_v62 = vpop.xlane.xlu1 %1756  ;;  %v1194_v58 = vpop.xlane.xlu0 %1193 }
 0xa16   :  { %3923 = vrcp.f32 %v1757_v62 }
 0xa17   :  { %3925 = vrcp.f32 %v1760_v14 }
 0xa18   :  { %v3916_v61 = vpop.eup %3915 }
 0xa19   :  { %v1763_v7 = vpop.xlane.xlu1 %1762  ;;  %v1200_v48 = vpop.xlane.xlu0 %1199  ;;  %v5349_v10 = vmul.f32 %v3916_v61, %v5755_v21 }
 0xa1a   :  { %v3918_v36 = vpop.eup %3917  ;;  %3927 = vrcp.f32 %v1763_v7 }
 0xa1b   :  { %v3675_v53 = vpack.i.bf16 %v5349_v10, %v5346_v44  ;;  %v5356_v60 = vmul.f32 %v3918_v36, %v5756_v17  ;;  %3929 = vrcp.f32 %v1194_v58  ;;  %v5767_v36 = vld [vmem:[#allocation66_spill] sm:$0xff] }
 0xa1c   :  { %v3920_v9 = vpop.eup %3919 }
 0xa1d   :  { %v5353_v6 = vpop.xlane.xlu1 %2328  ;;  %v1766_v3 = vpop.xlane.xlu0 %1765  ;;  %v5359_v39 = vmul.f32 %v3920_v9, %v5757_v19 }
 0xa1e   :  { %v3922_v30 = vpop.eup %3921 }
 0xa1f   :  { %v3680_v32 = vpack.i.bf16 %v5359_v39, %v5356_v60  ;;  %v5366_v25 = vmul.f32 %v3922_v30, %v5758_v2 }
 0xa20   :  { %v3924_v54 = vpop.eup %3923 }
 0xa21   :  { %v5363_v63 = vpop.xlane.xlu1 %2334  ;;  %v1772_v1 = vpop.xlane.xlu0 %1771  ;;  %v5369_v45 = vmul.f32 %v3924_v54, %v5759_v38  ;;  %v5769_v38 = vld [vmem:[#allocation65_spill] sm:$0xff] }
 0xa22   :  { %v3926_v37 = vpop.eup %3925 }
 0xa23   :  { %v5374_v34 = vmul.f32 %v3926_v37, %v5760_v28 }
 0xa24   :  { %v3928_v22 = vpop.eup %3927 }
 0xa25   :  { %v1197_v31 = vpop.xlane.xlu1 %1196  ;;  %v1206_v33 = vpop.xlane.xlu0 %1205  ;;  %v5377_v24 = vmul.f32 %v3928_v22, %v5761_v11 }
 0xa26   :  { %3931 = vrcp.f32 %v1197_v31  ;;  %v3930_v51 = vpop.eup %3929 }
 0xa27   :  { %3933 = vrcp.f32 %v1200_v48  ;;  %v5382_v35 = vmul.f32 %v3930_v51, %v5762_v41  ;;  %v5789_v60 = vpack.i.bf16 %v5377_v24, %v5374_v34 }
 0xa29   :  { %v1203_v13 = vpop.xlane.xlu1 %1202  ;;  %v1212_v27 = vpop.xlane.xlu0 %1211 }
 0xa2a   :  { %3935 = vrcp.f32 %v1203_v13 }
 0xa2b   :  { %3937 = vrcp.f32 %v1766_v3 }
 0xa2d   :  { %v1769_v57 = vpop.xlane.xlu1 %1768  ;;  %v1778_v52 = vpop.xlane.xlu0 %1777 }
 0xa2e   :  { %3939 = vrcp.f32 %v1769_v57 }
 0xa2f   :  { %3941 = vrcp.f32 %v1772_v1  ;;  %v5768_v1 = vld [vmem:[#allocation63_spill] sm:$0xff] }
 0xa30   :  { %v3932_v4 = vpop.eup %3931 }
 0xa31   :  { %v1775_v20 = vpop.xlane.xlu1 %1774  ;;  %v1784_v47 = vpop.xlane.xlu0 %1783  ;;  %v5385_v23 = vmul.f32 %v3932_v4, %v5763_v49 }
 0xa32   :  { %v3934_v42 = vpop.eup %3933  ;;  %3943 = vrcp.f32 %v1775_v20  ;;  %v5772_v20 = vld [vmem:[#allocation26_spill] sm:$0xff] }
 0xa33   :  { %3945 = vrcp.f32 %v1206_v33  ;;  %v5390_v5 = vmul.f32 %v3934_v42, %v5764_v50 }
 0xa34   :  { %v3936_v18 = vpop.eup %3935 }
 0xa35   :  { %v1209_v15 = vpop.xlane.xlu1 %1208  ;;  %v598_v14 = vpop.xlane.xlu0 %597  ;;  %v5393_v62 = vmul.f32 %v3936_v18, %v5765_v16  ;;  %v5774_v16 = vld [vmem:[#allocation55_spill] sm:$0xff] }
 0xa36   :  { %v3938_v58 = vpop.eup %3937  ;;  %3947 = vrcp.f32 %v1209_v15 }
 0xa37   :  { %3949 = vrcp.f32 %v598_v14  ;;  %v5398_v21 = vmul.f32 %v3938_v58, %v5766_v59  ;;  %v5773_v14 = vld [vmem:[#allocation53_spill] sm:$0xff]  ;;  %v5791_v34 = vpack.i.bf16 %v5393_v62, %v5390_v5 }
 0xa38   :  { %v3940_v61 = vpop.eup %3939  ;;  %3951 = vrcp.f32 %v1212_v27  ;;  %v5770_v27 = vld [vmem:[#allocation54_spill] sm:$0xff] }
 0xa39   :  { %v1215_v7 = vpop.xlane.xlu1 %1214  ;;  %v604_v48 = vpop.xlane.xlu0 %603  ;;  %v5401_v9 = vmul.f32 %v3940_v61, %v5767_v36 }
 0xa3a   :  { %v3942_v3 = vpop.eup %3941  ;;  %3953 = vrcp.f32 %v1215_v7  ;;  %v5775_v7 = vld [vmem:[#allocation25_spill] sm:$0xff] }
 0xa3b   :  { %3955 = vrcp.f32 %v604_v48  ;;  %v5406_v2 = vmul.f32 %v3942_v3, %v5768_v1  ;;  %v5777_v1 = vld [vmem:[#allocation70_spill] sm:$0xff]  ;;  %v5794_v24 = vpack.i.bf16 %v5401_v9, %v5398_v21 }
 0xa3c   :  { %v3944_v19 = vpop.eup %3943  ;;  %3957 = vrcp.f32 %v1778_v52  ;;  %v5771_v52 = vld [vmem:[#allocation56_spill] sm:$0xff] }
 0xa3d   :  { %v1781_v30 = vpop.xlane.xlu1 %1780  ;;  %v610_v54 = vpop.xlane.xlu0 %609  ;;  %v5409_v37 = vmul.f32 %v3944_v19, %v5769_v38 }
 0xa3e   :  { %v3946_v22 = vpop.eup %3945  ;;  %3959 = vrcp.f32 %v1781_v30  ;;  %v5776_v30 = vld [vmem:[#allocation68_spill] sm:$0xff] }
 0xa3f   :  { %3961 = vrcp.f32 %v610_v54  ;;  %v5414_v57 = vmul.f32 %v3946_v22, %v5770_v27 }
 0xa40   :  { %v3948_v33 = vpop.eup %3947  ;;  %3963 = vrcp.f32 %v1784_v47 }
 0xa41   :  { %v3950_v28 = vpop.eup %3949  ;;  %v1787_v11 = vpop.xlane.xlu1 %1786  ;;  %v5417_v51 = vmul.f32 %v3948_v33, %v5771_v52  ;;  %v5778_v33 = vld [vmem:[#allocation30_spill] sm:$0xff] }
 0xa42   :  { %v616_v13 = vpop.xlane.xlu0 %615  ;;  %v3952_v4 = vpop.eup %3951  ;;  %3965 = vrcp.f32 %v1787_v11  ;;  %v5420_v41 = vmul.f32 %v3950_v28, %v5772_v20 }
 0xa43   :  { %3967 = vrcp.f32 %v616_v13  ;;  %v5425_v50 = vmul.f32 %v3952_v4, %v5773_v14  ;;  %v5779_v4 = vld [vmem:[#allocation67_spill] sm:$0xff] }
 0xa44   :  { %v3954_v42 = vpop.eup %3953 }
 0xa45   :  { %v3956_v47 = vpop.eup %3955  ;;  %v601_v18 = vpop.xlane.xlu1 %600  ;;  %v5428_v58 = vmul.f32 %v3954_v42, %v5774_v16  ;;  %v5780_v42 = vld [vmem:[#allocation69_spill] sm:$0xff] }
 0xa46   :  { %v622_v15 = vpop.xlane.xlu0 %621  ;;  %v3958_v61 = vpop.eup %3957  ;;  %3969 = vrcp.f32 %v601_v18  ;;  %v5431_v48 = vmul.f32 %v3956_v47, %v5775_v7  ;;  %v5781_v18 = vld [vmem:[#allocation29_spill] sm:$0xff] }
 0xa47   :  { %3971 = vrcp.f32 %v622_v15  ;;  %v5436_v54 = vmul.f32 %v3958_v61, %v5776_v30  ;;  %v5795_v5 = vpack.i.bf16 %v5428_v58, %v5425_v50 }
 0xa48   :  { %v3960_v36 = vpop.eup %3959 }
 0xa49   :  { %v3962_v3 = vpop.eup %3961  ;;  %v607_v19 = vpop.xlane.xlu1 %606  ;;  %v5439_v38 = vmul.f32 %v3960_v36, %v5777_v1  ;;  %v5782_v36 = vld [vmem:[#allocation28_spill] sm:$0xff] }
 0xa4a   :  { %v3964_v22 = vpop.eup %3963  ;;  %3973 = vrcp.f32 %v607_v19  ;;  %v5442_v28 = vmul.f32 %v3962_v3, %v5778_v33  ;;  %v5783_v19 = vld [vmem:[#allocation34_spill] sm:$0xff]  ;;  %v2344_v1 = vpop.xlane.xlu0 %2343 }
 0xa4b   :  { %v5447_v20 = vmul.f32 %v3964_v22, %v5779_v4  ;;  %v5798_v62 = vpack.i.bf16 %v5439_v38, %v5436_v54 }
 0xa4c   :  { %v3966_v13 = vpop.eup %3965 }
 0xa4d   :  { %v3968_v27 = vpop.eup %3967  ;;  %v613_v52 = vpop.xlane.xlu1 %612  ;;  %v5450_v47 = vmul.f32 %v3966_v13, %v5780_v42  ;;  %v5784_v13 = vld [vmem:[#allocation27_spill] sm:$0xff] }
 0xa4e   :  { %3975 = vrcp.f32 %v613_v52  ;;  %v5453_v15 = vmul.f32 %v3968_v27, %v5781_v18  ;;  %v2338_v4 = vpop.xlane.xlu0 %2337  ;;  %v5785_v18 = vld [vmem:[#allocation32_spill] sm:$0xff] }
 0xa50   :  { %v3970_v16 = vpop.eup %3969 }
 0xa51   :  { %v3972_v61 = vpop.eup %3971  ;;  %v619_v7 = vpop.xlane.xlu1 %618  ;;  %v5458_v3 = vmul.f32 %v3970_v16, %v5782_v36 }
 0xa52   :  { %3977 = vrcp.f32 %v619_v7  ;;  %v5461_v30 = vmul.f32 %v3972_v61, %v5783_v19  ;;  %v3768_v61 = vld [vmem:[#allocation7 + $0x8] sm:$0xff]  }
 0xa53   :  { %3979 = vrcp.f32 %v5330_v55  ;;  %v5786_v7 = vld [vmem:[#allocation31_spill] sm:$0xff]  ;;  %3574 = vmatprep.subr.bf16.mxu1 %v3768_v61 }
 0xa54   :  { %v3974_v22 = vpop.eup %3973  ;;  %3981 = vrcp.f32 %v5333_v29  ;;  %3575 = vmatpush3.bf16.msra.mxu1 %v3768_v61 }
 0xa55   :  { %v625_v33 = vpop.xlane.xlu1 %624  ;;  %v5466_v27 = vmul.f32 %v3974_v22, %v5784_v13 }
 0xa56   :  { %3983 = vrcp.f32 %v625_v33 }
 0xa57   :  { %3985 = vrcp.f32 %v5337_v40 }
 0xa58   :  { %v3976_v52 = vpop.eup %3975  ;;  %3987 = vrcp.f32 %v5339_v26  ;;  %v2356_v26 = vpop.xlane.xlu0 %2355 }
 0xa59   :  { %3989 = vrcp.f32 %v2344_v1  ;;  %v2347_v42 = vpop.xlane.xlu1 %2346  ;;  %v5471_v16 = vmul.f32 %v3976_v52, %v5785_v18 }
 0xa5a   :  { %3991 = vrcp.f32 %v2347_v42  ;;  %v5787_v42 = vld [vmem:[#allocation36_spill] sm:$0xff] }
 0xa5b   :  { %3993 = vrcp.f32 %v2338_v4 }
 0xa5c   :  { %v3978_v55 = vpop.eup %3977 }
 0xa5d   :  { %v2341_v29 = vpop.xlane.xlu1 %2340  ;;  %v5474_v36 = vmul.f32 %v3978_v55, %v5786_v7  ;;  %v3980_v19 = vpop.eup %3979 }
 0xa5e   :  { %3995 = vrcp.f32 %v2341_v29  ;;  %v3982_v40 = vpop.eup %3981 }
 0xa5f   :  { %3997 = vrcp.f32 %v5343_v12 }
 0xa60   :  { %v3984_v1 = vpop.eup %3983  ;;  %3999 = vrcp.f32 %v5363_v63  ;;  %v3566_v22 = vpop.f32.mrb[80].mxu0 }
 0xa61   :  { %v3550_v33 = vpop.f32.mrb[48].mxu1  ;;  %v3986_v13 = vpop.eup %3985  ;;  %4001 = vrcp.f32 %v5341_v46  ;;  %v5480_v18 = vmul.f32 %v3984_v1, %v5787_v42 }
 0xa62   :  { %v2531_v52 = vpop.f32.mrb[81].mxu0  ;;  %v2442_v4 = vpop.f32.mrb[49].mxu1  ;;  %4003 = vrcp.f32 %v5353_v6  ;;  %v2564_v14 = vmul.f32 %v3982_v40, %v3550_v33 }
 0xa63   :  { %v3988_v55 = vpop.eup %3987  ;;  %v631_v12 = vpop.xlane.xlu1 %630  ;;  %v2562_v46 = vmul.f32 %v3980_v19, %v2442_v4 }
 0xa64   :  { %v3567_v29 = vpop.f32.mrb[82].mxu0  ;;  %v3990_v7 = vpop.eup %3989  ;;  %4005 = vrcp.f32 %v631_v12 }
 0xa65   :  { %v3551_v11 = vpop.f32.mrb[50].mxu1  ;;  %v3992_v63 = vpop.eup %3991  ;;  %v5483_v17 = vmul.f32 %v3990_v7, %v3566_v22  ;;  %4007 = vrcp.f32 %v2356_v26 }
 0xa66   :  { %v2565_v49 = vmul.f32 %v3988_v55, %v3551_v11  ;;  %v2534_v61 = vpop.f32.mrb[83].mxu0  ;;  %v2445_v59 = vpop.f32.mrb[51].mxu1  ;;  %v2573_v31 = vmul.f32 %v3992_v63, %v3567_v29 }
 0xa67   :  { %v2563_v0 = vmul.f32 %v3986_v13, %v2445_v59  ;;  %v2359_v42 = vpop.xlane.xlu1 %2358  ;;  %v3994_v56 = vpop.eup %3993 }
 0xa68   :  { %v3670_v1 = vpack.i.bf16 %v2565_v49, %v2564_v14  ;;  %v2350_v6 = vpop.xlane.xlu0 %2349  ;;  %v3735_v43 = vpack.i.bf16 %v2573_v31, %v5483_v17  ;;  %4009 = vrcp.f32 %v2359_v42  ;;  %v3996_v12 = vpop.eup %3995  ;;  %v2570_v22 = vmul.f32 %v3994_v56, %v2531_v52 }
 0xa69   :  { %v3665_v8 = vpack.i.bf16 %v2563_v0, %v2562_v46  ;;  %v3554_v11 = vpop.f32.mrb[52].mxu1  ;;  %v3998_v40 = vpop.eup %3997  ;;  %v2571_v33 = vmul.f32 %v3996_v12, %v2534_v61  ;;  %4011 = vrcp.f32 %v2350_v6  ;;  %v5788_v46 = vld [vmem:[#allocation35_spill] sm:$0xff] }
 0xa6a   :  { %3671 = vrot.lane.b32.xlu0 %v3670_v1, %s4137_s18  ;;  %v2458_v59 = vpop.f32.mrb[53].mxu1  ;;  %v4000_v19 = vpop.eup %3999  ;;  %v2568_v17 = vmul.f32 %v3998_v40, %v3554_v11 }
 0xa6b   :  { %3666 = vrot.lane.b32.xlu1 %v3665_v8, %s4137_s18  ;;  %v2353_v49 = vpop.xlane.xlu1 %2352  ;;  %v3555_v14 = vpop.f32.mrb[54].mxu1  ;;  %v3740_v13 = vpack.i.bf16 %v2571_v33, %v2570_v22 }
 0xa6c   :  { %v4002_v26 = vpop.eup %4001  ;;  %4013 = vrcp.f32 %v2353_v49  ;;  %v2569_v0 = vmul.f32 %v4000_v19, %v3555_v14  ;;  %v3570_v31 = vpop.f32.mrb[84].mxu0 }
 0xa6d   :  { %v4004_v4 = vpop.eup %4003  ;;  %v2461_v55 = vpop.f32.mrb[55].mxu1  ;;  %v2566_v56 = vmul.f32 %v4002_v26, %v2458_v59 }
 0xa6e   :  { %v2547_v29 = vpop.f32.mrb[85].mxu0  ;;  %3681 = vrot.lane.b32.xlu0 %v3680_v32, %s4124_s17  ;;  %v4006_v8 = vpop.eup %4005  ;;  %v3700_v52 = vpack.i.bf16 %v2569_v0, %v2568_v17  ;;  %v2567_v7 = vmul.f32 %v4004_v4, %v2461_v55  ;;  %v5790_v32 = vpack.i.bf16 %v5369_v45, %v5366_v25  ;;  %v5792_v25 = vpack.i.bf16 %v5385_v23, %v5382_v35 }
 0xa6f   :  { %v3571_v63 = vpop.f32.mrb[86].mxu0  ;;  %3676 = vrot.lane.b32.xlu1 %v3675_v53, %s4124_s17  ;;  %v5497_v1 = vmul.f32 %v4006_v8, %v5788_v46  ;;  %v4008_v6 = vpop.eup %4007  ;;  %v5793_v45 = vpack.i.bf16 %v5409_v37, %v5406_v2  ;;  %v5796_v35 = vpack.i.bf16 %v5417_v51, %v5414_v57  ;;  %v5797_v23 = vpack.i.bf16 %v5450_v47, %v5447_v20 }
 0xa70   :  { %v2550_v61 = vpop.f32.mrb[87].mxu0  ;;  %v3695_v42 = vpack.i.bf16 %v2567_v7, %v2566_v56  ;;  %v2576_v12 = vmul.f32 %v4008_v6, %v3570_v31  ;;  %v628_v21 = vpop.xlane.xlu0 %627 }
 0xa71   :  { %4015 = vrcp.f32 %v628_v21 }
 0xa72   :  { %3691 = vrot.lane.b32.xlu0 %v5789_v60, %s4136_s16  ;;  %v4010_v39 = vpop.eup %4009 }
 0xa73   :  { %3686 = vrot.lane.b32.xlu1 %v5790_v32, %s4136_s16  ;;  %v2577_v44 = vmul.f32 %v4010_v39, %v3571_v63  ;;  %v4012_v10 = vpop.eup %4011 }
 0xa74   :  { %v2574_v40 = vmul.f32 %v4012_v10, %v2547_v29  ;;  %v5545_v9 = vpop.xlane.xlu0 %633 }
 0xa75   :  { %v3760_v53 = vpack.i.bf16 %v2577_v44, %v2576_v12  ;;  %4017 = vrcp.f32 %v5545_v9 }
 0xa76   :  { %3701 = vrot.lane.b32.xlu0 %v3700_v52, %s4137_s18  ;;  %v4014_v11 = vpop.eup %4013 }
 0xa77   :  { %3696 = vrot.lane.b32.xlu1 %v3695_v42, %s4137_s18  ;;  %v2575_v22 = vmul.f32 %v4014_v11, %v2550_v61 }
 0xa78   :  { %v5549_v2 = vpop.xlane.xlu0 %639 }
 0xa79   :  { %v3755_v33 = vpack.i.bf16 %v2575_v22, %v2574_v40  ;;  %4019 = vrcp.f32 %v5549_v2 }
 0xa7a   :  { %3711 = vrot.lane.b32.xlu0 %v5791_v34, %s4124_s17 }
 0xa7b   :  { %3706 = vrot.lane.b32.xlu1 %v5792_v25, %s4124_s17 }
 0xa7c   :  { %v3647_v57 = vpop.permute.xlu0 %3646 }
 0xa7d   :  { %v3649_v38 = vunpack.i.h.bf16 %v3647_v57  ;;  %v3648_v47 = vunpack.i.l.bf16 %v3647_v57 }
 0xa7e   :  { %3721 = vrot.lane.b32.xlu0 %v5793_v45, %s4136_s16 }
 0xa7f   :  { %3716 = vrot.lane.b32.xlu1 %v5794_v24, %s4136_s16  ;;  %v2771_v0 = vsel %vm308_vm1, %v5458_v3, %v3649_v38  ;;  %v2770_v31 = vsel %vm308_vm1, %v5420_v41, %v3648_v47 }
 0xa80   :  { %v3662_v20 = vpop.permute.xlu0 %3661 }
 0xa81   :  { %v3664_v26 = vunpack.i.h.bf16 %v3662_v20 }
 0xa82   :  { %3731 = vrot.lane.b32.xlu0 %v5795_v5, %s4124_s17 }
 0xa83   :  { %3726 = vrot.lane.b32.xlu1 %v5796_v35, %s4124_s17 }
 0xa86   :  { %3736 = vrot.lane.b32.xlu0 %v3735_v43, %s4137_s18  ;;  %v5547_v43 = vpop.xlane.xlu1 %636 }
 0xa87   :  { %3741 = vrot.lane.b32.xlu1 %v3740_v13, %s4137_s18  ;;  %v3663_v13 = vunpack.i.l.bf16 %v3662_v20 }
 0xa8a   :  { %3751 = vrot.lane.b32.xlu0 %v5797_v23, %s4136_s16  ;;  %v5551_v37 = vpop.xlane.xlu1 %642 }
 0xa8b   :  { %3746 = vrot.lane.b32.xlu1 %v5798_v62, %s4136_s16  ;;  %4021 = vrcp.f32 %v5551_v37 }
 0xa8c   :  { %4023 = vrcp.f32 %v5547_v43 }
 0xa8e   :  { %3761 = vrot.lane.b32.xlu0 %v3760_v53, %s4137_s18  ;;  %v3652_v51 = vpop.permute.xlu1 %3651 }
 0xa8f   :  { %3756 = vrot.lane.b32.xlu1 %v3755_v33, %s4137_s18  ;;  %v3654_v50 = vunpack.i.h.bf16 %v3652_v51  ;;  %v3653_v58 = vunpack.i.l.bf16 %v3652_v51 }
 0xa91   :  { %v2773_v59 = vsel %vm308_vm1, %v5466_v27, %v3654_v50  ;;  %v2772_v19 = vsel %vm308_vm1, %v5431_v48, %v3653_v58 }
 0xa92   :  { %v3657_v54 = vpop.permute.xlu1 %3656  ;;  %v2789_v27 = vsel %vm2786_vm3, %v2772_v19, %v3663_v13  ;;  %v2790_v8 = vsel %vm2786_vm3, %v2773_v59, %v3664_v26 }
 0xa93   :  { %v3659_v49 = vunpack.i.h.bf16 %v3657_v54  ;;  %v3658_v14 = vunpack.i.l.bf16 %v3657_v54 }
 0xa95   :  { %v2787_v52 = vsel %vm2786_vm3, %v2770_v31, %v3658_v14  ;;  %v2788_v7 = vsel %vm2786_vm3, %v2771_v0, %v3659_v49  ;;  %v4016_v14 = vpop.eup %4015 }
 0xadc   :  { %v3672_v17 = vpop.permute.xlu0 %3671 }
 0xadd   :  { %v3674_v4 = vunpack.i.h.bf16 %v3672_v17  ;;  %v3673_v55 = vunpack.i.l.bf16 %v3672_v17  ;;  %v3667_v29 = vpop.permute.xlu1 %3666 }
 0xade   :  { %v3669_v48 = vunpack.i.h.bf16 %v3667_v29  ;;  %v3668_v56 = vunpack.i.l.bf16 %v3667_v29 }
 0xadf   :  { %v2806_v63 = vsel %vm2803_vm4, %v2789_v27, %v3673_v55  ;;  %v2807_v3 = vsel %vm2803_vm4, %v2790_v8, %v3674_v4  ;;  %v5799_v55 = vld [vmem:[#allocation33_spill] sm:$0xff] }
 0xae0   :  { %v2821_v61 = vpack.c.bf16 %v2807_v3, %v2806_v63  ;;  %v2804_v41 = vsel %vm2803_vm4, %v2787_v52, %v3668_v56  ;;  %v2805_v46 = vsel %vm2803_vm4, %v2788_v7, %v3669_v48  ;;  %v3682_v42 = vpop.permute.xlu0 %3681  ;;  %v856_v29 = vmul.f32 %v4016_v14, %v5799_v55  ;;  %v4018_v52 = vpop.eup %4017 }
 0xae1   :  { %v2820_v6 = vpack.c.bf16 %v2805_v46, %v2804_v41  ;;  %v3677_v60 = vpop.permute.xlu1 %3676  ;;  %v3684_v39 = vunpack.i.h.bf16 %v3682_v42  ;;  %v3683_v32 = vunpack.i.l.bf16 %v3682_v42  ;;  %v4020_v46 = vpop.eup %4019 }
 0xae2   :  { %v3679_v44 = vunpack.i.h.bf16 %v3677_v60  ;;  %v3678_v10 = vunpack.i.l.bf16 %v3677_v60 }
 0xae3   :  { %3576 = vmatprep.mubr.msk.bf16.mxu1 %vm166_vm0, %v2820_v6  ;;  %v2777_v34 = vsel %vm308_vm1, %v5474_v36, %v3684_v39  ;;  %v2776_v25 = vsel %vm308_vm1, %v5453_v15, %v3683_v32  ;;  %v4022_v39 = vpop.eup %4021 }
 0xae4   :  { %v3692_v12 = vpop.permute.xlu0 %3691  ;;  %3577 = vmatmul.mubr.msk.bf16.vlgmr.msra.gmra.mrb[56].mxu1 %vm166_vm0, %v2821_v61  ;;  %v2775_v24 = vsel %vm308_vm1, %v5471_v16, %v3679_v44  ;;  %v2774_v5 = vsel %vm308_vm1, %v5442_v28, %v3678_v10  ;;  %v4024_v44 = vpop.eup %4023 }
 0xae5   :  { %v3687_v53 = vpop.permute.xlu1 %3686  ;;  %v3694_v11 = vunpack.i.h.bf16 %v3692_v12  ;;  %v3693_v40 = vunpack.i.l.bf16 %v3692_v12 }
 0xae6   :  { %v3689_v22 = vunpack.i.h.bf16 %v3687_v53  ;;  %v3688_v33 = vunpack.i.l.bf16 %v3687_v53 }
 0xae7   :  { %v2793_v57 = vsel %vm2786_vm3, %v2776_v25, %v3693_v40  ;;  %v2794_v21 = vsel %vm2786_vm3, %v2777_v34, %v3694_v11 }
 0xae8   :  { %v3702_v45 = vpop.permute.xlu0 %3701  ;;  %v2792_v36 = vsel %vm2786_vm3, %v2775_v24, %v3689_v22  ;;  %v2791_v15 = vsel %vm2786_vm3, %v2774_v5, %v3688_v33  ;;  %v5800_v24 = vld [vmem:[#allocation37_spill] sm:$0xff] }
 0xae9   :  { %v3704_v35 = vunpack.i.h.bf16 %v3702_v45  ;;  %v3703_v23 = vunpack.i.l.bf16 %v3702_v45  ;;  %v3697_v62 = vpop.permute.xlu1 %3696  ;;  %v860_v5 = vmul.f32 %v4020_v46, %v5800_v24 }
 0xaea   :  { %v3699_v51 = vunpack.i.h.bf16 %v3697_v62  ;;  %v3698_v50 = vunpack.i.l.bf16 %v3697_v62 }
 0xaeb   :  { %v2810_v58 = vsel %vm2803_vm4, %v2793_v57, %v3703_v23  ;;  %v2811_v16 = vsel %vm2803_vm4, %v2794_v21, %v3704_v35  ;;  %v5801_v35 = vld [vmem:[#allocation39_spill] sm:$0xff]  ;;  %v5802_v21 = vld [vmem:[#allocation40_spill] sm:$0xff] }
 0xaec   :  { %v2823_v20 = vpack.c.bf16 %v2811_v16, %v2810_v58  ;;  %v2809_v28 = vsel %vm2803_vm4, %v2792_v36, %v3699_v51  ;;  %v2808_v54 = vsel %vm2803_vm4, %v2791_v15, %v3698_v50  ;;  %v3712_v38 = vpop.permute.xlu0 %3711  ;;  %v861_v23 = vmul.f32 %v4022_v39, %v5801_v35  ;;  %v5803_v50 = vld [vmem:[#allocation38_spill] sm:$0xff] }
 0xaed   :  { %v2822_v47 = vpack.c.bf16 %v2809_v28, %v2808_v54  ;;  %v3707_v59 = vpop.permute.xlu1 %3706  ;;  %v3714_v26 = vunpack.i.h.bf16 %v3712_v38  ;;  %v3713_v13 = vunpack.i.l.bf16 %v3712_v38  ;;  %v859_v51 = vmul.f32 %v4024_v44, %v5802_v21 }
 0xaee   :  { %v3709_v17 = vunpack.i.h.bf16 %v3707_v59  ;;  %v3708_v31 = vunpack.i.l.bf16 %v3707_v59  ;;  %v858_v36 = vmul.f32 %v4018_v52, %v5803_v50 }
 0xaef   :  { %3580 = vmatprep.mubr.msk.bf16.mxu1 %vm166_vm0, %v2822_v47  ;;  %v2781_v48 = vsel %vm308_vm1, %v5497_v1, %v3714_v26  ;;  %v2780_v37 = vsel %vm308_vm1, %v856_v29, %v3713_v13 }
 0xaf0   :  { %v3722_v19 = vpop.permute.xlu0 %3721  ;;  %3581 = vmatmul.mubr.msk.bf16.gmra.mrb[60].mxu1 %vm166_vm0, %v2823_v20  ;;  %v2779_v43 = vsel %vm308_vm1, %v5480_v18, %v3709_v17  ;;  %v2778_v7 = vsel %vm308_vm1, %v5461_v30, %v3708_v31 }
 0xaf1   :  { %v3717_v49 = vpop.permute.xlu1 %3716  ;;  %v3723_v4 = vunpack.i.l.bf16 %v3722_v19  ;;  %v3724_v27 = vunpack.i.h.bf16 %v3722_v19 }
 0xaf2   :  { %v3719_v2 = vunpack.i.h.bf16 %v3717_v49  ;;  %v3718_v8 = vunpack.i.l.bf16 %v3717_v49 }
 0xaf3   :  { %v2797_v63 = vsel %vm2786_vm3, %v2780_v37, %v3723_v4  ;;  %v2798_v42 = vsel %vm2786_vm3, %v2781_v48, %v3724_v27 }
 0xaf4   :  { %v3732_v0 = vpop.permute.xlu0 %3731  ;;  %v2796_v1 = vsel %vm2786_vm3, %v2779_v43, %v3719_v2  ;;  %v2795_v18 = vsel %vm2786_vm3, %v2778_v7, %v3718_v8  ;;  %v3137_v2 = vld [vmem:[%s5659_s4] ss:$0 sm:$0xff]  ;;  %s4138_s4 = smov [#allocation8]  }
 0xaf5   :  { %v3727_v9 = vpop.permute.xlu1 %3726  ;;  %v3734_v32 = vunpack.i.h.bf16 %v3732_v0  ;;  %v3733_v10 = vunpack.i.l.bf16 %v3732_v0  ;;  %s3049_s21 = sshll.u32 %s4138_s4, 4  ;;  %s3050_s21 = int_to_ptr.vmem [resolvable:$true] %s3049_s21 }
 0xaf6   :  { %v3729_v33 = vunpack.i.h.bf16 %v3727_v9  ;;  %v3728_v34 = vunpack.i.l.bf16 %v3727_v9  ;;  %s4091_s22 = scalar_lea.vmem %s3050_s21, 1024  ;;  %p4096_p11 = scmp.lt.s32.totalorder %s3050_s21, %s3050_s21 }
 0xaf7   :  { %v2785_v16 = vsel %vm308_vm1, %v861_v23, %v3734_v32  ;;  %v2784_v20 = vsel %vm308_vm1, %v860_v5, %v3733_v10  ;;  %p4092_p10 = scmp.ne.s32.totalorder %s3050_s21, %s4091_s22  ;;  %p4097_p12 = scmp.lt.s32.totalorder %s4091_s22, %s4091_s22 }
 0xaf8   :  { %v3737_v56 = vpop.permute.xlu0 %3736  ;;  %v2783_v54 = vsel %vm308_vm1, %v859_v51, %v3729_v33  ;;  %v2782_v38 = vsel %vm308_vm1, %v858_v36, %v3728_v34 }
 0xaf9   :  { %v3739_v3 = vunpack.i.h.bf16 %v3737_v56  ;;  %v3738_v61 = vunpack.i.l.bf16 %v3737_v56  ;;  %v3742_v41 = vpop.permute.xlu1 %3741  ;;  %p4098_p13 = por %p4097_p12, %p4096_p11 }
 0xafa   :  { %v3744_v6 = vunpack.i.h.bf16 %v3742_v41  ;;  %v3743_v60 = vunpack.i.l.bf16 %v3742_v41 }
 0xafb   :  { %v2814_v12 = vsel %vm2803_vm4, %v2797_v63, %v3738_v61  ;;  %v2815_v30 = vsel %vm2803_vm4, %v2798_v42, %v3739_v3  ;;  %p4099_p0 = pnand %p4098_p13, %p4092_p10 }
 0xafc   :  { %v2825_v53 = vpack.c.bf16 %v2815_v30, %v2814_v12  ;;  %v2813_v11 = vsel %vm2803_vm4, %v2796_v1, %v3744_v6  ;;  %v2812_v40 = vsel %vm2803_vm4, %v2795_v18, %v3743_v60  ;;  %v3752_v22 = vpop.permute.xlu0 %3751 }
 0xafd   :  { %v2824_v25 = vpack.c.bf16 %v2813_v11, %v2812_v40  ;;  %v3747_v45 = vpop.permute.xlu1 %3746  ;;  %v3754_v62 = vunpack.i.h.bf16 %v3752_v22  ;;  %v3753_v57 = vunpack.i.l.bf16 %v3752_v22 }
 0xafe   :  { %v3749_v15 = vunpack.i.h.bf16 %v3747_v45  ;;  %v3748_v58 = vunpack.i.l.bf16 %v3747_v45 }
 0xaff   :  { %3584 = vmatprep.mubr.msk.bf16.mxu1 %vm166_vm0, %v2824_v25  ;;  %v2801_v49 = vsel %vm2786_vm3, %v2784_v20, %v3753_v57  ;;  %v2802_v14 = vsel %vm2786_vm3, %v2785_v16, %v3754_v62 }
 0xb00   :  { %v3762_v28 = vpop.permute.xlu0 %3761  ;;  %3585 = vmatmul.mubr.msk.bf16.gmra.mrb[64].mxu1 %vm166_vm0, %v2825_v53  ;;  %v2800_v17 = vsel %vm2786_vm3, %v2783_v54, %v3749_v15  ;;  %v2799_v0 = vsel %vm2786_vm3, %v2782_v38, %v3748_v58 }
 0xb01   :  { %v3764_v47 = vunpack.i.h.bf16 %v3762_v28  ;;  %v3763_v59 = vunpack.i.l.bf16 %v3762_v28  ;;  %v3757_v19 = vpop.permute.xlu1 %3756 }
 0xb02   :  { %v3759_v26 = vunpack.i.h.bf16 %v3757_v19  ;;  %v3758_v13 = vunpack.i.l.bf16 %v3757_v19 }
 0xb03   :  { %v2818_v31 = vsel %vm2803_vm4, %v2801_v49, %v3763_v59  ;;  %v2819_v4 = vsel %vm2803_vm4, %v2802_v14, %v3764_v47 }
 0xb04   :  { %v2827_v9 = vpack.c.bf16 %v2819_v4, %v2818_v31  ;;  %v2817_v55 = vsel %vm2803_vm4, %v2800_v17, %v3759_v26  ;;  %v2816_v29 = vsel %vm2803_vm4, %v2799_v0, %v3758_v13 }
 0xb05   :  { %v2826_v27 = vpack.c.bf16 %v2817_v55, %v2816_v29 }
 0xb07   :  { %3588 = vmatprep.mubr.msk.bf16.mxu1 %vm166_vm0, %v2826_v27 }
 0xb08   :  { %3589 = vmatmul.mubr.msk.bf16.gmra.mrb[68].mxu1 %vm166_vm0, %v2827_v9 }
 0xbb7   :  { %v3578_v8 = vpop.f32.mrb[56].mxu1 }
 0xbb8   :  { %v2909_v48 = vpop.f32.mrb[57].mxu1  ;;  %v2918_v7 = vadd.f32 %v3578_v8, %v3137_v2 }
 0xbb9   :  { %v2910_v37 = vadd.f32 %v3137_v2, %v2909_v48  ;;  %v3579_v43 = vpop.f32.mrb[58].mxu1 }
 0xbba   :  { %v2912_v56 = vpop.f32.mrb[59].mxu1  ;;  %v2921_v61 = vadd.f32 %v3579_v43, %v3137_v2 }
 0xbbb   :  { %2972 = vxpose.xlu1.b32.start [1/8] (short) (narrow) %v2910_v37, 32  ;;  %v2913_v52 = vadd.f32 %v3137_v2, %v2912_v56 }
 0xbbf   :  { %2973 = vxpose.xlu1.b32.cont [2/8] (short) (narrow) %v2913_v52, 32 }
 0xbc3   :  { %v3582_v63 = vpop.f32.mrb[60].mxu1  ;;  %2974 = vxpose.xlu1.b32.cont [3/8] (short) (narrow) %v2918_v7, 32 }
 0xbc4   :  { %v2925_v3 = vpop.f32.mrb[61].mxu1  ;;  %v2934_v6 = vadd.f32 %v3582_v63, %v3137_v2 }
 0xbc5   :  { %v3583_v41 = vpop.f32.mrb[62].mxu1  ;;  %v2926_v42 = vadd.f32 %v3137_v2, %v2925_v3 }
 0xbc6   :  { %v2928_v46 = vpop.f32.mrb[63].mxu1  ;;  %v2937_v18 = vadd.f32 %v3583_v41, %v3137_v2 }
 0xbc7   :  { %2975 = vxpose.xlu1.b32.cont [4/8] (short) (narrow) %v2921_v61, 32  ;;  %v2929_v1 = vadd.f32 %v3137_v2, %v2928_v46 }
 0xbcb   :  { %2976 = vxpose.xlu1.b32.cont [5/8] (short) (narrow) %v2926_v42, 32 }
 0xbcf   :  { %2977 = vxpose.xlu1.b32.cont [6/8] (short) (narrow) %v2929_v1, 32 }
 0xbd3   :  { %v3586_v60 = vpop.f32.mrb[64].mxu1  ;;  %2978 = vxpose.xlu1.b32.cont [7/8] (short) (narrow) %v2934_v6, 32 }
 0xbd4   :  { %v2941_v39 = vpop.f32.mrb[65].mxu1  ;;  %v2950_v11 = vadd.f32 %v3586_v60, %v3137_v2 }
 0xbd5   :  { %v2942_v32 = vadd.f32 %v3137_v2, %v2941_v39  ;;  %v3587_v12 = vpop.f32.mrb[66].mxu1 }
 0xbd6   :  { %v2944_v30 = vpop.f32.mrb[67].mxu1  ;;  %v2953_v33 = vadd.f32 %v3587_v12, %v3137_v2 }
 0xbd7   :  { %3004 = vxpose.xlu0.b32.start [1/8] (short) (narrow) %v2942_v32, 32  ;;  %2979 = vxpose.xlu1.b32.end [8/8] (short) (narrow) %v2937_v18, 32  ;;  %v2945_v44 = vadd.f32 %v3137_v2, %v2944_v30 }
 0xbdb   :  { %v3590_v10 = vpop.f32.mrb[68].mxu1  ;;  %3005 = vxpose.xlu0.b32.cont [2/8] (short) (narrow) %v2945_v44, 32 }
 0xbdc   :  { %v2957_v53 = vpop.f32.mrb[69].mxu1  ;;  %v2966_v45 = vadd.f32 %v3590_v10, %v3137_v2 }
 0xbdd   :  { %v3591_v40 = vpop.f32.mrb[70].mxu1  ;;  %v2958_v34 = vadd.f32 %v3137_v2, %v2957_v53 }
 0xbde   :  { %v2960_v22 = vpop.f32.mrb[71].mxu1  ;;  %v2969_v24 = vadd.f32 %v3591_v40, %v3137_v2 }
 0xbdf   :  { %3006 = vxpose.xlu0.b32.cont [3/8] (short) (narrow) %v2950_v11, 32  ;;  %v2961_v25 = vadd.f32 %v3137_v2, %v2960_v22 }
 0xbe3   :  { %3007 = vxpose.xlu0.b32.cont [4/8] (short) (narrow) %v2953_v33, 32 }
 0xbe7   :  { %3008 = vxpose.xlu0.b32.cont [5/8] (short) (narrow) %v2958_v34, 32 }
 0xbeb   :  { %3009 = vxpose.xlu0.b32.cont [6/8] (short) (narrow) %v2961_v25, 32 }
 0xbef   :  { %3010 = vxpose.xlu0.b32.cont [7/8] (short) (narrow) %v2966_v45, 32 }
 0xbf3   :  { %3011 = vxpose.xlu0.b32.end [8/8] (short) (narrow) %v2969_v24, 32 }
 0xc3b   :  { %v2988_v5 = vpop.trf.xlu1 }
 0xc3c   :  { %3036 = vst.msk [vmem:[#allocation8] sm:$0xff] %vm499_vm2, %v2988_v5 }
 0xc3f   :  { %v2989_v35 = vpop.trf.xlu1 }
 0xc40   :  { %3037 = vst.msk [vmem:[#allocation8 + $0x8] sm:$0xff] %vm499_vm2, %v2989_v35 }
 0xc43   :  { %v2990_v23 = vpop.trf.xlu1 }
 0xc44   :  { %3038 = vst.msk [vmem:[#allocation8 + $0x10] sm:$0xff] %vm499_vm2, %v2990_v23 }
 0xc47   :  { %v2991_v62 = vpop.trf.xlu1 }
 0xc48   :  { %3039 = vst.msk [vmem:[#allocation8 + $0x18] sm:$0xff] %vm499_vm2, %v2991_v62 }
 0xc57   :  { %v3020_v57 = vpop.trf.xlu0 }
 0xc58   :  { %3040 = vst.msk [vmem:[#allocation8 + $0x20] sm:$0xff] %vm499_vm2, %v3020_v57 }
 0xc5b   :  { %v3021_v21 = vpop.trf.xlu0 }
 0xc5c   :  { %3041 = vst.msk [vmem:[#allocation8 + $0x28] sm:$0xff] %vm499_vm2, %v3021_v21 }
 0xc5f   :  { %v3022_v51 = vpop.trf.xlu0 }
 0xc60   :  { %3042 = vst.msk [vmem:[#allocation8 + $0x30] sm:$0xff] %vm499_vm2, %v3022_v51 }
 0xc63   :  { %v3023_v50 = vpop.trf.xlu0 }
 0xc64   :  { %3043 = vst.msk [vmem:[#allocation8 + $0x38] sm:$0xff] %vm499_vm2, %v3023_v50 }
 0xc65   :  { %4102 = shalt.err (!%p4099_p0)
}
 0xc66   :  { %s4103_s25 = scalar_lea.hbm %s5660_s5, 1024 }
 0xc67   :  { %p4104_p1 = scmp.ne.s32.totalorder %s5660_s5, %s4103_s25  ;;  %p4107_p2 = scmp.lt.u32.totalorder %s4103_s25, %s5660_s5 }
 0xc69   :  { %p4109_p3 = pnand %p4107_p2, %p4104_p1 }
 0xc6b   :  { %4112 = shalt.err (!%p4109_p3)
}
 0xc6c   :  { %3055 = dma.vmem_to_hbm [thread:$0]  %s3050_s21, 1024, %s5660_s5, [#allocation4], %s4123_s1, %s4123_s1, %s4124_s17  }
 0xc6d   :  { %4117 = dma.done.wait [#allocation4], 1024  }
 0xc6e   :  { %4118 = vsyncadd [#allocation4], 4294966272 }
 0xc6f   :  { %3059 = vsyncpa [#allocation3], 1 }
 0xc70   :  { %3060 = vsyncpa [#allocation6], 1 }
 0xc71   :  { %3061 = vsyncpa [#allocation4], 1 }

</bundles_post_ra>
